<compile_context>
chip_gen: v5e
topology: v5e:2x2
jax: 0.10.0
libtpu: 0.0.40
codegen_flags: <defaults>
</compile_context>

<pallas_src>
import functools

import jax
import jax.numpy as jnp
import numpy as np
from jax import lax
from jax.experimental import pallas as pl
from jax.experimental.pallas import tpu as pltpu

KH = KW = 3      # ConvolutionBlock: Conv2d(kernel_size=3, stride=1, padding=0) x2
LANE = 128       # TPU lane width: out-channels are zero-padded to this -> dense stores


def _round_up(x, m):
    return (x + m - 1) // m * m


# ---------------------------------------------------------------------------
# Kernel 1: ConvTranspose2d(kernel_size=2, stride=2) == per-pixel channel matmul.
# The pixel shuffle to (2H, 2W) is pure layout and is done wrapper-side.
# ---------------------------------------------------------------------------
def upsample_kernel(x_ref, w_ref, b_ref, o_ref):
    # x_ref: (TM, Cin)  w_ref: (Cin, CUP)  b_ref: (1, CUP)  o_ref: (TM, CUP)
    o_ref[...] = (
        jnp.dot(x_ref[...], w_ref[...], preferred_element_type=jnp.float32)
        + b_ref[...]
    ).astype(o_ref.dtype)


# ---------------------------------------------------------------------------
# Kernel 2: fused Conv3x3(valid) -> ReLU -> Conv3x3(valid) -> ReLU, one image
# per grid step.  The image is row-flattened (row r = i*width + j, channels on
# lanes), so a 3x3 tap (kh, kw) is just the rows shifted by kh*width + kw and
# each tap is a single 2-D (rows, Cin) @ (Cin, Cout) matmul on the MXU
# (9 matmuls per conv instead of 9*Cin VPU broadcast-MACs).  Rows whose column
# falls in the right margin are garbage and get cropped wrapper-side.
# ---------------------------------------------------------------------------
def double_conv_kernel(x_ref, w1_ref, b1_ref, w2_ref, b2_ref, o_ref, *, width):
    Cin = x_ref.shape[-1]
    M2, Cq = o_ref.shape                      # rows kept after conv2, padded out-chans
    off = (KH - 1) * width + (KW - 1)         # largest tap shift (2*W + 2)
    M1 = M2 + off                             # conv1 rows needed by conv2's taps

    # Hoisted loads: x and both whole weight matrices are read exactly once.
    x = x_ref[...]                            # (M1 + off, Cin)
    w1 = w1_ref[...]                          # (KH*KW*Cin, Cq)
    w2 = w2_ref[...]                          # (KH*KW*Cq,  Cq)
    b1 = b1_ref[...]                          # (1, Cq)
    b2 = b2_ref[...]                          # (1, Cq)

    # conv1: 9 MXU matmuls, one per tap (static slices -> no dynamic indexing).
    acc1 = jnp.zeros((M1, Cq), jnp.float32)
    for kh in range(KH):
        for kw in range(KW):
            o = kh * width + kw
            tap = x[o:o + M1, :]                                        # (M1, Cin)
            wt = w1[(kh * KW + kw) * Cin:(kh * KW + kw + 1) * Cin, :]   # (Cin, Cq)
            acc1 = acc1 + jnp.dot(tap, wt, preferred_element_type=jnp.float32)
    h1 = jnp.maximum(acc1 + b1, 0.0)                                    # (M1, Cq)

    # conv2: 9 MXU matmuls on the intermediate feature map (never leaves VMEM).
    acc2 = jnp.zeros((M2, Cq), jnp.float32)
    for kh in range(KH):
        for kw in range(KW):
            o = kh * width + kw
            tap = h1[o:o + M2, :]                                       # (M2, Cq)
            wt = w2[(kh * KW + kw) * Cq:(kh * KW + kw + 1) * Cq, :]     # (Cq, Cq)
            acc2 = acc2 + jnp.dot(tap, wt, preferred_element_type=jnp.float32)
    # bias + ReLU epilogue rides the VPU; store is fully lane-dense (Cq = 128*k).
    o_ref[...] = jnp.maximum(acc2 + b2, 0.0).astype(o_ref.dtype)


# ---------------------------------------------------------------------------
# Wrappers (NCHW public interface, parameter repacking, layout glue).
# ---------------------------------------------------------------------------
def _pack_conv_weights(w_oihw, cin_pad, cout_pad):
    """(Cout, Cin, KH, KW) OIHW -> (KH*KW*cin_pad, cout_pad), zero-padded."""
    cout, cin = w_oihw.shape[0], w_oihw.shape[1]
    w = jnp.transpose(w_oihw, (2, 3, 1, 0))                    # (KH, KW, Cin, Cout)
    w = jnp.pad(w, ((0, 0), (0, 0), (0, cin_pad - cin), (0, cout_pad - cout)))
    return w.reshape(KH * KW * cin_pad, cout_pad)


def _upsample_pallas(x_nchw, w_up, b_up):
    """nn.ConvTranspose2d(Cin, Cout, kernel_size=2, stride=2); returns NHWC."""
    N, Cx, h, w = x_nchw.shape
    Cco = w_up.shape[1]
    cols = 4 * Cco                                   # (a, b, co) output columns
    cup = _round_up(cols, LANE)                      # pad to lane width -> dense stores

    # weight (Cin, Cout, 2, 2) -> (Cin, a, b, Cout) -> (Cin, 4*Cout), lane-padded
    w_mat = jnp.transpose(w_up, (0, 2, 3, 1)).reshape(Cx, cols)
    w_mat = jnp.pad(w_mat, ((0, 0), (0, cup - cols)))
    b_row = jnp.pad(jnp.tile(b_up, 4), (0, cup - cols)).reshape(1, cup)

    x_mat = jnp.transpose(x_nchw, (0, 2, 3, 1)).reshape(N * h * w, Cx)
    m = N * h * w
    # one grid step for small inputs, 512-row tiles for large ones
    tm = min(512, _round_up(m, 8))
    mp = _round_up(m, tm)
    x_mat = jnp.pad(x_mat, ((0, mp - m), (0, 0)))

    y = pl.pallas_call(
        upsample_kernel,
        out_shape=jax.ShapeDtypeStruct((mp, cup), jnp.float32),
        grid_spec=pltpu.PrefetchScalarGridSpec(
            num_scalar_prefetch=0,
            grid=(mp // tm,),
            in_specs=[
                pl.BlockSpec((tm, Cx), lambda i: (i, 0)),
                pl.BlockSpec((Cx, cup), lambda i: (0, 0)),
                pl.BlockSpec((1, cup), lambda i: (0, 0)),
            ],
            out_specs=pl.BlockSpec((tm, cup), lambda i: (i, 0)),
        ),
        compiler_params=pltpu.CompilerParams(dimension_semantics=("parallel",)),
    )(x_mat, w_mat, b_row)

    # pixel shuffle (pure layout, XLA): (N*h*w, 4*Cco) -> (N, 2h, 2w, Cco)
    y = y[:m, :cols].reshape(N, h, w, 2, 2, Cco)
    y = jnp.transpose(y, (0, 1, 3, 2, 4, 5)).reshape(N, 2 * h, 2 * w, Cco)
    return y


def _double_conv_pallas(x_nhwc, w1_mat, b1_row, w2_mat, b2_row):
    """Fused Conv3x3 -> ReLU -> Conv3x3 -> ReLU (valid padding); NHWC in/out."""
    N, H, W, Cin = x_nhwc.shape
    Cq = w1_mat.shape[1]
    Ho2, Wo2 = H - 2 * (KH - 1), W - 2 * (KW - 1)
    off = (KH - 1) * W + (KW - 1)
    M2 = Ho2 * W                  # keep full-width rows; right margin cropped below
    rx = M2 + 2 * off             # flat input rows the kernel touches (= H*W + 4)

    x_flat = x_nhwc.reshape(N, H * W, Cin)
    x_flat = jnp.pad(x_flat, ((0, 0), (0, rx - H * W), (0, 0)))

    # TODO(synk): for production-sized images / v7x's 64 MiB VMEM, row-tile the
    # flat rows (halo = 2*W + 2 via manual DMA) instead of whole-image blocks;
    # at these sizes whole-image blocks fit comfortably in default scoped VMEM.
    out_flat = pl.pallas_call(
        functools.partial(double_conv_kernel, width=W),
        out_shape=jax.ShapeDtypeStruct((N, M2, Cq), jnp.float32),
        grid_spec=pltpu.PrefetchScalarGridSpec(
            num_scalar_prefetch=0,
            grid=(N,),                      # one image per step, sharded across TCs
            in_specs=[
                pl.BlockSpec((None, rx, Cin), lambda n: (n, 0, 0)),
                pl.BlockSpec(w1_mat.shape, lambda n: (0, 0)),
                pl.BlockSpec(b1_row.shape, lambda n: (0, 0)),
                pl.BlockSpec(w2_mat.shape, lambda n: (0, 0)),
                pl.BlockSpec(b2_row.shape, lambda n: (0, 0)),
            ],
            out_specs=pl.BlockSpec((None, M2, Cq), lambda n: (n, 0, 0)),
        ),
        compiler_params=pltpu.CompilerParams(dimension_semantics=("parallel",)),
    )(x_flat, w1_mat, b1_row, w2_mat, b2_row)

    # (N, Ho2*W, Cq) -> (N, Ho2, W, Cq); drop the garbage right-margin columns.
    return out_flat.reshape(N, Ho2, W, Cq)[:, :, :Wo2, :]


@jax.jit
def expanding_block(cc_input, x, w_up, b_up, w1, b1, w2, b2):
    """JAX/Pallas equivalent of ExpandingBlock.forward (NCHW in, NCHW out)."""
    cout, cin = w1.shape[0], w1.shape[1]

    # 1) upsample: ConvTranspose2d(kernel_size=2, stride=2)
    up = _upsample_pallas(x, w_up, b_up)                  # (N, 2h, 2w, Cout) NHWC
    th, tw = up.shape[1], up.shape[2]

    # 2) center-crop the skip connection, 3) concat along channels (layout glue)
    hc, wc = cc_input.shape[-2], cc_input.shape[-1]
    top, left = (hc - th) // 2, (wc - tw) // 2            # torchvision center_crop
    cc = jnp.transpose(cc_input[:, :, top:top + th, left:left + tw], (0, 2, 3, 1))
    x_cat = jnp.concatenate([up, cc], axis=-1)            # (N, th, tw, cin) NHWC
    assert x_cat.shape[-1] == cin, (x_cat.shape, cin)

    # 4) ConvolutionBlock: fused double conv, out-channels padded to 128 lanes
    cq = _round_up(cout, LANE)
    w1_mat = _pack_conv_weights(w1, cin, cq)              # (9*cin, cq)
    w2_mat = _pack_conv_weights(w2, cq, cq)               # (9*cq,  cq)
    b1_row = jnp.pad(b1, (0, cq - cout)).reshape(1, cq)
    b2_row = jnp.pad(b2, (0, cq - cout)).reshape(1, cq)

    y = _double_conv_pallas(x_cat, w1_mat, b1_row, w2_mat, b2_row)
    return jnp.transpose(y[..., :cout], (0, 3, 1, 2))     # back to NCHW


@jax.jit
def _reference(cc, x, w_up, b_up, w1, b1, w2, b2):
    """Pure-JAX reference of ExpandingBlock.forward (for the correctness check)."""
    N, Cx, h, w = x.shape
    Cco = w_up.shape[1]
    up = jnp.einsum("ncij,cdab->ndiajb", x, w_up).reshape(N, Cco, 2 * h, 2 * w)
    up = up + b_up[None, :, None, None]
    th, tw = 2 * h, 2 * w
    hc, wc = cc.shape[-2], cc.shape[-1]
    top, left = (hc - th) // 2, (wc - tw) // 2
    y = jnp.concatenate([up, cc[:, :, top:top + th, left:left + tw]], axis=1)
    dn = ("NCHW", "OIHW", "NCHW")
    y = lax.conv_general_dilated(y, w1, (1, 1), "VALID", dimension_numbers=dn)
    y = jnp.maximum(y + b1[None, :, None, None], 0.0)
    y = lax.conv_general_dilated(y, w2, (1, 1), "VALID", dimension_numbers=dn)
    y = jnp.maximum(y + b2[None, :, None, None], 0.0)
    return y


if __name__ == "__main__":
    # ExpandingBlock(in_channels=8, out_channels=4):
    #   x  (2, 8,  8,  8) --ConvTranspose2d(8->4, k2, s2)--> (2, 4, 16, 16)
    #   cc (2, 4, 20, 20) --center_crop-->                   (2, 4, 16, 16)
    #   concat -> (2, 8, 16, 16) --ConvolutionBlock(8->4)--> (2, 4, 12, 12)
    N, in_ch, out_ch = 2, 8, 4
    h, w = 8, 8
    hc, wc = 20, 20

    key = jax.random.PRNGKey(0)
    kx, kc, k0, k1, k2, k3, k4, k5 = jax.random.split(key, 8)

    x = jax.random.normal(kx, (N, in_ch, h, w), jnp.float32)
    cc = jax.random.normal(kc, (N, in_ch - out_ch, hc, wc), jnp.float32)

    fan_up = in_ch * 2 * 2
    fan1 = in_ch * KH * KW
    fan2 = out_ch * KH * KW
    w_up = jax.random.uniform(k0, (in_ch, out_ch, 2, 2), jnp.float32, -1.0, 1.0) / np.sqrt(fan_up)
    b_up = jax.random.uniform(k1, (out_ch,), jnp.float32, -1.0, 1.0) / np.sqrt(fan_up)
    w1 = jax.random.uniform(k2, (out_ch, in_ch, KH, KW), jnp.float32, -1.0, 1.0) / np.sqrt(fan1)
    b1 = jax.random.uniform(k3, (out_ch,), jnp.float32, -1.0, 1.0) / np.sqrt(fan1)
    w2 = jax.random.uniform(k4, (out_ch, out_ch, KH, KW), jnp.float32, -1.0, 1.0) / np.sqrt(fan2)
    b2 = jax.random.uniform(k5, (out_ch,), jnp.float32, -1.0, 1.0) / np.sqrt(fan2)

    out = jax.block_until_ready(expanding_block(cc, x, w_up, b_up, w1, b1, w2, b2))
    assert out.shape == (N, out_ch, 2 * h - 4, 2 * w - 4), out.shape

    ref = jax.block_until_ready(_reference(cc, x, w_up, b_up, w1, b1, w2, b2))
    # tolerance accounts for MXU default matmul precision vs. the XLA conv reference
    np.testing.assert_allclose(np.asarray(out), np.asarray(ref), rtol=1e-2, atol=1e-2)

    print("KERNEL_OK")
</pallas_src>

<mosaic_0001>
module attributes {stable_mosaic.version = 11 : i64} {
  func.func @upsample_kernel(%arg0: i32, %arg1: memref<128x8xf32, #tpu.memory_space<vmem>>, %arg2: memref<8x128xf32, #tpu.memory_space<vmem>>, %arg3: memref<1x128xf32, #tpu.memory_space<vmem>>, %arg4: memref<128x128xf32, #tpu.memory_space<vmem>>) attributes {dimension_semantics = [#tpu.dimension_semantics<parallel>], iteration_bounds = array<i64: 1>, scalar_prefetch = 0 : i64, scratch_operands = 0 : i64, tpu.core_type = #tpu.core_type<tc>, window_params = [{transform_indices = @transform_0, window_bounds = array<i64: 128, 8>}, {pipeline_mode = #tpu.pipeline_mode<synchronous>, transform_indices = @transform_1, window_bounds = array<i64: 8, 128>}, {pipeline_mode = #tpu.pipeline_mode<synchronous>, transform_indices = @transform_2, window_bounds = array<i64: 1, 128>}, {transform_indices = @transform_3, window_bounds = array<i64: 128, 128>}]} {
    %c0 = arith.constant 0 : index
    %c0_0 = arith.constant 0 : index
    %0 = vector.load %arg1[%c0, %c0_0] : memref<128x8xf32, #tpu.memory_space<vmem>>, vector<128x8xf32>
    %c0_1 = arith.constant 0 : index
    %c0_2 = arith.constant 0 : index
    %1 = vector.load %arg2[%c0_1, %c0_2] : memref<8x128xf32, #tpu.memory_space<vmem>>, vector<8x128xf32>
    %cst = arith.constant dense<0.000000e+00> : vector<128x128xf32>
    %2 = tpu.matmul %0, %1, %cst {dimension_numbers = #tpu.dot_dimension_numbers<[1], [0], [0], [1], [0, 0, 1, 1], [], []>} : vector<128x8xf32>, vector<8x128xf32>, vector<128x128xf32> -> vector<128x128xf32>
    %c0_3 = arith.constant 0 : index
    %c0_4 = arith.constant 0 : index
    %3 = vector.load %arg3[%c0_3, %c0_4] : memref<1x128xf32, #tpu.memory_space<vmem>>, vector<1x128xf32>
    %4 = vector.broadcast %3 : vector<1x128xf32> to vector<128x128xf32>
    %5 = arith.addf %2, %4 : vector<128x128xf32>
    %c0_5 = arith.constant 0 : index
    %c0_6 = arith.constant 0 : index
    %6 = vector.load %arg4[%c0_5, %c0_6] : memref<128x128xf32, #tpu.memory_space<vmem>>, vector<128x128xf32>
    tpu.vector_store %arg4[%c0_5, %c0_6], %5 {strides = array<i32>} : memref<128x128xf32, #tpu.memory_space<vmem>>, vector<128x128xf32>,
    return
  }
  func.func @transform_0(%arg0: i32) -> (i32, i32) {
    %c0_i32 = arith.constant 0 : i32
    %c0_i32_0 = arith.constant 0 : i32
    return %arg0, %c0_i32 : i32, i32
  }
  func.func @transform_1(%arg0: i32) -> (i32, i32) {
    %c0_i32 = arith.constant 0 : i32
    %c0_i32_0 = arith.constant 0 : i32
    %c0_i32_1 = arith.constant 0 : i32
    return %c0_i32, %c0_i32_0 : i32, i32
  }
  func.func @transform_2(%arg0: i32) -> (i32, i32) {
    %c0_i32 = arith.constant 0 : i32
    %c0_i32_0 = arith.constant 0 : i32
    %c0_i32_1 = arith.constant 0 : i32
    return %c0_i32, %c0_i32_0 : i32, i32
  }
  func.func @transform_3(%arg0: i32) -> (i32, i32) {
    %c0_i32 = arith.constant 0 : i32
    %c0_i32_0 = arith.constant 0 : i32
    return %arg0, %c0_i32 : i32, i32
  }
}

module attributes {stable_mosaic.version = 11 : i64} {
  func.func @double_conv_kernel(%arg0: i32, %arg1: memref<1x260x8xf32, #tpu.memory_space<vmem>>, %arg2: memref<72x128xf32, #tpu.memory_space<vmem>>, %arg3: memref<1x128xf32, #tpu.memory_space<vmem>>, %arg4: memref<1152x128xf32, #tpu.memory_space<vmem>>, %arg5: memref<1x128xf32, #tpu.memory_space<vmem>>, %arg6: memref<1x192x128xf32, #tpu.memory_space<vmem>>) attributes {dimension_semantics = [#tpu.dimension_semantics<parallel>], iteration_bounds = array<i64: 2>, scalar_prefetch = 0 : i64, scratch_operands = 0 : i64, tpu.core_type = #tpu.core_type<tc>, window_params = [{transform_indices = @transform_0, window_bounds = array<i64: 1, 260, 8>}, {pipeline_mode = #tpu.pipeline_mode<synchronous>, transform_indices = @transform_1, window_bounds = array<i64: 72, 128>}, {pipeline_mode = #tpu.pipeline_mode<synchronous>, transform_indices = @transform_2, window_bounds = array<i64: 1, 128>}, {pipeline_mode = #tpu.pipeline_mode<synchronous>, transform_indices = @transform_3, window_bounds = array<i64: 1152, 128>}, {pipeline_mode = #tpu.pipeline_mode<synchronous>, transform_indices = @transform_4, window_bounds = array<i64: 1, 128>}, {transform_indices = @transform_5, window_bounds = array<i64: 1, 192, 128>}]} {
    %c0 = arith.constant 0 : index
    %c0_0 = arith.constant 0 : index
    %c0_1 = arith.constant 0 : index
    %0 = vector.load %arg1[%c0, %c0_0, %c0_1] : memref<1x260x8xf32, #tpu.memory_space<vmem>>, vector<1x260x8xf32>
    %1 = vector.shape_cast %0 : vector<1x260x8xf32> to vector<260x8xf32>
    %c0_2 = arith.constant 0 : index
    %c0_3 = arith.constant 0 : index
    %2 = vector.load %arg2[%c0_2, %c0_3] : memref<72x128xf32, #tpu.memory_space<vmem>>, vector<72x128xf32>
    %c0_4 = arith.constant 0 : index
    %c0_5 = arith.constant 0 : index
    %3 = vector.load %arg4[%c0_4, %c0_5] : memref<1152x128xf32, #tpu.memory_space<vmem>>, vector<1152x128xf32>
    %c0_6 = arith.constant 0 : index
    %c0_7 = arith.constant 0 : index
    %4 = vector.load %arg3[%c0_6, %c0_7] : memref<1x128xf32, #tpu.memory_space<vmem>>, vector<1x128xf32>
    %c0_8 = arith.constant 0 : index
    %c0_9 = arith.constant 0 : index
    %5 = vector.load %arg5[%c0_8, %c0_9] : memref<1x128xf32, #tpu.memory_space<vmem>>, vector<1x128xf32>
    %cst = arith.constant 0.000000e+00 : f32
    %6 = vector.broadcast %cst : f32 to vector<226x128xf32>
    %7 = vector.extract_strided_slice %1 {offsets = [0, 0], sizes = [226, 8], strides = [1, 1]} : vector<260x8xf32> to vector<226x8xf32>
    %8 = vector.extract_strided_slice %2 {offsets = [0, 0], sizes = [8, 128], strides = [1, 1]} : vector<72x128xf32> to vector<8x128xf32>
    %cst_10 = arith.constant dense<0.000000e+00> : vector<226x128xf32>
    %9 = tpu.matmul %7, %8, %cst_10 {dimension_numbers = #tpu.dot_dimension_numbers<[1], [0], [0], [1], [0, 0, 1, 1], [], []>} : vector<226x8xf32>, vector<8x128xf32>, vector<226x128xf32> -> vector<226x128xf32>
    %10 = arith.addf %6, %9 : vector<226x128xf32>
    %11 = vector.extract_strided_slice %1 {offsets = [1, 0], sizes = [226, 8], strides = [1, 1]} : vector<260x8xf32> to vector<226x8xf32>
    %12 = vector.extract_strided_slice %2 {offsets = [8, 0], sizes = [8, 128], strides = [1, 1]} : vector<72x128xf32> to vector<8x128xf32>
    %cst_11 = arith.constant dense<0.000000e+00> : vector<226x128xf32>
    %13 = tpu.matmul %11, %12, %cst_11 {dimension_numbers = #tpu.dot_dimension_numbers<[1], [0], [0], [1], [0, 0, 1, 1], [], []>} : vector<226x8xf32>, vector<8x128xf32>, vector<226x128xf32> -> vector<226x128xf32>
    %14 = arith.addf %10, %13 : vector<226x128xf32>
    %15 = vector.extract_strided_slice %1 {offsets = [2, 0], sizes = [226, 8], strides = [1, 1]} : vector<260x8xf32> to vector<226x8xf32>
    %16 = vector.extract_strided_slice %2 {offsets = [16, 0], sizes = [8, 128], strides = [1, 1]} : vector<72x128xf32> to vector<8x128xf32>
    %cst_12 = arith.constant dense<0.000000e+00> : vector<226x128xf32>
    %17 = tpu.matmul %15, %16, %cst_12 {dimension_numbers = #tpu.dot_dimension_numbers<[1], [0], [0], [1], [0, 0, 1, 1], [], []>} : vector<226x8xf32>, vector<8x128xf32>, vector<226x128xf32> -> vector<226x128xf32>
    %18 = arith.addf %14, %17 : vector<226x128xf32>
    %19 = vector.extract_strided_slice %1 {offsets = [16, 0], sizes = [226, 8], strides = [1, 1]} : vector<260x8xf32> to vector<226x8xf32>
    %20 = vector.extract_strided_slice %2 {offsets = [24, 0], sizes = [8, 128], strides = [1, 1]} : vector<72x128xf32> to vector<8x128xf32>
    %cst_13 = arith.constant dense<0.000000e+00> : vector<226x128xf32>
    %21 = tpu.matmul %19, %20, %cst_13 {dimension_numbers = #tpu.dot_dimension_numbers<[1], [0], [0], [1], [0, 0, 1, 1], [], []>} : vector<226x8xf32>, vector<8x128xf32>, vector<226x128xf32> -> vector<226x128xf32>
    %22 = arith.addf %18, %21 : vector<226x128xf32>
    %23 = vector.extract_strided_slice %1 {offsets = [17, 0], sizes = [226, 8], strides = [1, 1]} : vector<260x8xf32> to vector<226x8xf32>
    %24 = vector.extract_strided_slice %2 {offsets = [32, 0], sizes = [8, 128], strides = [1, 1]} : vector<72x128xf32> to vector<8x128xf32>
    %cst_14 = arith.constant dense<0.000000e+00> : vector<226x128xf32>
    %25 = tpu.matmul %23, %24, %cst_14 {dimension_numbers = #tpu.dot_dimension_numbers<[1], [0], [0], [1], [0, 0, 1, 1], [], []>} : vector<226x8xf32>, vector<8x128xf32>, vector<226x128xf32> -> vector<226x128xf32>
    %26 = arith.addf %22, %25 : vector<226x128xf32>
    %27 = vector.extract_strided_slice %1 {offsets = [18, 0], sizes = [226, 8], strides = [1, 1]} : vector<260x8xf32> to vector<226x8xf32>
    %28 = vector.extract_strided_slice %2 {offsets = [40, 0], sizes = [8, 128], strides = [1, 1]} : vector<72x128xf32> to vector<8x128xf32>
    %cst_15 = arith.constant dense<0.000000e+00> : vector<226x128xf32>
    %29 = tpu.matmul %27, %28, %cst_15 {dimension_numbers = #tpu.dot_dimension_numbers<[1], [0], [0], [1], [0, 0, 1, 1], [], []>} : vector<226x8xf32>, vector<8x128xf32>, vector<226x128xf32> -> vector<226x128xf32>
    %30 = arith.addf %26, %29 : vector<226x128xf32>
    %31 = vector.extract_strided_slice %1 {offsets = [32, 0], sizes = [226, 8], strides = [1, 1]} : vector<260x8xf32> to vector<226x8xf32>
    %32 = vector.extract_strided_slice %2 {offsets = [48, 0], sizes = [8, 128], strides = [1, 1]} : vector<72x128xf32> to vector<8x128xf32>
    %cst_16 = arith.constant dense<0.000000e+00> : vector<226x128xf32>
    %33 = tpu.matmul %31, %32, %cst_16 {dimension_numbers = #tpu.dot_dimension_numbers<[1], [0], [0], [1], [0, 0, 1, 1], [], []>} : vector<226x8xf32>, vector<8x128xf32>, vector<226x128xf32> -> vector<226x128xf32>
    %34 = arith.addf %30, %33 : vector<226x128xf32>
    %35 = vector.extract_strided_slice %1 {offsets = [33, 0], sizes = [226, 8], strides = [1, 1]} : vector<260x8xf32> to vector<226x8xf32>
    %36 = vector.extract_strided_slice %2 {offsets = [56, 0], sizes = [8, 128], strides = [1, 1]} : vector<72x128xf32> to vector<8x128xf32>
    %cst_17 = arith.constant dense<0.000000e+00> : vector<226x128xf32>
    %37 = tpu.matmul %35, %36, %cst_17 {dimension_numbers = #tpu.dot_dimension_numbers<[1], [0], [0], [1], [0, 0, 1, 1], [], []>} : vector<226x8xf32>, vector<8x128xf32>, vector<226x128xf32> -> vector<226x128xf32>
    %38 = arith.addf %34, %37 : vector<226x128xf32>
    %39 = vector.extract_strided_slice %1 {offsets = [34, 0], sizes = [226, 8], strides = [1, 1]} : vector<260x8xf32> to vector<226x8xf32>
    %40 = vector.extract_strided_slice %2 {offsets = [64, 0], sizes = [8, 128], strides = [1, 1]} : vector<72x128xf32> to vector<8x128xf32>
    %cst_18 = arith.constant dense<0.000000e+00> : vector<226x128xf32>
    %41 = tpu.matmul %39, %40, %cst_18 {dimension_numbers = #tpu.dot_dimension_numbers<[1], [0], [0], [1], [0, 0, 1, 1], [], []>} : vector<226x8xf32>, vector<8x128xf32>, vector<226x128xf32> -> vector<226x128xf32>
    %42 = arith.addf %38, %41 : vector<226x128xf32>
    %43 = vector.broadcast %4 : vector<1x128xf32> to vector<226x128xf32>
    %44 = arith.addf %42, %43 : vector<226x128xf32>
    %cst_19 = arith.constant 0.000000e+00 : f32
    %45 = vector.broadcast %cst_19 : f32 to vector<226x128xf32>
    %46 = arith.maximumf %44, %45 : vector<226x128xf32>
    %cst_20 = arith.constant 0.000000e+00 : f32
    %47 = vector.broadcast %cst_20 : f32 to vector<192x128xf32>
    %48 = vector.extract_strided_slice %46 {offsets = [0, 0], sizes = [192, 128], strides = [1, 1]} : vector<226x128xf32> to vector<192x128xf32>
    %49 = vector.extract_strided_slice %3 {offsets = [0, 0], sizes = [128, 128], strides = [1, 1]} : vector<1152x128xf32> to vector<128x128xf32>
    %cst_21 = arith.constant dense<0.000000e+00> : vector<192x128xf32>
    %50 = tpu.matmul %48, %49, %cst_21 {dimension_numbers = #tpu.dot_dimension_numbers<[1], [0], [0], [1], [0, 0, 1, 1], [], []>} : vector<192x128xf32>, vector<128x128xf32>, vector<192x128xf32> -> vector<192x128xf32>
    %51 = arith.addf %47, %50 : vector<192x128xf32>
    %52 = vector.extract_strided_slice %46 {offsets = [1, 0], sizes = [192, 128], strides = [1, 1]} : vector<226x128xf32> to vector<192x128xf32>
    %53 = vector.extract_strided_slice %3 {offsets = [128, 0], sizes = [128, 128], strides = [1, 1]} : vector<1152x128xf32> to vector<128x128xf32>
    %cst_22 = arith.constant dense<0.000000e+00> : vector<192x128xf32>
    %54 = tpu.matmul %52, %53, %cst_22 {dimension_numbers = #tpu.dot_dimension_numbers<[1], [0], [0], [1], [0, 0, 1, 1], [], []>} : vector<192x128xf32>, vector<128x128xf32>, vector<192x128xf32> -> vector<192x128xf32>
    %55 = arith.addf %51, %54 : vector<192x128xf32>
    %56 = vector.extract_strided_slice %46 {offsets = [2, 0], sizes = [192, 128], strides = [1, 1]} : vector<226x128xf32> to vector<192x128xf32>
    %57 = vector.extract_strided_slice %3 {offsets = [256, 0], sizes = [128, 128], strides = [1, 1]} : vector<1152x128xf32> to vector<128x128xf32>
    %cst_23 = arith.constant dense<0.000000e+00> : vector<192x128xf32>
    %58 = tpu.matmul %56, %57, %cst_23 {dimension_numbers = #tpu.dot_dimension_numbers<[1], [0], [0], [1], [0, 0, 1, 1], [], []>} : vector<192x128xf32>, vector<128x128xf32>, vector<192x128xf32> -> vector<192x128xf32>
    %59 = arith.addf %55, %58 : vector<192x128xf32>
    %60 = vector.extract_strided_slice %46 {offsets = [16, 0], sizes = [192, 128], strides = [1, 1]} : vector<226x128xf32> to vector<192x128xf32>
    %61 = vector.extract_strided_slice %3 {offsets = [384, 0], sizes = [128, 128], strides = [1, 1]} : vector<1152x128xf32> to vector<128x128xf32>
    %cst_24 = arith.constant dense<0.000000e+00> : vector<192x128xf32>
    %62 = tpu.matmul %60, %61, %cst_24 {dimension_numbers = #tpu.dot_dimension_numbers<[1], [0], [0], [1], [0, 0, 1, 1], [], []>} : vector<192x128xf32>, vector<128x128xf32>, vector<192x128xf32> -> vector<192x128xf32>
    %63 = arith.addf %59, %62 : vector<192x128xf32>
    %64 = vector.extract_strided_slice %46 {offsets = [17, 0], sizes = [192, 128], strides = [1, 1]} : vector<226x128xf32> to vector<192x128xf32>
    %65 = vector.extract_strided_slice %3 {offsets = [512, 0], sizes = [128, 128], strides = [1, 1]} : vector<1152x128xf32> to vector<128x128xf32>
    %cst_25 = arith.constant dense<0.000000e+00> : vector<192x128xf32>
    %66 = tpu.matmul %64, %65, %cst_25 {dimension_numbers = #tpu.dot_dimension_numbers<[1], [0], [0], [1], [0, 0, 1, 1], [], []>} : vector<192x128xf32>, vector<128x128xf32>, vector<192x128xf32> -> vector<192x128xf32>
    %67 = arith.addf %63, %66 : vector<192x128xf32>
    %68 = vector.extract_strided_slice %46 {offsets = [18, 0], sizes = [192, 128], strides = [1, 1]} : vector<226x128xf32> to vector<192x128xf32>
    %69 = vector.extract_strided_slice %3 {offsets = [640, 0], sizes = [128, 128], strides = [1, 1]} : vector<1152x128xf32> to vector<128x128xf32>
    %cst_26 = arith.constant dense<0.000000e+00> : vector<192x128xf32>
    %70 = tpu.matmul %68, %69, %cst_26 {dimension_numbers = #tpu.dot_dimension_numbers<[1], [0], [0], [1], [0, 0, 1, 1], [], []>} : vector<192x128xf32>, vector<128x128xf32>, vector<192x128xf32> -> vector<192x128xf32>
    %71 = arith.addf %67, %70 : vector<192x128xf32>
    %72 = vector.extract_strided_slice %46 {offsets = [32, 0], sizes = [192, 128], strides = [1, 1]} : vector<226x128xf32> to vector<192x128xf32>
    %73 = vector.extract_strided_slice %3 {offsets = [768, 0], sizes = [128, 128], strides = [1, 1]} : vector<1152x128xf32> to vector<128x128xf32>
    %cst_27 = arith.constant dense<0.000000e+00> : vector<192x128xf32>
    %74 = tpu.matmul %72, %73, %cst_27 {dimension_numbers = #tpu.dot_dimension_numbers<[1], [0], [0], [1], [0, 0, 1, 1], [], []>} : vector<192x128xf32>, vector<128x128xf32>, vector<192x128xf32> -> vector<192x128xf32>
    %75 = arith.addf %71, %74 : vector<192x128xf32>
    %76 = vector.extract_strided_slice %46 {offsets = [33, 0], sizes = [192, 128], strides = [1, 1]} : vector<226x128xf32> to vector<192x128xf32>
    %77 = vector.extract_strided_slice %3 {offsets = [896, 0], sizes = [128, 128], strides = [1, 1]} : vector<1152x128xf32> to vector<128x128xf32>
    %cst_28 = arith.constant dense<0.000000e+00> : vector<192x128xf32>
    %78 = tpu.matmul %76, %77, %cst_28 {dimension_numbers = #tpu.dot_dimension_numbers<[1], [0], [0], [1], [0, 0, 1, 1], [], []>} : vector<192x128xf32>, vector<128x128xf32>, vector<192x128xf32> -> vector<192x128xf32>
    %79 = arith.addf %75, %78 : vector<192x128xf32>
    %80 = vector.extract_strided_slice %46 {offsets = [34, 0], sizes = [192, 128], strides = [1, 1]} : vector<226x128xf32> to vector<192x128xf32>
    %81 = vector.extract_strided_slice %3 {offsets = [1024, 0], sizes = [128, 128], strides = [1, 1]} : vector<1152x128xf32> to vector<128x128xf32>
    %cst_29 = arith.constant dense<0.000000e+00> : vector<192x128xf32>
    %82 = tpu.matmul %80, %81, %cst_29 {dimension_numbers = #tpu.dot_dimension_numbers<[1], [0], [0], [1], [0, 0, 1, 1], [], []>} : vector<192x128xf32>, vector<128x128xf32>, vector<192x128xf32> -> vector<192x128xf32>
    %83 = arith.addf %79, %82 : vector<192x128xf32>
    %84 = vector.broadcast %5 : vector<1x128xf32> to vector<192x128xf32>
    %85 = arith.addf %83, %84 : vector<192x128xf32>
    %cst_30 = arith.constant 0.000000e+00 : f32
    %86 = vector.broadcast %cst_30 : f32 to vector<192x128xf32>
    %87 = arith.maximumf %85, %86 : vector<192x128xf32>
    %c0_31 = arith.constant 0 : index
    %c0_32 = arith.constant 0 : index
    %c0_33 = arith.constant 0 : index
    %88 = vector.load %arg6[%c0_31, %c0_32, %c0_33] : memref<1x192x128xf32, #tpu.memory_space<vmem>>, vector<1x192x128xf32>
    %89 = vector.shape_cast %88 : vector<1x192x128xf32> to vector<192x128xf32>
    %90 = vector.shape_cast %87 : vector<192x128xf32> to vector<1x192x128xf32>
    tpu.vector_store %arg6[%c0_31, %c0_32, %c0_33], %90 {strides = array<i32>} : memref<1x192x128xf32, #tpu.memory_space<vmem>>, vector<1x192x128xf32>,
    return
  }
  func.func @transform_0(%arg0: i32) -> (i32, i32, i32) {
    %c0_i32 = arith.constant 0 : i32
    %c0_i32_0 = arith.constant 0 : i32
    %c0_i32_1 = arith.constant 0 : i32
    return %arg0, %c0_i32, %c0_i32_0 : i32, i32, i32
  }
  func.func @transform_1(%arg0: i32) -> (i32, i32) {
    %c0_i32 = arith.constant 0 : i32
    %c0_i32_0 = arith.constant 0 : i32
    %c0_i32_1 = arith.constant 0 : i32
    return %c0_i32, %c0_i32_0 : i32, i32
  }
  func.func @transform_2(%arg0: i32) -> (i32, i32) {
    %c0_i32 = arith.constant 0 : i32
    %c0_i32_0 = arith.constant 0 : i32
    %c0_i32_1 = arith.constant 0 : i32
    return %c0_i32, %c0_i32_0 : i32, i32
  }
  func.func @transform_3(%arg0: i32) -> (i32, i32) {
    %c0_i32 = arith.constant 0 : i32
    %c0_i32_0 = arith.constant 0 : i32
    %c0_i32_1 = arith.constant 0 : i32
    return %c0_i32, %c0_i32_0 : i32, i32
  }
  func.func @transform_4(%arg0: i32) -> (i32, i32) {
    %c0_i32 = arith.constant 0 : i32
    %c0_i32_0 = arith.constant 0 : i32
    %c0_i32_1 = arith.constant 0 : i32
    return %c0_i32, %c0_i32_0 : i32, i32
  }
  func.func @transform_5(%arg0: i32) -> (i32, i32, i32) {
    %c0_i32 = arith.constant 0 : i32
    %c0_i32_0 = arith.constant 0 : i32
    %c0_i32_1 = arith.constant 0 : i32
    return %arg0, %c0_i32, %c0_i32_0 : i32, i32, i32
  }
}

</mosaic_0001>

<bundles_post_ra>
// kernel: tile.8
= control target key start
LH: loop header
LB: loop body
LE: loop exit
PB: predicated region body
PF: predicated region fallthrough
CT: control target
= control target key end

     0   :  { %s22_s0 = inlined_call_operand.vmem [shape: f32[4], index: 0, kind: input, shape index: {}]   ;;  %s23_s1 = inlined_call_operand.vmem [shape: f32[4,4], index: 1, kind: output, shape index: {}]  }
   0x1   :  { %v4_v0 = vld [vmem:[%s22_s0] ss:$0 sm:$0xff] }
   0x2   :  { %5 = vst [vmem:[%s23_s1] sm:$0xf] %v4_v0 }

// kernel: tile.9
= control target key start
LH: loop header
LB: loop body
LE: loop exit
PB: predicated region body
PF: predicated region fallthrough
CT: control target
= control target key end

     0   :  { %s37_s8 = smov 4   ;;  %s38_s9 = smov 8   ;;  %vm7_vm0 = vcmask 31744   ;;  %vm13_vm1 = vcmask 130144   ;;  %vm19_vm2 = vcmask 97344   ;;  %vm25_vm3 = vcmask 64544   ;;  %s55_s0 = inlined_call_operand.vmem [shape: f32[4,4], index: 0, kind: input, shape index: {}]   ;;  %s56_s1 = inlined_call_operand.vmem [shape: f32[16], index: 1, kind: output, shape index: {}]  }
   0x1   :  { %v4_v0 = vld [vmem:[%s55_s0] sm:$0xf]  ;;  %s36_s0 = smov 12  }
   0x2   :  { %5 = vst [vmem:[#allocation1] sm:$0xf] %v4_v0 }
   0x9   :  { %v10_v1 = vld [vmem:[#allocation1 + $0x3] sm:$0x1]   ;;  %v22_v2 = vld [vmem:[#allocation1 + $0x1] sm:$0x1]   ;;  %v16_v3 = vld [vmem:[#allocation1 + $0x2] sm:$0x1]  }
   0xa   :  { %11 = vrot.lane.b32.xlu0 %v10_v1, %s36_s0  ;;  %23 = vrot.lane.b32.xlu1 %v22_v2, %s37_s8  ;;  %v6_v4 = vld [vmem:[#allocation1] sm:$0x1]  }
   0xb   :  { %8 = vst.msk [vmem:[#allocation0] sm:$0x1] %vm7_vm0, %v6_v4  }
  0x12   :  { %17 = vrot.lane.b32.xlu0 %v16_v3, %s38_s9 }
  0x7c   :  { %v12_v5 = vpop.permute.xlu0 %11   ;;  %v24_v6 = vpop.permute.xlu1 %23  }
  0x7d   :  { %14 = vst.msk [vmem:[#allocation0] sm:$0x1] %vm13_vm1, %v12_v5  }
  0x84   :  { %v18_v7 = vpop.permute.xlu0 %17  }
  0x85   :  { %20 = vst.msk [vmem:[#allocation0] sm:$0x1] %vm19_vm2, %v18_v7  }
  0x86   :  { %26 = vst.msk [vmem:[#allocation0] sm:$0x1] %vm25_vm3, %v24_v6  }
  0x8d   :  { %v29_v8 = vld [vmem:[#allocation0] sm:$0x1] }
  0x8e   :  { %32 = vst [vmem:[%s56_s1] sm:$0x1] %v29_v8 }

// kernel: expanding_block.2
= control target key start
LH: loop header
LB: loop body
LE: loop exit
PB: predicated region body
PF: predicated region fallthrough
CT: control target
= control target key end

     0   :  { %vm35_vm0 = vcmask 64512   ;;  %s327_s1 = inlined_call_operand.vmem [shape: f32[8,128], index: 1, kind: input, shape index: {}]   ;;  %s328_s0 = inlined_call_operand.vmem [shape: f32[128,8], index: 0, kind: input, shape index: {}]   ;;  %s329_s2 = inlined_call_operand.vmem [shape: f32[1,128], index: 2, kind: input, shape index: {}]   ;;  %s330_s3 = inlined_call_operand.vmem [shape: f32[128,128], index: 3, kind: output, shape index: {}]  }
   0x1   :  { %v30_v0 = vld [vmem:[%s327_s1] sm:$0xff]  ;;  %v23_v5 = vld [vmem:[%s328_s0 + $0x48] sm:$0xff]  ;;  %v24_v9 = vld [vmem:[%s328_s0 + $0x50] sm:$0xff] }
   0x2   :  { %v22_v1 = vld [vmem:[%s328_s0 + $0x40] sm:$0xff]  ;;  %186 = vmatpush.msra.mxu2 %v30_v0  ;;  %187 = vmatpush.msra.mxu3 %v30_v0  ;;  %v27_v6 = vld [vmem:[%s328_s0 + $0x68] sm:$0xff]  ;;  %v28_v10 = vld [vmem:[%s328_s0 + $0x70] sm:$0xff] }
   0x3   :  { %v26_v2 = vld [vmem:[%s328_s0 + $0x60] sm:$0xff]  ;;  %177 = vmatmul.msk.f32.vlgmr.msra.gmra.mxu2 %vm35_vm0, %v22_v1  ;;  %99 = vmatpush.msra.mxu0 %v30_v0  ;;  %v15_v7 = vld [vmem:[%s328_s0 + $0x8] sm:$0xff]  ;;  %v16_v11 = vld [vmem:[%s328_s0 + $0x10] sm:$0xff] }
   0x4   :  { %v14_v3 = vld [vmem:[%s328_s0] sm:$0xff]  ;;  %181 = vmatmul.msk.f32.vlgmr.msra.gmra.mxu3 %vm35_vm0, %v26_v2  ;;  %185 = vmatpush.msra.mxu1 %v30_v0  ;;  %v19_v8 = vld [vmem:[%s328_s0 + $0x28] sm:$0xff]  ;;  %v20_v12 = vld [vmem:[%s328_s0 + $0x30] sm:$0xff] }
   0x5   :  { %v18_v4 = vld [vmem:[%s328_s0 + $0x20] sm:$0xff]  ;;  %169 = vmatmul.msk.f32.vlgmr.msra.gmra.mxu0 %vm35_vm0, %v14_v3  ;;  %v25_v13 = vld [vmem:[%s328_s0 + $0x58] sm:$0xff] }
   0x6   :  { %173 = vmatmul.msk.f32.vlgmr.msra.gmra.mxu1 %vm35_vm0, %v18_v4  ;;  %v29_v14 = vld [vmem:[%s328_s0 + $0x78] sm:$0xff]  ;;  %v188_v17 = vld [vmem:[%s329_s2] ss:$0 sm:$0xff] }
   0x7   :  { %v17_v15 = vld [vmem:[%s328_s0 + $0x18] sm:$0xff] }
   0x8   :  { %v21_v16 = vld [vmem:[%s328_s0 + $0x38] sm:$0xff] }
   0xb   :  { %178 = vmatmul.msk.f32.gmra.mxu2 %vm35_vm0, %v23_v5 }
   0xc   :  { %182 = vmatmul.msk.f32.gmra.mxu3 %vm35_vm0, %v27_v6 }
   0xd   :  { %170 = vmatmul.msk.f32.gmra.mxu0 %vm35_vm0, %v15_v7 }
   0xe   :  { %174 = vmatmul.msk.f32.gmra.mxu1 %vm35_vm0, %v19_v8 }
  0x13   :  { %179 = vmatmul.msk.f32.gmra.mxu2 %vm35_vm0, %v24_v9 }
  0x14   :  { %183 = vmatmul.msk.f32.gmra.mxu3 %vm35_vm0, %v28_v10 }
  0x15   :  { %171 = vmatmul.msk.f32.gmra.mxu0 %vm35_vm0, %v16_v11 }
  0x16   :  { %175 = vmatmul.msk.f32.gmra.mxu1 %vm35_vm0, %v20_v12 }
  0x1b   :  { %180 = vmatmul.msk.f32.gmra.mxu2 %vm35_vm0, %v25_v13 }
  0x1c   :  { %184 = vmatmul.msk.f32.gmra.mxu3 %vm35_vm0, %v29_v14 }
  0x1d   :  { %172 = vmatmul.msk.f32.gmra.mxu0 %vm35_vm0, %v17_v15 }
  0x1e   :  { %176 = vmatmul.msk.f32.gmra.mxu1 %vm35_vm0, %v21_v16 }
  0x82   :  { %v101_v18 = vpop.f32.mrf.mxu0 }
  0x83   :  { %v113_v19 = vpop.f32.mrf.mxu1  ;;  %v102_v20 = vadd.f32 %v188_v17, %v101_v18 }
  0x84   :  { %v114_v21 = vadd.f32 %v188_v17, %v113_v19 }
  0x85   :  { %149 = vst [vmem:[%s330_s3] sm:$0xff] %v102_v20 }
  0x86   :  { %153 = vst [vmem:[%s330_s3 + $0x20] sm:$0xff] %v114_v21  ;;  %v125_v22 = vpop.f32.mrf.mxu2 }
  0x87   :  { %v137_v23 = vpop.f32.mrf.mxu3  ;;  %v126_v24 = vadd.f32 %v188_v17, %v125_v22 }
  0x88   :  { %v138_v25 = vadd.f32 %v188_v17, %v137_v23 }
  0x89   :  { %157 = vst [vmem:[%s330_s3 + $0x40] sm:$0xff] %v126_v24 }
  0x8a   :  { %161 = vst [vmem:[%s330_s3 + $0x60] sm:$0xff] %v138_v25  ;;  %v104_v26 = vpop.f32.mrf.mxu0 }
  0x8b   :  { %v116_v27 = vpop.f32.mrf.mxu1  ;;  %v105_v28 = vadd.f32 %v188_v17, %v104_v26 }
  0x8c   :  { %v117_v29 = vadd.f32 %v188_v17, %v116_v27 }
  0x8d   :  { %150 = vst [vmem:[%s330_s3 + $0x8] sm:$0xff] %v105_v28 }
  0x8e   :  { %154 = vst [vmem:[%s330_s3 + $0x28] sm:$0xff] %v117_v29  ;;  %v128_v30 = vpop.f32.mrf.mxu2 }
  0x8f   :  { %v140_v31 = vpop.f32.mrf.mxu3  ;;  %v129_v32 = vadd.f32 %v188_v17, %v128_v30 }
  0x90   :  { %v141_v33 = vadd.f32 %v188_v17, %v140_v31 }
  0x91   :  { %158 = vst [vmem:[%s330_s3 + $0x48] sm:$0xff] %v129_v32 }
  0x92   :  { %162 = vst [vmem:[%s330_s3 + $0x68] sm:$0xff] %v141_v33  ;;  %v107_v34 = vpop.f32.mrf.mxu0 }
  0x93   :  { %v119_v35 = vpop.f32.mrf.mxu1  ;;  %v108_v36 = vadd.f32 %v188_v17, %v107_v34 }
  0x94   :  { %v120_v37 = vadd.f32 %v188_v17, %v119_v35 }
  0x95   :  { %151 = vst [vmem:[%s330_s3 + $0x10] sm:$0xff] %v108_v36 }
  0x96   :  { %155 = vst [vmem:[%s330_s3 + $0x30] sm:$0xff] %v120_v37  ;;  %v131_v38 = vpop.f32.mrf.mxu2 }
  0x97   :  { %v143_v39 = vpop.f32.mrf.mxu3  ;;  %v132_v40 = vadd.f32 %v188_v17, %v131_v38 }
  0x98   :  { %v144_v41 = vadd.f32 %v188_v17, %v143_v39 }
  0x99   :  { %159 = vst [vmem:[%s330_s3 + $0x50] sm:$0xff] %v132_v40 }
  0x9a   :  { %163 = vst [vmem:[%s330_s3 + $0x70] sm:$0xff] %v144_v41  ;;  %v110_v42 = vpop.f32.mrf.mxu0 }
  0x9b   :  { %v122_v43 = vpop.f32.mrf.mxu1  ;;  %v111_v44 = vadd.f32 %v188_v17, %v110_v42 }
  0x9c   :  { %v123_v45 = vadd.f32 %v188_v17, %v122_v43 }
  0x9d   :  { %152 = vst [vmem:[%s330_s3 + $0x18] sm:$0xff] %v111_v44 }
  0x9e   :  { %156 = vst [vmem:[%s330_s3 + $0x38] sm:$0xff] %v123_v45  ;;  %v134_v46 = vpop.f32.mrf.mxu2 }
  0x9f   :  { %v146_v47 = vpop.f32.mrf.mxu3  ;;  %v135_v48 = vadd.f32 %v188_v17, %v134_v46 }
  0xa0   :  { %v147_v49 = vadd.f32 %v188_v17, %v146_v47 }
  0xa1   :  { %160 = vst [vmem:[%s330_s3 + $0x58] sm:$0xff] %v135_v48 }
  0xa2   :  { %164 = vst [vmem:[%s330_s3 + $0x78] sm:$0xff] %v147_v49 }

// kernel: expanding_block.3
= control target key start
LH: loop header
LB: loop body
LE: loop exit
PB: predicated region body
PF: predicated region fallthrough
CT: control target
= control target key end

     0   :  { %s3609_s18 = smov 0   ;;  %s6350_s0 = inlined_call_operand.vmem [shape: f32[2,260,8], index: 0, kind: input, shape index: {}]   ;;  %s6351_s1 = inlined_call_operand.vmem [shape: f32[72,128], index: 1, kind: input, shape index: {}]   ;;  %s6352_s2 = inlined_call_operand.vmem [shape: f32[1,128], index: 2, kind: input, shape index: {}]   ;;  %s6353_s3 = inlined_call_operand.vmem [shape: f32[1152,128], index: 3, kind: input, shape index: {}]   ;;  %s6354_s4 = inlined_call_operand.vmem [shape: f32[1,128], index: 4, kind: input, shape index: {}]   ;;  %s6355_s5 = inlined_call_operand.vmem [shape: f32[2,192,128], index: 5, kind: output, shape index: {}]  }
   0x1 LB: > { %s3283_s19 = sadd.s32 4294967295, %s3577_s18   ;;  %p3287_p0 = scmp.ge.s32.totalorder %s3577_s18, 1  ;;  %s3577_s18 = sphi %s3609_s18, %s15_s18  }
   0x2   : > { %p187_p1 = scmp.lt.s32.totalorder %s3577_s18, 3 }
   0x4   : > { %p188_p2 = pnand %p3287_p0, %p187_p1 }
   0x6   : > { %191 = sbr.rel (%p188_p2) target bundleno = 1404 (0x57c), region = 40 }
   0xb   : > { %v259_v0 = vld [vmem:[%s6351_s1 + $0x8] sm:$0xff]  ;;  %p215_p3 = scmp.lt.s32.totalorder %s3283_s19, 1  ;;  %v258_v1 = vld [vmem:[%s6351_s1] sm:$0xff]  ;;  %v260_v2 = vld [vmem:[%s6351_s1 + $0x10] sm:$0xff]  ;;  %vm500_vm0 = vcmask 64512   ;;  %vm442_vm1 = vcmask 1046528  }
   0xc   : > { %3553 = vmatpush.msra.mxu3 %v259_v0  ;;  %574 = vmatpush.msra.mxu0 %v259_v0  ;;  %vm825_vm2 = vcmask 1045504   ;;  %v261_v45 = vld [vmem:[%s6351_s1 + $0x18] sm:$0xff] }
   0xd   : > { %s6877_s19 = smov (!%p215_p3, %s3283_s19), 1  ;;  %736 = vmatpush.msra.mxu1 %v258_v1  ;;  %3555 = vmatpush.msra.mxu2 %v260_v2 }
   0xe   : > { %956 = vmatpush.msrb.mxu0 %v260_v2  ;;  %3554 = vmatpush.msrb.mxu3 %v258_v1  ;;  %s3556_s26 = smul.u32 264, %s6877_s19 }
   0xf   : > { %s3557_s13 = smul.u32 192, %s6877_s19 }
  0x10   : > { %s3632_s29 = scalar_lea.vmem %s6350_s0, %s3556_s26 }
  0x11   : > { %v3635_v3 = vld [vmem:[%s3632_s29 + $0xe0] sm:$0xff]  ;;  %v3641_v5 = vld [vmem:[%s3632_s29 + $0x8] sm:$0xff]  ;;  %v3651_v9 = vld [vmem:[%s3632_s29 + $0x10] sm:$0xff]  ;;  %s6231_s16 = scalar_lea.vmem %s6355_s5, %s3557_s13 }
  0x12   : > { %v3638_v4 = vld [vmem:[%s3632_s29] sm:$0xff]  ;;  %v3644_v6 = vrot.slane %v3635_v3, 1  ;;  %v444_v8 = vrot.slane %v3641_v5, 1  ;;  %v446_v11 = vrot.slane %v3651_v9, 1  ;;  %v3659_v12 = vld [vmem:[%s3632_s29 + $0x98] sm:$0xff]  ;;  %v3688_v20 = vld [vmem:[%s3632_s29 + $0xa8] sm:$0xff] }
  0x13   : > { %v443_v7 = vrot.slane %v3638_v4, 1  ;;  %3319 = vmatmul.msk.f32.vlgmr.msra.gmra.mxu1 %vm500_vm0, %v3638_v4  ;;  %v3665_v14 = vld [vmem:[%s3632_s29 + $0x18] sm:$0xff]  ;;  %v3672_v16 = vld [vmem:[%s3632_s29 + $0xa0] sm:$0xff]  ;;  %v3696_v22 = vld [vmem:[%s3632_s29 + $0x28] sm:$0xff] }
  0x14   : > { %6459 = vst [vmem:[#allocation2_spill] sm:$0xff] %v3644_v6  ;;  %3318 = vmatmul.msk.f32.vlgmr.msra.gmra.mxu3 %vm500_vm0, %v3644_v6  ;;  %v447_v13 = vsel %vm442_vm1, %v444_v8, %v446_v11  ;;  %v448_v15 = vrot.slane %v3665_v14, 1  ;;  %v3680_v18 = vld [vmem:[%s3632_s29 + $0x20] sm:$0xff]  ;;  %v452_v23 = vrot.slane %v3696_v22, 1  ;;  %v3704_v24 = vld [vmem:[%s3632_s29 + $0xb0] sm:$0xff]  ;;  %v3718_v28 = vld [vmem:[%s3632_s29 + $0x58] sm:$0xff] }
  0x15   : > { %v445_v10 = vsel %vm442_vm1, %v443_v7, %v444_v8  ;;  %v450_v19 = vrot.slane %v3680_v18, 1  ;;  %v3712_v26 = vld [vmem:[%s3632_s29 + $0x30] sm:$0xff]  ;;  %v847_v30 = vrot.slane %v3718_v28, 2  ;;  %v3735_v33 = vld [vmem:[%s3632_s29 + $0xb8] sm:$0xff]  ;;  %v3746_v36 = vld [vmem:[%s3632_s29 + $0x60] sm:$0xff]  ;;  %1095 = vmatpush.msra.mxu3 %v261_v45  ;;  %v464_v1 = vrot.slane %v3718_v28, 1 }
  0x16   : > { %3290 = vmatmul.msk.f32.vlgmr.msra.gmra.mxu0 %vm500_vm0, %v445_v10  ;;  %v3675_v17 = vsel %vm442_vm1, %v446_v11, %v448_v15  ;;  %v3715_v27 = vld [vmem:[%s3632_s29 + $0x50] sm:$0xff]  ;;  %v454_v31 = vrot.slane %v3712_v26, 1  ;;  %v3743_v35 = vld [vmem:[%s3632_s29 + $0x38] sm:$0xff]  ;;  %v849_v37 = vrot.slane %v3746_v36, 2  ;;  %v3760_v40 = vld [vmem:[%s3632_s29 + $0xc0] sm:$0xff]  ;;  %v466_v11 = vrot.slane %v3746_v36, 1 }
  0x17   : > { %v3691_v21 = vsel %vm442_vm1, %v448_v15, %v450_v19  ;;  %v3707_v25 = vsel %vm442_vm1, %v450_v19, %v452_v23  ;;  %v6356_v29 = vrot.slane %v3715_v27, 2  ;;  %v456_v38 = vrot.slane %v3743_v35, 1  ;;  %v3768_v42 = vld [vmem:[%s3632_s29 + $0x40] sm:$0xff]  ;;  %v3771_v43 = vld [vmem:[%s3632_s29 + $0x68] sm:$0xff]  ;;  %v3799_v51 = vld [vmem:[%s3632_s29 + $0x70] sm:$0xff] }
  0x18   : > { %v3738_v34 = vsel %vm442_vm1, %v452_v23, %v454_v31  ;;  %v3755_v39 = vsel %vm825_vm2, %v847_v30, %v849_v37  ;;  %v851_v44 = vrot.slane %v3771_v43, 2  ;;  %v458_v46 = vrot.slane %v3768_v42, 1  ;;  %v3788_v48 = vld [vmem:[%s3632_s29 + $0xc8] sm:$0xff]  ;;  %v3813_v55 = vld [vmem:[%s3632_s29 + $0xd0] sm:$0xff]  ;;  %v3821_v57 = vld [vmem:[%s3632_s29 + $0x78] sm:$0xff] }
  0x19   : > { %v3730_v32 = vsel %vm825_vm2, %v6356_v29, %v847_v30  ;;  %v3763_v41 = vsel %vm442_vm1, %v454_v31, %v456_v38  ;;  %v3796_v50 = vld [vmem:[%s3632_s29 + $0x48] sm:$0xff]  ;;  %v853_v52 = vrot.slane %v3799_v51, 2  ;;  %v855_v58 = vrot.slane %v3821_v57, 2  ;;  %v3835_v61 = vld [vmem:[%s3632_s29 + $0xd8] sm:$0xff]  ;;  %v3843_v63 = vld [vmem:[%s3632_s29 + $0x80] sm:$0xff] }
  0x1a   : > { %3358 = vmatmul.msk.f32.vlgmr.msra.gmra.mxu2 %vm500_vm0, %v3730_v32  ;;  %v3783_v47 = vsel %vm825_vm2, %v849_v37, %v851_v44  ;;  %v3791_v49 = vsel %vm442_vm1, %v456_v38, %v458_v46  ;;  %v460_v53 = vrot.slane %v3796_v50, 1  ;;  %v462_v59 = vrot.slane %v3715_v27, 1  ;;  %v3862_v8 = vld [vmem:[%s3632_s29 + $0x88] sm:$0xff]  ;;  %v3881_v19 = vld [vmem:[%s3632_s29 + $0x90] sm:$0xff] }
  0x1b   : > { %3320 = vmatmul.msk.f32.gmra.mxu1 %vm500_vm0, %v3641_v5  ;;  %v3808_v54 = vsel %vm825_vm2, %v851_v44, %v853_v52  ;;  %v3830_v60 = vsel %vm825_vm2, %v853_v52, %v855_v58  ;;  %v857_v0 = vrot.slane %v3843_v63, 2  ;;  %v859_v10 = vrot.slane %v3862_v8, 2 }
  0x1c   : > { %3338 = vmatmul.msk.f32.vlgmr.msrb.gmra.mxu3 %vm500_vm0, %v3659_v12  ;;  %v3816_v56 = vsel %vm442_vm1, %v458_v46, %v460_v53  ;;  %v3838_v62 = vsel %vm442_vm1, %v460_v53, %v462_v59  ;;  %v3857_v7 = vsel %vm442_vm1, %v462_v59, %v464_v1  ;;  %v3876_v15 = vsel %vm442_vm1, %v464_v1, %v466_v11 }
  0x1d   : > { %v3852_v2 = vsel %vm825_vm2, %v855_v58, %v857_v0  ;;  %v861_v23 = vrot.slane %v3881_v19, 2  ;;  %v468_v30 = vrot.slane %v3771_v43, 1  ;;  %v863_v38 = vrot.slane %v3659_v12, 2 }
  0x1e   : > { %3291 = vmatmul.msk.f32.gmra.mxu0 %vm500_vm0, %v447_v13  ;;  %v3871_v13 = vsel %vm825_vm2, %v857_v0, %v859_v10  ;;  %v470_v44 = vrot.slane %v3799_v51, 1  ;;  %v865_v52 = vrot.slane %v3672_v16, 2  ;;  %v472_v53 = vrot.slane %v3821_v57, 1 }
  0x1f   : > { %v3890_v31 = vsel %vm825_vm2, %v859_v10, %v861_v23  ;;  %v3895_v37 = vsel %vm442_vm1, %v466_v11, %v468_v30  ;;  %v3906_v45 = vsel %vm825_vm2, %v861_v23, %v863_v38  ;;  %v867_v0 = vrot.slane %v3688_v20, 2 }
  0x20   : > { %v3911_v46 = vsel %vm442_vm1, %v468_v30, %v470_v44  ;;  %v3922_v58 = vsel %vm825_vm2, %v863_v38, %v865_v52  ;;  %v3927_v59 = vsel %vm442_vm1, %v470_v44, %v472_v53  ;;  %v474_v1 = vrot.slane %v3843_v63, 1 }
  0x21   : > { %v3938_v10 = vsel %vm825_vm2, %v865_v52, %v867_v0  ;;  %v869_v23 = vrot.slane %v3704_v24, 2  ;;  %v476_v30 = vrot.slane %v3862_v8, 1 }
  0x22   : > { %3359 = vmatmul.msk.f32.gmra.mxu2 %vm500_vm0, %v3755_v39  ;;  %6460 = vst [vmem:[#allocation3_spill] sm:$0xff] %v3938_v10  ;;  %v3943_v11 = vsel %vm442_vm1, %v472_v53, %v474_v1  ;;  %v871_v53 = vrot.slane %v3735_v33, 2 }
  0x23   : > { %3321 = vmatmul.msk.f32.gmra.mxu1 %vm500_vm0, %v3651_v9  ;;  %v3954_v38 = vsel %vm825_vm2, %v867_v0, %v869_v23  ;;  %v3961_v52 = vsel %vm442_vm1, %v474_v1, %v476_v30  ;;  %v478_v0 = vrot.slane %v3881_v19, 1 }
  0x24   : > { %3339 = vmatmul.msk.f32.gmra.mxu3 %vm500_vm0, %v3672_v16  ;;  %6461 = vst [vmem:[#allocation4_spill] sm:$0xff] %v3954_v38  ;;  %v3972_v29 = vsel %vm825_vm2, %v869_v23, %v871_v53  ;;  %v480_v23 = vrot.slane %v3659_v12, 1 }
  0x25   : > { %6463 = vst [vmem:[#allocation6_spill] sm:$0xff] %v3961_v52 }
  0x26   : > { %3292 = vmatmul.msk.f32.gmra.mxu0 %vm500_vm0, %v3675_v17  ;;  %6464 = vst [vmem:[#allocation7_spill] sm:$0xff] %v3972_v29 }
  0x2a   : > { %3360 = vmatmul.msk.f32.gmra.mxu2 %vm500_vm0, %v3783_v47 }
  0x2b   : > { %3322 = vmatmul.msk.f32.gmra.mxu1 %vm500_vm0, %v3665_v14 }
  0x2c   : > { %3340 = vmatmul.msk.f32.gmra.mxu3 %vm500_vm0, %v3688_v20 }
  0x2e   : > { %3293 = vmatmul.msk.f32.gmra.mxu0 %vm500_vm0, %v3691_v21 }
  0x32   : > { %3361 = vmatmul.msk.f32.gmra.mxu2 %vm500_vm0, %v3808_v54 }
  0x33   : > { %3323 = vmatmul.msk.f32.gmra.mxu1 %vm500_vm0, %v3680_v18 }
  0x34   : > { %3341 = vmatmul.msk.f32.gmra.mxu3 %vm500_vm0, %v3704_v24 }
  0x36   : > { %3294 = vmatmul.msk.f32.gmra.mxu0 %vm500_vm0, %v3707_v25 }
  0x3a   : > { %3362 = vmatmul.msk.f32.gmra.mxu2 %vm500_vm0, %v3830_v60 }
  0x3b   : > { %3324 = vmatmul.msk.f32.gmra.mxu1 %vm500_vm0, %v3696_v22 }
  0x3c   : > { %3342 = vmatmul.msk.f32.gmra.mxu3 %vm500_vm0, %v3735_v33 }
  0x3e   : > { %3295 = vmatmul.msk.f32.gmra.mxu0 %vm500_vm0, %v3738_v34 }
  0x42   : > { %3363 = vmatmul.msk.f32.gmra.mxu2 %vm500_vm0, %v3852_v2 }
  0x43   : > { %3325 = vmatmul.msk.f32.gmra.mxu1 %vm500_vm0, %v3712_v26 }
  0x44   : > { %3343 = vmatmul.msk.f32.gmra.mxu3 %vm500_vm0, %v3760_v40 }
  0x46   : > { %3296 = vmatmul.msk.f32.gmra.mxu0 %vm500_vm0, %v3763_v41 }
  0x4a   : > { %3364 = vmatmul.msk.f32.gmra.mxu2 %vm500_vm0, %v3871_v13 }
  0x4b   : > { %3326 = vmatmul.msk.f32.gmra.mxu1 %vm500_vm0, %v3743_v35 }
  0x4c   : > { %3344 = vmatmul.msk.f32.gmra.mxu3 %vm500_vm0, %v3788_v48 }
  0x4e   : > { %3297 = vmatmul.msk.f32.gmra.mxu0 %vm500_vm0, %v3791_v49 }
  0x52   : > { %3365 = vmatmul.msk.f32.gmra.mxu2 %vm500_vm0, %v3890_v31 }
  0x53   : > { %3327 = vmatmul.msk.f32.gmra.mxu1 %vm500_vm0, %v3768_v42 }
  0x54   : > { %3345 = vmatmul.msk.f32.gmra.mxu3 %vm500_vm0, %v3813_v55 }
  0x56   : > { %3298 = vmatmul.msk.f32.gmra.mxu0 %vm500_vm0, %v3816_v56 }
  0x5a   : > { %3366 = vmatmul.msk.f32.gmra.mxu2 %vm500_vm0, %v3906_v45 }
  0x5b   : > { %3328 = vmatmul.msk.f32.gmra.mxu1 %vm500_vm0, %v3796_v50 }
  0x5c   : > { %3346 = vmatmul.msk.f32.gmra.mxu3 %vm500_vm0, %v3835_v61 }
  0x5e   : > { %3299 = vmatmul.msk.f32.gmra.mxu0 %vm500_vm0, %v3838_v62 }
  0x62   : > { %3367 = vmatmul.msk.f32.gmra.mxu2 %vm500_vm0, %v3922_v58 }
  0x63   : > { %3329 = vmatmul.msk.f32.gmra.mxu1 %vm500_vm0, %v3715_v27 }
  0x64   : > { %3347 = vmatmul.msk.f32.gmra.mxu3 %vm500_vm0, %v3635_v3 }
  0x66   : > { %3300 = vmatmul.msk.f32.gmra.mxu0 %vm500_vm0, %v3857_v7 }
  0x6a   : > { %3368 = vmatmul.msk.f32.gmra.mxu2 %vm500_vm0, %v3938_v10 }
  0x6b   : > { %3330 = vmatmul.msk.f32.gmra.mxu1 %vm500_vm0, %v3718_v28 }
  0x6c   : > { %3377 = vmatmul.msk.f32.vlgmr.msra.gmra.mxu3 %vm500_vm0, %v3651_v9 }
  0x6e   : > { %3301 = vmatmul.msk.f32.gmra.mxu0 %vm500_vm0, %v3876_v15 }
  0x72   : > { %3369 = vmatmul.msk.f32.gmra.mxu2 %vm500_vm0, %v3954_v38  ;;  %v3981_v38 = vsel %vm442_vm1, %v476_v30, %v478_v0 }
  0x73   : > { %3331 = vmatmul.msk.f32.gmra.mxu1 %vm500_vm0, %v3746_v36  ;;  %6467 = vst [vmem:[#allocation10_spill] sm:$0xff] %v3981_v38 }
  0x74   : > { %3378 = vmatmul.msk.f32.gmra.mxu3 %vm500_vm0, %v3665_v14 }
  0x76   : > { %3302 = vmatmul.msk.f32.gmra.mxu0 %vm500_vm0, %v3895_v37 }
  0x7a   : > { %3370 = vmatmul.msk.f32.gmra.mxu2 %vm500_vm0, %v3972_v29  ;;  %v4001_v29 = vsel %vm442_vm1, %v478_v0, %v480_v23 }
  0x7b   : > { %3332 = vmatmul.msk.f32.gmra.mxu1 %vm500_vm0, %v3771_v43  ;;  %6471 = vst [vmem:[#allocation14_spill] sm:$0xff] %v4001_v29 }
  0x7c   : > { %3379 = vmatmul.msk.f32.gmra.mxu3 %vm500_vm0, %v3680_v18 }
  0x7e   : > { %3303 = vmatmul.msk.f32.gmra.mxu0 %vm500_vm0, %v3911_v46 }
  0x83   : > { %3333 = vmatmul.msk.f32.gmra.mxu1 %vm500_vm0, %v3799_v51 }
  0x84   : > { %3380 = vmatmul.msk.f32.gmra.mxu3 %vm500_vm0, %v3696_v22 }
  0x86   : > { %3304 = vmatmul.msk.f32.gmra.mxu0 %vm500_vm0, %v3927_v59 }
  0x8b   : > { %3334 = vmatmul.msk.f32.gmra.mxu1 %vm500_vm0, %v3821_v57 }
  0x8c   : > { %3381 = vmatmul.msk.f32.gmra.mxu3 %vm500_vm0, %v3712_v26 }
  0x8e   : > { %3305 = vmatmul.msk.f32.gmra.mxu0 %vm500_vm0, %v3943_v11 }
  0x93   : > { %v3958_v44 = vpop.f32.mrf.mxu0  ;;  %3335 = vmatmul.msk.f32.gmra.mxu1 %vm500_vm0, %v3843_v63 }
  0x94   : > { %6462 = vst [vmem:[#allocation5_spill] sm:$0xff] %v3958_v44  ;;  %3382 = vmatmul.msk.f32.gmra.mxu3 %vm500_vm0, %v3743_v35 }
  0x96   : > { %3306 = vmatmul.msk.f32.gmra.mxu0 %vm500_vm0, %v3961_v52  ;;  %v873_v52 = vrot.slane %v3760_v40, 2 }
  0x97   : > { %v3974_v44 = vpop.f32.mrf.mxu3 }
  0x98   : > { %6465 = vst [vmem:[#allocation8_spill] sm:$0xff] %v3974_v44  ;;  %v3992_v44 = vsel %vm825_vm2, %v871_v53, %v873_v52  ;;  %v482_v53 = vrot.slane %v3672_v16, 1 }
  0x99   : > { %6468 = vst [vmem:[#allocation11_spill] sm:$0xff] %v3992_v44  ;;  %3371 = vmatmul.msk.f32.gmra.mxu2 %vm500_vm0, %v3992_v44 }
  0x9a   : > { %v4021_v44 = vsel %vm442_vm1, %v480_v23, %v482_v53 }
  0x9b   : > { %v3978_v1 = vpop.f32.mrf.mxu0  ;;  %3336 = vmatmul.msk.f32.gmra.mxu1 %vm500_vm0, %v3862_v8  ;;  %6475 = vst [vmem:[#allocation18_spill] sm:$0xff] %v4021_v44 }
  0x9c   : > { %6466 = vst [vmem:[#allocation9_spill] sm:$0xff] %v3978_v1  ;;  %3383 = vmatmul.msk.f32.gmra.mxu3 %vm500_vm0, %v3768_v42 }
  0x9e   : > { %3307 = vmatmul.msk.f32.gmra.mxu0 %vm500_vm0, %v3981_v38  ;;  %v875_v38 = vrot.slane %v3788_v48, 2 }
  0x9f   : > { %v3994_v1 = vpop.f32.mrf.mxu3 }
  0xa0   : > { %6469 = vst [vmem:[#allocation12_spill] sm:$0xff] %v3994_v1  ;;  %v4012_v1 = vsel %vm825_vm2, %v873_v52, %v875_v38  ;;  %v484_v52 = vrot.slane %v3688_v20, 1 }
  0xa1   : > { %6472 = vst [vmem:[#allocation15_spill] sm:$0xff] %v4012_v1  ;;  %3372 = vmatmul.msk.f32.gmra.mxu2 %vm500_vm0, %v4012_v1  ;;  %v879_v1 = vrot.slane %v3835_v61, 2 }
  0xa3   : > { %v3998_v30 = vpop.f32.mrf.mxu0  ;;  %3337 = vmatmul.msk.f32.gmra.mxu1 %vm500_vm0, %v3881_v19 }
  0xa4   : > { %6470 = vst [vmem:[#allocation13_spill] sm:$0xff] %v3998_v30  ;;  %3384 = vmatmul.msk.f32.gmra.mxu3 %vm500_vm0, %v3796_v50 }
  0xa6   : > { %3308 = vmatmul.msk.f32.gmra.mxu0 %vm500_vm0, %v4001_v29  ;;  %v877_v29 = vrot.slane %v3813_v55, 2 }
  0xa7   : > { %v4014_v30 = vpop.f32.mrf.mxu3 }
  0xa8   : > { %6473 = vst [vmem:[#allocation16_spill] sm:$0xff] %v4014_v30  ;;  %v4030_v30 = vsel %vm825_vm2, %v875_v38, %v877_v29  ;;  %v486_v38 = vrot.slane %v3704_v24, 1 }
  0xa9   : > { %6476 = vst [vmem:[#allocation19_spill] sm:$0xff] %v4030_v30  ;;  %3373 = vmatmul.msk.f32.gmra.mxu2 %vm500_vm0, %v4030_v30  ;;  %v4062_v30 = vrot.slane %v3635_v3, 2 }
  0xab   : > { %v4018_v0 = vpop.f32.mrf.mxu0  ;;  %6484 = vst [vmem:[#allocation27_spill] sm:$0xff] %v4062_v30 }
  0xac   : > { %6474 = vst [vmem:[#allocation17_spill] sm:$0xff] %v4018_v0  ;;  %3385 = vmatmul.msk.f32.gmra.mxu3 %vm500_vm0, %v3715_v27  ;;  %v4039_v0 = vsel %vm442_vm1, %v482_v53, %v484_v52 }
  0xad   : > { %6479 = vst [vmem:[#allocation22_spill] sm:$0xff] %v4039_v0 }
  0xae   : > { %3309 = vmatmul.msk.f32.gmra.mxu0 %vm500_vm0, %v4021_v44 }
  0xaf   : > { %v4032_v10 = vpop.f32.mrf.mxu3 }
  0xb0   : > { %6477 = vst [vmem:[#allocation20_spill] sm:$0xff] %v4032_v10  ;;  %v4048_v10 = vsel %vm825_vm2, %v877_v29, %v879_v1  ;;  %v488_v29 = vrot.slane %v3735_v33, 1 }
  0xb1   : > { %6480 = vst [vmem:[#allocation23_spill] sm:$0xff] %v4048_v10  ;;  %3374 = vmatmul.msk.f32.gmra.mxu2 %vm500_vm0, %v4048_v10 }
  0xb3   : > { %v4036_v23 = vpop.f32.mrf.mxu0 }
  0xb4   : > { %6478 = vst [vmem:[#allocation21_spill] sm:$0xff] %v4036_v23  ;;  %3386 = vmatmul.msk.f32.gmra.mxu3 %vm500_vm0, %v3718_v28  ;;  %v4057_v23 = vsel %vm442_vm1, %v484_v52, %v486_v38 }
  0xb5   : > { %6483 = vst [vmem:[#allocation26_spill] sm:$0xff] %v4057_v23 }
  0xb6   : > { %3310 = vmatmul.msk.f32.gmra.mxu0 %vm500_vm0, %v4039_v0 }
  0xb7   : > { %v4050_v44 = vpop.f32.mrf.mxu3 }
  0xb8   : > { %6481 = vst [vmem:[#allocation24_spill] sm:$0xff] %v4050_v44  ;;  %v4069_v44 = vsel %vm825_vm2, %v879_v1, %v4062_v30 }
  0xb9   : > { %6485 = vst [vmem:[#allocation28_spill] sm:$0xff] %v4069_v44  ;;  %3375 = vmatmul.msk.f32.gmra.mxu2 %vm500_vm0, %v4069_v44 }
  0xbb   : > { %v4054_v53 = vpop.f32.mrf.mxu0 }
  0xbc   : > { %6482 = vst [vmem:[#allocation25_spill] sm:$0xff] %v4054_v53  ;;  %3387 = vmatmul.msk.f32.gmra.mxu3 %vm500_vm0, %v3746_v36  ;;  %v4078_v53 = vsel %vm442_vm1, %v486_v38, %v488_v29  ;;  %v492_v38 = vrot.slane %v3788_v48, 1 }
  0xbd   : > { %6488 = vst [vmem:[#allocation31_spill] sm:$0xff] %v4078_v53 }
  0xbe   : > { %3311 = vmatmul.msk.f32.gmra.mxu0 %vm500_vm0, %v4057_v23  ;;  %v490_v23 = vrot.slane %v3760_v40, 1 }
  0xbf   : > { %v4071_v10 = vpop.f32.mrf.mxu3 }
  0xc0   : > { %6486 = vst [vmem:[#allocation29_spill] sm:$0xff] %v4071_v10 }
  0xc1   : > { %3376 = vmatmul.msk.f32.gmra.mxu2 %vm500_vm0, %v4062_v30 }
  0xc3   : > { %v4075_v52 = vpop.f32.mrf.mxu0 }
  0xc4   : > { %6487 = vst [vmem:[#allocation30_spill] sm:$0xff] %v4075_v52  ;;  %3388 = vmatmul.msk.f32.gmra.mxu3 %vm500_vm0, %v3771_v43  ;;  %v4092_v52 = vsel %vm442_vm1, %v488_v29, %v490_v23  ;;  %v262_v29 = vld [vmem:[%s6351_s1 + $0x20] sm:$0xff] }
  0xc5   : > { %6491 = vst [vmem:[#allocation34_spill] sm:$0xff] %v4092_v52  ;;  %1238 = vmatpush.msra.mxu0 %v262_v29 }
  0xc6   : > { %3312 = vmatmul.msk.f32.gmra.mxu0 %vm500_vm0, %v4078_v53 }
  0xc7   : > { %v4085_v1 = vpop.f32.mrf.mxu3 }
  0xc8   : > { %6489 = vst [vmem:[#allocation32_spill] sm:$0xff] %v4085_v1  ;;  %v4104_v1 = vsel %vm442_vm1, %v490_v23, %v492_v38 }
  0xc9   : > { %6494 = vst [vmem:[#allocation37_spill] sm:$0xff] %v4104_v1 }
  0xcb   : > { %v4089_v10 = vpop.f32.mrf.mxu0 }
  0xcc   : > { %6490 = vst [vmem:[#allocation33_spill] sm:$0xff] %v4089_v10  ;;  %3389 = vmatmul.msk.f32.gmra.mxu3 %vm500_vm0, %v3799_v51  ;;  %v494_v10 = vrot.slane %v3813_v55, 1 }
  0xce   : > { %3313 = vmatmul.msk.f32.gmra.mxu0 %vm500_vm0, %v4092_v52  ;;  %v4119_v23 = vsel %vm442_vm1, %v492_v38, %v494_v10 }
  0xcf   : > { %v4099_v44 = vpop.f32.mrf.mxu3  ;;  %6497 = vst [vmem:[#allocation40_spill] sm:$0xff] %v4119_v23 }
  0xd0   : > { %6492 = vst [vmem:[#allocation35_spill] sm:$0xff] %v4099_v44 }
  0xd3   : > { %v4101_v53 = vpop.f32.mrf.mxu0 }
  0xd4   : > { %6493 = vst [vmem:[#allocation36_spill] sm:$0xff] %v4101_v53  ;;  %3390 = vmatmul.msk.f32.gmra.mxu3 %vm500_vm0, %v3821_v57  ;;  %v496_v53 = vrot.slane %v3835_v61, 1 }
  0xd6   : > { %3314 = vmatmul.msk.f32.gmra.mxu0 %vm500_vm0, %v4104_v1  ;;  %v4131_v29 = vsel %vm442_vm1, %v494_v10, %v496_v53  ;;  %v826_v10 = vrot.slane %v3638_v4, 2 }
  0xd7   : > { %v4114_v30 = vpop.f32.mrf.mxu3  ;;  %6500 = vst [vmem:[#allocation43_spill] sm:$0xff] %v4131_v29 }
  0xd8   : > { %6495 = vst [vmem:[#allocation38_spill] sm:$0xff] %v4114_v30 }
  0xdb   : > { %v4116_v44 = vpop.f32.mrf.mxu0 }
  0xdc   : > { %6496 = vst [vmem:[#allocation39_spill] sm:$0xff] %v4116_v44  ;;  %3391 = vmatmul.msk.f32.gmra.mxu3 %vm500_vm0, %v3843_v63  ;;  %v4143_v44 = vsel %vm442_vm1, %v496_v53, %v3644_v6  ;;  %v829_v53 = vrot.slane %v3651_v9, 2 }
  0xdd   : > { %6503 = vst [vmem:[#allocation46_spill] sm:$0xff] %v4143_v44 }
  0xde   : > { %3315 = vmatmul.msk.f32.gmra.mxu0 %vm500_vm0, %v4119_v23 }
  0xdf   : > { %v4126_v1 = vpop.f32.mrf.mxu3 }
  0xe0   : > { %6498 = vst [vmem:[#allocation41_spill] sm:$0xff] %v4126_v1  ;;  %v827_v1 = vrot.slane %v3641_v5, 2  ;;  %v4168_v5 = vpop.f32.mrf.mxu1 }
  0xe2   : > { %v830_v4 = vsel %vm825_vm2, %v827_v1, %v829_v53 }
  0xe3   : > { %v4128_v52 = vpop.f32.mrf.mxu0 }
  0xe4   : > { %6499 = vst [vmem:[#allocation42_spill] sm:$0xff] %v4128_v52  ;;  %3392 = vmatmul.msk.f32.gmra.mxu3 %vm500_vm0, %v3862_v8 }
  0xe6   : > { %3316 = vmatmul.msk.f32.gmra.mxu0 %vm500_vm0, %v4131_v29 }
  0xe7   : > { %v4137_v38 = vpop.f32.mrf.mxu3 }
  0xe8   : > { %6501 = vst [vmem:[#allocation44_spill] sm:$0xff] %v4137_v38 }
  0xeb   : > { %v4139_v30 = vpop.f32.mrf.mxu0 }
  0xec   : > { %6502 = vst [vmem:[#allocation45_spill] sm:$0xff] %v4139_v30  ;;  %3393 = vmatmul.msk.f32.gmra.mxu3 %vm500_vm0, %v3881_v19  ;;  %v828_v30 = vsel %vm825_vm2, %v826_v10, %v827_v1  ;;  %v831_v10 = vrot.slane %v3665_v14, 2  ;;  %v833_v1 = vrot.slane %v3680_v18, 2 }
  0xee   : > { %3317 = vmatmul.msk.f32.gmra.mxu0 %vm500_vm0, %v4143_v44  ;;  %v832_v23 = vsel %vm825_vm2, %v829_v53, %v831_v10  ;;  %v835_v53 = vrot.slane %v3696_v22, 2 }
  0xef   : > { %v4151_v52 = vpop.f32.mrf.mxu3 }
  0xf0   : > { %v4202_v38 = vsel %vm825_vm2, %v833_v1, %v835_v53 }
  0xf3   : > { %v4153_v29 = vpop.f32.mrf.mxu0 }
  0xf4   : > { %6504 = vst [vmem:[#allocation47_spill] sm:$0xff] %v4153_v29  ;;  %3394 = vmatmul.msk.f32.gmra.mxu3 %vm500_vm0, %v3659_v12 }
  0xf6   : > { %3348 = vmatmul.msk.f32.vlgmr.msrb.gmra.mxu0 %vm500_vm0, %v828_v30  ;;  %v4173_v30 = vpop.f32.mrf.mxu2 }
  0xf7   : > { %v4160_v6 = vpop.f32.mrf.mxu3  ;;  %6507 = vst [vmem:[#allocation50_spill] sm:$0xff] %v4173_v30  ;;  %v834_v30 = vsel %vm825_vm2, %v831_v10, %v833_v1  ;;  %v837_v10 = vrot.slane %v3712_v26, 2 }
  0xfb   : > { %v4162_v44 = vpop.f32.mrf.mxu0 }
  0xfc   : > { %6505 = vst [vmem:[#allocation48_spill] sm:$0xff] %v4162_v44  ;;  %3395 = vmatmul.msk.f32.gmra.mxu3 %vm500_vm0, %v3672_v16  ;;  %v4184_v44 = vpop.f32.mrf.mxu1 }
  0xfe   : > { %3349 = vmatmul.msk.f32.gmra.mxu0 %vm500_vm0, %v830_v4  ;;  %v4186_v14 = vpop.f32.mrf.mxu2 }
  0xff   : > { %v4171_v29 = vpop.f32.mrf.mxu3  ;;  %6510 = vst [vmem:[#allocation53_spill] sm:$0xff] %v4186_v14 }
 0x100   : > { %6506 = vst [vmem:[#allocation49_spill] sm:$0xff] %v4171_v29 }
 0x103   : > { %v4175_v9 = vpop.f32.mrf.mxu0 }
 0x104   : > { %6508 = vst [vmem:[#allocation51_spill] sm:$0xff] %v4175_v9  ;;  %3396 = vmatmul.msk.f32.gmra.mxu3 %vm500_vm0, %v3688_v20  ;;  %v4197_v29 = vpop.f32.mrf.mxu1 }
 0x106   : > { %3350 = vmatmul.msk.f32.gmra.mxu0 %vm500_vm0, %v832_v23  ;;  %v4204_v14 = vpop.f32.mrf.mxu2 }
 0x107   : > { %v4182_v4 = vpop.f32.mrf.mxu3  ;;  %6514 = vst [vmem:[#allocation57_spill] sm:$0xff] %v4204_v14 }
 0x108   : > { %6509 = vst [vmem:[#allocation52_spill] sm:$0xff] %v4182_v4 }
 0x10b   : > { %v4188_v0 = vpop.f32.mrf.mxu0 }
 0x10c   : > { %6511 = vst [vmem:[#allocation54_spill] sm:$0xff] %v4188_v0  ;;  %3397 = vmatmul.msk.f32.gmra.mxu3 %vm500_vm0, %v3704_v24  ;;  %v4223_v14 = vpop.f32.mrf.mxu1 }
 0x10d   : > { %6517 = vst [vmem:[#allocation60_spill] sm:$0xff] %v4223_v14 }
 0x10e   : > { %3351 = vmatmul.msk.f32.gmra.mxu0 %vm500_vm0, %v834_v30 }
 0x10f   : > { %v4195_v9 = vpop.f32.mrf.mxu3 }
 0x110   : > { %6512 = vst [vmem:[#allocation55_spill] sm:$0xff] %v4195_v9  ;;  %v264_v9 = vld [vmem:[%s6351_s1 + $0x30] sm:$0xff] }
 0x111   : > { %1520 = vmatpush.msrb.mxu2 %v264_v9  ;;  %v4235_v9 = vpop.f32.mrf.mxu2 }
 0x112   : > { %3464 = vmatmul.msk.f32.vlgmr.msrb.gmra.mxu2 %vm500_vm0, %v3680_v18  ;;  %v265_v18 = vld [vmem:[%s6351_s1 + $0x38] sm:$0xff]  ;;  %6518 = vst [vmem:[#allocation61_spill] sm:$0xff] %v4235_v9  ;;  %v841_v9 = vrot.slane %v3768_v42, 2 }
 0x113   : > { %v4199_v4 = vpop.f32.mrf.mxu0  ;;  %1663 = vmatpush.msrb.mxu3 %v265_v18 }
 0x114   : > { %6513 = vst [vmem:[#allocation56_spill] sm:$0xff] %v4199_v4  ;;  %3398 = vmatmul.msk.f32.gmra.mxu3 %vm500_vm0, %v3735_v33  ;;  %v4221_v4 = vsel %vm825_vm2, %v835_v53, %v837_v10  ;;  %v839_v53 = vrot.slane %v3743_v35, 2  ;;  %v4255_v18 = vpop.f32.mrf.mxu1 }
 0x116   : > { %3352 = vmatmul.msk.f32.gmra.mxu0 %vm500_vm0, %v4202_v38 }
 0x117   : > { %v4211_v0 = vpop.f32.mrf.mxu3 }
 0x118   : > { %6515 = vst [vmem:[#allocation58_spill] sm:$0xff] %v4211_v0  ;;  %v263_v0 = vld [vmem:[%s6351_s1 + $0x28] sm:$0xff] }
 0x119   : > { %1381 = vmatpush.msrb.mxu1 %v263_v0  ;;  %v4246_v0 = vsel %vm825_vm2, %v837_v10, %v839_v53  ;;  %v4261_v10 = vpop.f32.mrf.mxu2 }
 0x11a   : > { %3435 = vmatmul.msk.f32.vlgmr.msrb.gmra.mxu1 %vm500_vm0, %v832_v23  ;;  %3465 = vmatmul.msk.f32.gmra.mxu2 %vm500_vm0, %v3696_v22  ;;  %v266_v23 = vld [vmem:[%s6351_s1 + $0x40] sm:$0xff]  ;;  %6522 = vst [vmem:[#allocation65_spill] sm:$0xff] %v4261_v10 }
 0x11b   : > { %v4218_v1 = vpop.f32.mrf.mxu0  ;;  %1806 = vmatpush.msrb.mxu0 %v266_v23 }
 0x11c   : > { %6516 = vst [vmem:[#allocation59_spill] sm:$0xff] %v4218_v1  ;;  %3399 = vmatmul.msk.f32.gmra.mxu3 %vm500_vm0, %v3760_v40  ;;  %v4279_v10 = vpop.f32.mrf.mxu1 }
 0x11e   : > { %3353 = vmatmul.msk.f32.gmra.mxu0 %vm500_vm0, %v4221_v4 }
 0x11f   : > { %v4239_v1 = vpop.f32.mrf.mxu3 }
 0x120   : > { %6519 = vst [vmem:[#allocation62_spill] sm:$0xff] %v4239_v1  ;;  %v4268_v1 = vsel %vm825_vm2, %v839_v53, %v841_v9 }
 0x122   : > { %3436 = vmatmul.msk.f32.gmra.mxu1 %vm500_vm0, %v834_v30  ;;  %3466 = vmatmul.msk.f32.gmra.mxu2 %vm500_vm0, %v3712_v26  ;;  %v843_v30 = vrot.slane %v3796_v50, 2  ;;  %v4283_v26 = vpop.f32.mrf.mxu2 }
 0x123   : > { %v4243_v14 = vpop.f32.mrf.mxu0  ;;  %6525 = vst [vmem:[#allocation68_spill] sm:$0xff] %v4283_v26 }
 0x124   : > { %6520 = vst [vmem:[#allocation63_spill] sm:$0xff] %v4243_v14  ;;  %3400 = vmatmul.msk.f32.gmra.mxu3 %vm500_vm0, %v3788_v48 }
 0x126   : > { %3354 = vmatmul.msk.f32.gmra.mxu0 %vm500_vm0, %v4246_v0 }
 0x127   : > { %v4259_v22 = vpop.f32.mrf.mxu3 }
 0x128   : > { %6521 = vst [vmem:[#allocation64_spill] sm:$0xff] %v4259_v22 }
 0x12a   : > { %3437 = vmatmul.msk.f32.gmra.mxu1 %vm500_vm0, %v4202_v38  ;;  %3467 = vmatmul.msk.f32.gmra.mxu2 %vm500_vm0, %v3743_v35  ;;  %v4300_v35 = vpop.f32.mrf.mxu1  ;;  %v4309_v22 = vpop.f32.mrf.mxu2 }
 0x12b   : > { %v4265_v14 = vpop.f32.mrf.mxu0  ;;  %6529 = vst [vmem:[#allocation71_spill] sm:$0xff] %v4309_v22 }
 0x12c   : > { %6523 = vst [vmem:[#allocation66_spill] sm:$0xff] %v4265_v14  ;;  %3401 = vmatmul.msk.f32.gmra.mxu3 %vm500_vm0, %v3813_v55  ;;  %v4288_v14 = vsel %vm825_vm2, %v841_v9, %v843_v30  ;;  %v6528_v9 = vrot.slane %v3715_v27, 2 }
 0x12e   : > { %3355 = vmatmul.msk.f32.gmra.mxu0 %vm500_vm0, %v4268_v1  ;;  %v4307_v26 = vsel %vm825_vm2, %v843_v30, %v6528_v9 }
 0x12f   : > { %v4277_v23 = vpop.f32.mrf.mxu3 }
 0x130   : > { %6524 = vst [vmem:[#allocation67_spill] sm:$0xff] %v4277_v23 }
 0x132   : > { %3438 = vmatmul.msk.f32.gmra.mxu1 %vm500_vm0, %v4221_v4  ;;  %3468 = vmatmul.msk.f32.gmra.mxu2 %vm500_vm0, %v3768_v42  ;;  %v4326_v9 = vpop.f32.mrf.mxu1 }
 0x133   : > { %v4285_v53 = vpop.f32.mrf.mxu0 }
 0x134   : > { %6526 = vst [vmem:[#allocation69_spill] sm:$0xff] %v4285_v53  ;;  %3402 = vmatmul.msk.f32.gmra.mxu3 %vm500_vm0, %v3835_v61 }
 0x136   : > { %3356 = vmatmul.msk.f32.gmra.mxu0 %vm500_vm0, %v4288_v14 }
 0x137   : > { %v4296_v23 = vpop.f32.mrf.mxu3 }
 0x13a   : > { %3439 = vmatmul.msk.f32.gmra.mxu1 %vm500_vm0, %v4246_v0  ;;  %3469 = vmatmul.msk.f32.gmra.mxu2 %vm500_vm0, %v3796_v50 }
 0x13b   : > { %v4302_v53 = vpop.f32.mrf.mxu0 }
 0x13c   : > { %6527 = vst [vmem:[#allocation70_spill] sm:$0xff] %v4302_v53  ;;  %3403 = vmatmul.msk.f32.gmra.mxu3 %vm500_vm0, %v3635_v3  ;;  %v4320_v53 = vld [vmem:[%s3632_s29 + $0xe8] sm:$0xff]  ;;  %v4332_v3 = vpop.f32.mrf.mxu2 }
 0x13d   : > { %6532 = vst [vmem:[#allocation74_spill] sm:$0xff] %v4332_v3 }
 0x13e   : > { %3357 = vmatmul.msk.f32.gmra.mxu0 %vm500_vm0, %v4307_v26 }
 0x13f   : > { %v4317_v42 = vpop.f32.mrf.mxu3 }
 0x140   : > { %6530 = vst [vmem:[#allocation72_spill] sm:$0xff] %v4317_v42  ;;  %v4339_v42 = vld [vmem:[%s3632_s29 + $0xf0] sm:$0xff] }
 0x142   : > { %3440 = vmatmul.msk.f32.gmra.mxu1 %vm500_vm0, %v4268_v1  ;;  %3470 = vmatmul.msk.f32.gmra.mxu2 %vm500_vm0, %v3715_v27 }
 0x143   : > { %v4324_v30 = vpop.f32.mrf.mxu0 }
 0x144   : > { %6531 = vst [vmem:[#allocation73_spill] sm:$0xff] %v4324_v30  ;;  %3404 = vmatmul.msk.f32.gmra.mxu3 %vm500_vm0, %v4320_v53  ;;  %v4355_v3 = vpop.f32.mrf.mxu2 }
 0x145   : > { %6535 = vst [vmem:[#allocation77_spill] sm:$0xff] %v4355_v3 }
 0x146   : > { %3406 = vmatmul.msk.f32.vlgmr.msra.gmra.mxu0 %vm500_vm0, %v3675_v17  ;;  %v4349_v17 = vpop.f32.mrf.mxu1 }
 0x147   : > { %v4336_v22 = vpop.f32.mrf.mxu3 }
 0x14a   : > { %3441 = vmatmul.msk.f32.gmra.mxu1 %vm500_vm0, %v4288_v14  ;;  %3471 = vmatmul.msk.f32.gmra.mxu2 %vm500_vm0, %v3718_v28 }
 0x14b   : > { %v4343_v50 = vpop.f32.mrf.mxu0 }
 0x14c   : > { %6533 = vst [vmem:[#allocation75_spill] sm:$0xff] %v4343_v50  ;;  %3405 = vmatmul.msk.f32.gmra.mxu3 %vm500_vm0, %v4339_v42  ;;  %v4373_v3 = vpop.f32.mrf.mxu2 }
 0x14d   : > { %6538 = vst [vmem:[#allocation80_spill] sm:$0xff] %v4373_v3 }
 0x14e   : > { %3407 = vmatmul.msk.f32.gmra.mxu0 %vm500_vm0, %v3691_v21  ;;  %v4369_v50 = vpop.f32.mrf.mxu1 }
 0x14f   : > { %v4353_v30 = vpop.f32.mrf.mxu3 }
 0x150   : > { %6534 = vst [vmem:[#allocation76_spill] sm:$0xff] %v4353_v30 }
 0x152   : > { %3442 = vmatmul.msk.f32.gmra.mxu1 %vm500_vm0, %v4307_v26  ;;  %3472 = vmatmul.msk.f32.gmra.mxu2 %vm500_vm0, %v3746_v36 }
 0x153   : > { %v4359_v27 = vpop.f32.mrf.mxu0 }
 0x154   : > { %6536 = vst [vmem:[#allocation78_spill] sm:$0xff] %v4359_v27  ;;  %3493 = vmatmul.msk.f32.vlgmr.msrb.gmra.mxu3 %vm500_vm0, %v3707_v25  ;;  %v4391_v3 = vpop.f32.mrf.mxu2 }
 0x155   : > { %6542 = vst [vmem:[#allocation84_spill] sm:$0xff] %v4391_v3 }
 0x156   : > { %3408 = vmatmul.msk.f32.gmra.mxu0 %vm500_vm0, %v3707_v25  ;;  %v4387_v27 = vpop.f32.mrf.mxu1 }
 0x157   : > { %v4367_v21 = vpop.f32.mrf.mxu3 }
 0x158   : > { %6537 = vst [vmem:[#allocation79_spill] sm:$0xff] %v4367_v21 }
 0x15a   : > { %3443 = vmatmul.msk.f32.gmra.mxu1 %vm500_vm0, %v3730_v32  ;;  %3473 = vmatmul.msk.f32.gmra.mxu2 %vm500_vm0, %v3771_v43 }
 0x15b   : > { %v4375_v28 = vpop.f32.mrf.mxu0 }
 0x15c   : > { %6539 = vst [vmem:[#allocation81_spill] sm:$0xff] %v4375_v28  ;;  %3494 = vmatmul.msk.f32.gmra.mxu3 %vm500_vm0, %v3738_v34 }
 0x15e   : > { %3409 = vmatmul.msk.f32.gmra.mxu0 %vm500_vm0, %v3738_v34  ;;  %v4405_v28 = vpop.f32.mrf.mxu1 }
 0x15f   : > { %v4383_v25 = vpop.f32.mrf.mxu3 }
 0x160   : > { %6540 = vst [vmem:[#allocation82_spill] sm:$0xff] %v4383_v25  ;;  %v6577_v25 = vld [vmem:[#allocation14_spill] sm:$0xff] }
 0x162   : > { %3444 = vmatmul.msk.f32.gmra.mxu1 %vm500_vm0, %v3755_v39  ;;  %3474 = vmatmul.msk.f32.gmra.mxu2 %vm500_vm0, %v3799_v51 }
 0x163   : > { %v4389_v36 = vpop.f32.mrf.mxu0 }
 0x164   : > { %6541 = vst [vmem:[#allocation83_spill] sm:$0xff] %v4389_v36  ;;  %3495 = vmatmul.msk.f32.gmra.mxu3 %vm500_vm0, %v3763_v41  ;;  %v4411_v36 = vpop.f32.mrf.mxu2 }
 0x165   : > { %6545 = vst [vmem:[#allocation87_spill] sm:$0xff] %v4411_v36 }
 0x166   : > { %3410 = vmatmul.msk.f32.gmra.mxu0 %vm500_vm0, %v3763_v41 }
 0x167   : > { %v4399_v34 = vpop.f32.mrf.mxu3 }
 0x168   : > { %6543 = vst [vmem:[#allocation85_spill] sm:$0xff] %v4399_v34 }
 0x16a   : > { %3445 = vmatmul.msk.f32.gmra.mxu1 %vm500_vm0, %v3783_v47  ;;  %3475 = vmatmul.msk.f32.gmra.mxu2 %vm500_vm0, %v3821_v57 }
 0x16b   : > { %v4403_v43 = vpop.f32.mrf.mxu0 }
 0x16c   : > { %6544 = vst [vmem:[#allocation86_spill] sm:$0xff] %v4403_v43  ;;  %3496 = vmatmul.msk.f32.gmra.mxu3 %vm500_vm0, %v3791_v49  ;;  %v4425_v43 = vpop.f32.mrf.mxu1  ;;  %v4431_v36 = vpop.f32.mrf.mxu2 }
 0x16d   : > { %6547 = vst [vmem:[#allocation89_spill] sm:$0xff] %v4425_v43 }
 0x16e   : > { %3411 = vmatmul.msk.f32.gmra.mxu0 %vm500_vm0, %v3791_v49  ;;  %6549 = vst [vmem:[#allocation91_spill] sm:$0xff] %v4431_v36 }
 0x16f   : > { %v4415_v41 = vpop.f32.mrf.mxu3 }
 0x170   : > { %6546 = vst [vmem:[#allocation88_spill] sm:$0xff] %v4415_v41  ;;  %v6572_v41 = vld [vmem:[#allocation5_spill] sm:$0xff] }
 0x172   : > { %3446 = vmatmul.msk.f32.gmra.mxu1 %vm500_vm0, %v3808_v54  ;;  %3476 = vmatmul.msk.f32.gmra.mxu2 %vm500_vm0, %v3843_v63 }
 0x173   : > { %v4419_v51 = vpop.f32.mrf.mxu0 }
 0x174   : > { %3497 = vmatmul.msk.f32.gmra.mxu3 %vm500_vm0, %v3816_v56  ;;  %v4445_v3 = vpop.f32.mrf.mxu1  ;;  %v4449_v36 = vpop.f32.mrf.mxu2 }
 0x175   : > { %6551 = vst [vmem:[#allocation93_spill] sm:$0xff] %v4445_v3 }
 0x176   : > { %3412 = vmatmul.msk.f32.gmra.mxu0 %vm500_vm0, %v3816_v56  ;;  %6552 = vst [vmem:[#allocation94_spill] sm:$0xff] %v4449_v36 }
 0x177   : > { %v4429_v49 = vpop.f32.mrf.mxu3 }
 0x178   : > { %6548 = vst [vmem:[#allocation90_spill] sm:$0xff] %v4429_v49 }
 0x17a   : > { %3447 = vmatmul.msk.f32.gmra.mxu1 %vm500_vm0, %v3830_v60  ;;  %3477 = vmatmul.msk.f32.gmra.mxu2 %vm500_vm0, %v3862_v8 }
 0x17b   : > { %v4435_v57 = vpop.f32.mrf.mxu0 }
 0x17c   : > { %3498 = vmatmul.msk.f32.gmra.mxu3 %vm500_vm0, %v3838_v62  ;;  %v4467_v36 = vpop.f32.mrf.mxu2 }
 0x17d   : > { %6555 = vst [vmem:[#allocation97_spill] sm:$0xff] %v4467_v36 }
 0x17e   : > { %3413 = vmatmul.msk.f32.gmra.mxu0 %vm500_vm0, %v3838_v62 }
 0x17f   : > { %v4443_v56 = vpop.f32.mrf.mxu3 }
 0x180   : > { %6550 = vst [vmem:[#allocation92_spill] sm:$0xff] %v4443_v56  ;;  %v4463_v56 = vpop.f32.mrf.mxu1 }
 0x181   : > { %6554 = vst [vmem:[#allocation96_spill] sm:$0xff] %v4463_v56 }
 0x182   : > { %3448 = vmatmul.msk.f32.gmra.mxu1 %vm500_vm0, %v3852_v2  ;;  %3478 = vmatmul.msk.f32.gmra.mxu2 %vm500_vm0, %v3881_v19 }
 0x183   : > { %v4451_v63 = vpop.f32.mrf.mxu0 }
 0x184   : > { %3499 = vmatmul.msk.f32.gmra.mxu3 %vm500_vm0, %v3857_v7  ;;  %v4487_v36 = vpop.f32.mrf.mxu2 }
 0x185   : > { %6558 = vst [vmem:[#allocation100_spill] sm:$0xff] %v4487_v36 }
 0x186   : > { %3414 = vmatmul.msk.f32.gmra.mxu0 %vm500_vm0, %v3857_v7 }
 0x187   : > { %v4459_v62 = vpop.f32.mrf.mxu3 }
 0x188   : > { %6553 = vst [vmem:[#allocation95_spill] sm:$0xff] %v4459_v62  ;;  %v4481_v62 = vpop.f32.mrf.mxu1 }
 0x189   : > { %6557 = vst [vmem:[#allocation99_spill] sm:$0xff] %v4481_v62  ;;  %v6575_v62 = vld [vmem:[#allocation7_spill] sm:$0xff] }
 0x18a   : > { %3449 = vmatmul.msk.f32.gmra.mxu1 %vm500_vm0, %v3871_v13  ;;  %3479 = vmatmul.msk.f32.gmra.mxu2 %vm500_vm0, %v3659_v12 }
 0x18b   : > { %v4465_v8 = vpop.f32.mrf.mxu0 }
 0x18c   : > { %3500 = vmatmul.msk.f32.gmra.mxu3 %vm500_vm0, %v3876_v15  ;;  %v4507_v36 = vpop.f32.mrf.mxu2 }
 0x18d   : > { %6562 = vst [vmem:[#allocation104_spill] sm:$0xff] %v4507_v36 }
 0x18e   : > { %3415 = vmatmul.msk.f32.gmra.mxu0 %vm500_vm0, %v3876_v15 }
 0x18f   : > { %v4475_v7 = vpop.f32.mrf.mxu3 }
 0x190   : > { %6556 = vst [vmem:[#allocation98_spill] sm:$0xff] %v4475_v7  ;;  %v4501_v7 = vpop.f32.mrf.mxu1 }
 0x191   : > { %6560 = vst [vmem:[#allocation102_spill] sm:$0xff] %v4501_v7  ;;  %v739_v7 = vadd.f32 %v4168_v5, %v6572_v41 }
 0x192   : > { %3450 = vmatmul.msk.f32.gmra.mxu1 %vm500_vm0, %v3890_v31  ;;  %3480 = vmatmul.msk.f32.gmra.mxu2 %vm500_vm0, %v3672_v16 }
 0x193   : > { %v4479_v19 = vpop.f32.mrf.mxu0 }
 0x194   : > { %3501 = vmatmul.msk.f32.gmra.mxu3 %vm500_vm0, %v3895_v37  ;;  %v4525_v36 = vpop.f32.mrf.mxu2 }
 0x195   : > { %6565 = vst [vmem:[#allocation107_spill] sm:$0xff] %v4525_v36 }
 0x196   : > { %3416 = vmatmul.msk.f32.gmra.mxu0 %vm500_vm0, %v3895_v37 }
 0x197   : > { %v4491_v15 = vpop.f32.mrf.mxu3 }
 0x198   : > { %6559 = vst [vmem:[#allocation101_spill] sm:$0xff] %v4491_v15  ;;  %v4521_v15 = vpop.f32.mrf.mxu1 }
 0x199   : > { %6564 = vst [vmem:[#allocation106_spill] sm:$0xff] %v4521_v15  ;;  %v6569_v15 = vld [vmem:[#allocation6_spill] sm:$0xff] }
 0x19a   : > { %3451 = vmatmul.msk.f32.gmra.mxu1 %vm500_vm0, %v3906_v45  ;;  %3481 = vmatmul.msk.f32.gmra.mxu2 %vm500_vm0, %v3688_v20 }
 0x19b   : > { %v4495_v12 = vpop.f32.mrf.mxu0 }
 0x19c   : > { %3502 = vmatmul.msk.f32.gmra.mxu3 %vm500_vm0, %v3911_v46  ;;  %v1042_v49 = vpop.f32.mrf.mxu2 }
 0x19e   : > { %3417 = vmatmul.msk.f32.gmra.mxu0 %vm500_vm0, %v3911_v46 }
 0x19f   : > { %v4505_v37 = vpop.f32.mrf.mxu3 }
 0x1a0   : > { %6561 = vst [vmem:[#allocation103_spill] sm:$0xff] %v4505_v37 }
 0x1a2   : > { %3452 = vmatmul.msk.f32.gmra.mxu1 %vm500_vm0, %v3922_v58  ;;  %3482 = vmatmul.msk.f32.gmra.mxu2 %vm500_vm0, %v3704_v24  ;;  %v4540_v24 = vpop.f32.mrf.mxu1 }
 0x1a3   : > { %v4511_v16 = vpop.f32.mrf.mxu0  ;;  %6568 = vst [vmem:[#allocation108_spill] sm:$0xff] %v4540_v24 }
 0x1a4   : > { %3503 = vmatmul.msk.f32.gmra.mxu3 %vm500_vm0, %v3927_v59  ;;  %v1522_v34 = vpop.f32.mrf.mxu2 }
 0x1a6   : > { %3418 = vmatmul.msk.f32.gmra.mxu0 %vm500_vm0, %v3927_v59  ;;  %v6566_v59 = vld [vmem:[#allocation3_spill] sm:$0xff] }
 0x1a7   : > { %v4519_v46 = vpop.f32.mrf.mxu3 }
 0x1a8   : > { %6563 = vst [vmem:[#allocation105_spill] sm:$0xff] %v4519_v46  ;;  %v282_v46 = vld [vmem:[%s6353_s3 + $0x78] sm:$0xff] }
 0x1a9   : > { %2172 = vmatpush.msra.mxu2 %v282_v46 }
 0x1aa   : > { %3453 = vmatmul.msk.f32.gmra.mxu1 %vm500_vm0, %v6566_v59  ;;  %3483 = vmatmul.msk.f32.gmra.mxu2 %vm500_vm0, %v3735_v33  ;;  %v1383_v33 = vpop.f32.mrf.mxu1 }
 0x1ab   : > { %v4527_v20 = vpop.f32.mrf.mxu0 }
 0x1ac   : > { %3504 = vmatmul.msk.f32.gmra.mxu3 %vm500_vm0, %v3943_v11 }
 0x1ae   : > { %3419 = vmatmul.msk.f32.gmra.mxu0 %vm500_vm0, %v3943_v11  ;;  %v298_v11 = vld [vmem:[%s6353_s3 + $0xf8] sm:$0xff] }
 0x1af   : > { %v4535_v37 = vpop.f32.mrf.mxu3  ;;  %2083 = vmatpush.msra.mxu1 %v298_v11  ;;  %v1045_v11 = vadd.f32 %v4419_v51, %v739_v7  ;;  %v6576_v51 = vld [vmem:[#allocation9_spill] sm:$0xff] }
 0x1b0   : > { %6567 = vst [vmem:[#allocation3_spill] sm:$0xff] %v4535_v37  ;;  %v6571_v37 = vld [vmem:[#allocation4_spill] sm:$0xff]  ;;  %v742_v7 = vadd.f32 %v4184_v44, %v6576_v51  ;;  %v6579_v44 = vld [vmem:[#allocation11_spill] sm:$0xff] }
 0x1b1   : > { %v1184_v5 = vadd.f32 %v4151_v52, %v1045_v11  ;;  %v6581_v51 = vld [vmem:[#allocation44_spill] sm:$0xff] }
 0x1b2   : > { %3454 = vmatmul.msk.f32.gmra.mxu1 %vm500_vm0, %v6571_v37  ;;  %3484 = vmatmul.msk.f32.gmra.mxu2 %vm500_vm0, %v3760_v40  ;;  %v281_v40 = vld [vmem:[%s6353_s3 + $0x70] sm:$0xff]  ;;  %v1386_v56 = vpop.f32.mrf.mxu1  ;;  %v1046_v52 = vadd.f32 %v4435_v57, %v742_v7  ;;  %v6582_v57 = vld [vmem:[#allocation13_spill] sm:$0xff] }
 0x1b3   : > { %v4542_v36 = vpop.f32.mrf.mxu0  ;;  %2173 = vmatpush.msra.mxu2 %v281_v40 }
 0x1b4   : > { %3505 = vmatmul.msk.f32.gmra.mxu3 %vm500_vm0, %v6569_v15 }
 0x1b6   : > { %3420 = vmatmul.msk.f32.gmra.mxu0 %vm500_vm0, %v6569_v15  ;;  %v6573_v15 = vld [vmem:[#allocation10_spill] sm:$0xff] }
 0x1b7   : > { %v4553_v46 = vpop.f32.mrf.mxu3 }
 0x1b8   : > { %6570 = vst [vmem:[#allocation6_spill] sm:$0xff] %v4553_v46 }
 0x1ba   : > { %3455 = vmatmul.msk.f32.gmra.mxu1 %vm500_vm0, %v6575_v62  ;;  %3485 = vmatmul.msk.f32.gmra.mxu2 %vm500_vm0, %v3788_v48  ;;  %v1525_v48 = vpop.f32.mrf.mxu2 }
 0x1bb   : > { %v4557_v24 = vpop.f32.mrf.mxu0 }
 0x1bc   : > { %3506 = vmatmul.msk.f32.gmra.mxu3 %vm500_vm0, %v6573_v15 }
 0x1be   : > { %3421 = vmatmul.msk.f32.gmra.mxu0 %vm500_vm0, %v6573_v15 }
 0x1bf   : > { %v4568_v46 = vpop.f32.mrf.mxu3 }
 0x1c0   : > { %6574 = vst [vmem:[#allocation4_spill] sm:$0xff] %v4568_v46  ;;  %v297_v46 = vld [vmem:[%s6353_s3 + $0xf0] sm:$0xff] }
 0x1c1   : > { %2084 = vmatpush.msra.mxu1 %v297_v46  ;;  %v745_v46 = vadd.f32 %v4197_v29, %v6582_v57  ;;  %v6584_v29 = vld [vmem:[#allocation15_spill] sm:$0xff] }
 0x1c2   : > { %3456 = vmatmul.msk.f32.gmra.mxu1 %vm500_vm0, %v6579_v44  ;;  %3486 = vmatmul.msk.f32.gmra.mxu2 %vm500_vm0, %v3813_v55 }
 0x1c3   : > { %v1240_v41 = vpop.f32.mrf.mxu0 }
 0x1c4   : > { %v1327_v15 = vadd.f32 %v1240_v41, %v1184_v5  ;;  %3507 = vmatmul.msk.f32.gmra.mxu3 %vm500_vm0, %v6577_v25  ;;  %v1185_v5 = vadd.f32 %v4160_v6, %v1046_v52  ;;  %v6580_v41 = vld [vmem:[#allocation8_spill] sm:$0xff]  ;;  %v280_v6 = vld [vmem:[%s6353_s3 + $0x68] sm:$0xff]  ;;  %v1389_v52 = vpop.f32.mrf.mxu1 }
 0x1c5   : > { %v823_v3 = vadd.f32 %v6581_v51, %v6580_v41  ;;  %2174 = vmatpush.msra.mxu2 %v280_v6  ;;  %v6590_v6 = vld [vmem:[#allocation19_spill] sm:$0xff] }
 0x1c6   : > { %v1470_v11 = vadd.f32 %v1383_v33, %v1327_v15  ;;  %3422 = vmatmul.msk.f32.gmra.mxu0 %vm500_vm0, %v6577_v25  ;;  %v6583_v33 = vld [vmem:[#allocation18_spill] sm:$0xff] }
 0x1c7   : > { %v4588_v21 = vpop.f32.mrf.mxu3  ;;  %v1073_v15 = vadd.f32 %v1042_v49, %v823_v3  ;;  %v6587_v3 = vld [vmem:[#allocation17_spill] sm:$0xff]  ;;  %v6588_v49 = vld [vmem:[#allocation60_spill] sm:$0xff] }
 0x1c8   : > { %v1609_v40 = vadd.f32 %v1522_v34, %v1470_v11  ;;  %6578 = vst [vmem:[#allocation5_spill] sm:$0xff] %v4588_v21  ;;  %v1047_v34 = vadd.f32 %v4451_v63, %v745_v46  ;;  %v6586_v63 = vld [vmem:[#allocation49_spill] sm:$0xff]  ;;  %v6589_v46 = vld [vmem:[#allocation22_spill] sm:$0xff] }
 0x1ca   : > { %3457 = vmatmul.msk.f32.gmra.mxu1 %vm500_vm0, %v6584_v29  ;;  %v1186_v41 = vadd.f32 %v6586_v63, %v1047_v34  ;;  %3487 = vmatmul.msk.f32.gmra.mxu2 %vm500_vm0, %v3835_v61 }
 0x1cb   : > { %v1243_v30 = vpop.f32.mrf.mxu0 }
 0x1cc   : > { %v1328_v25 = vadd.f32 %v1243_v30, %v1185_v5  ;;  %3508 = vmatmul.msk.f32.gmra.mxu3 %vm500_vm0, %v6583_v33  ;;  %v1528_v5 = vpop.f32.mrf.mxu2  ;;  %v1392_v61 = vpop.f32.mrf.mxu1 }
 0x1ce   : > { %v1471_v7 = vadd.f32 %v1386_v56, %v1328_v25  ;;  %3423 = vmatmul.msk.f32.gmra.mxu0 %vm500_vm0, %v6583_v33  ;;  %v296_v56 = vld [vmem:[%s6353_s3 + $0xe8] sm:$0xff] }
 0x1cf   : > { %v1181_v11 = vpop.f32.mrf.mxu3  ;;  %2085 = vmatpush.msra.mxu1 %v296_v56 }
 0x1d0   : > { %v1610_v55 = vadd.f32 %v1525_v48, %v1471_v7  ;;  %v4609_v30 = vadd.f32 %v1181_v11, %v1073_v15  ;;  %v748_v48 = vadd.f32 %v6588_v49, %v6587_v3  ;;  %v6591_v11 = vld [vmem:[#allocation52_spill] sm:$0xff]  ;;  %v6593_v49 = vld [vmem:[#allocation26_spill] sm:$0xff] }
 0x1d2   : > { %6585 = vst [vmem:[#allocation10_spill] sm:$0xff] %v4609_v30  ;;  %v1048_v25 = vadd.f32 %v4465_v8, %v748_v48  ;;  %3458 = vmatmul.msk.f32.gmra.mxu1 %vm500_vm0, %v6590_v6  ;;  %v6592_v8 = vld [vmem:[#allocation21_spill] sm:$0xff] }
 0x1d3   : > { %v1246_v51 = vpop.f32.mrf.mxu0 }
 0x1d4   : > { %v1329_v57 = vadd.f32 %v1246_v51, %v1186_v41  ;;  %3509 = vmatmul.msk.f32.gmra.mxu3 %vm500_vm0, %v6589_v46  ;;  %v1187_v56 = vadd.f32 %v6591_v11, %v1048_v25  ;;  %v1531_v41 = vpop.f32.mrf.mxu2  ;;  %v3568_v51 = vld [vmem:[%s3632_s29 + $0xe0] sm:$0xff]  ;;  %v6594_v25 = vld [vmem:[#allocation23_spill] sm:$0xff]  ;;  %v1395_v11 = vpop.f32.mrf.mxu1 }
 0x1d5   : > { %3488 = vmatmul.msk.f32.gmra.mxu2 %vm500_vm0, %v3568_v51 }
 0x1d6   : > { %v1472_v33 = vadd.f32 %v1389_v52, %v1329_v57  ;;  %3424 = vmatmul.msk.f32.gmra.mxu0 %vm500_vm0, %v6589_v46  ;;  %v751_v52 = vadd.f32 %v4255_v18, %v6592_v8 }
 0x1d7   : > { %v1665_v7 = vpop.f32.mrf.mxu3 }
 0x1d8   : > { %v1611_v34 = vadd.f32 %v1528_v5, %v1472_v33  ;;  %v4626_v15 = vadd.f32 %v1665_v7, %v1609_v40  ;;  %v1049_v5 = vadd.f32 %v4479_v19, %v751_v52  ;;  %v279_v40 = vld [vmem:[%s6353_s3 + $0x60] sm:$0xff]  ;;  %v6595_v33 = vld [vmem:[#allocation55_spill] sm:$0xff]  ;;  %v6597_v52 = vld [vmem:[#allocation28_spill] sm:$0xff] }
 0x1d9   : > { %2175 = vmatpush.msra.mxu2 %v279_v40  ;;  %v295_v19 = vld [vmem:[%s6353_s3 + $0xe0] sm:$0xff] }
 0x1da   : > { %3459 = vmatmul.msk.f32.gmra.mxu1 %vm500_vm0, %v6594_v25  ;;  %v1188_v7 = vadd.f32 %v6595_v33, %v1049_v5  ;;  %v278_v5 = vld [vmem:[%s6353_s3 + $0x58] sm:$0xff] }
 0x1db   : > { %v1249_v63 = vpop.f32.mrf.mxu0  ;;  %2086 = vmatpush.msra.mxu1 %v295_v19  ;;  %2176 = vmatpush.msra.mxu2 %v278_v5  ;;  %v1356_v19 = vrot.slane %v4320_v53, 2  ;;  %v6602_v5 = vld [vmem:[#allocation40_spill] sm:$0xff] }
 0x1dc   : > { %v1330_v3 = vadd.f32 %v1249_v63, %v1187_v56  ;;  %3510 = vmatmul.msk.f32.gmra.mxu3 %vm500_vm0, %v6593_v49  ;;  %v6596_v63 = vld [vmem:[#allocation31_spill] sm:$0xff] }
 0x1dd   : > { %3489 = vmatmul.msk.f32.gmra.mxu2 %vm500_vm0, %v4320_v53 }
 0x1de   : > { %v1473_v48 = vadd.f32 %v1392_v61, %v1330_v3  ;;  %3425 = vmatmul.msk.f32.gmra.mxu0 %vm500_vm0, %v6593_v49 }
 0x1df   : > { %v1668_v46 = vpop.f32.mrf.mxu3 }
 0x1e0   : > { %v1612_v57 = vadd.f32 %v1531_v41, %v1473_v48  ;;  %v4643_v18 = vadd.f32 %v1668_v46, %v1610_v55  ;;  %v1534_v41 = vpop.f32.mrf.mxu2  ;;  %v6598_v48 = vld [vmem:[#allocation34_spill] sm:$0xff] }
 0x1e2   : > { %3460 = vmatmul.msk.f32.gmra.mxu1 %vm500_vm0, %v6597_v52 }
 0x1e3   : > { %v1252_v61 = vpop.f32.mrf.mxu0 }
 0x1e4   : > { %v1331_v56 = vadd.f32 %v1252_v61, %v1188_v7  ;;  %3511 = vmatmul.msk.f32.gmra.mxu3 %vm500_vm0, %v6596_v63  ;;  %v6599_v7 = vld [vmem:[#allocation37_spill] sm:$0xff]  ;;  %v6600_v61 = vld [vmem:[#allocation27_spill] sm:$0xff] }
 0x1e5   : > { %3490 = vmatmul.msk.f32.gmra.mxu2 %vm500_vm0, %v4339_v42 }
 0x1e6   : > { %v1474_v51 = vadd.f32 %v1395_v11, %v1331_v56  ;;  %3426 = vmatmul.msk.f32.gmra.mxu0 %vm500_vm0, %v6596_v63  ;;  %v4684_v11 = vsel %vm825_vm2, %v6600_v61, %v1356_v19  ;;  %v277_v63 = vld [vmem:[%s6353_s3 + $0x50] sm:$0xff] }
 0x1e7   : > { %v1671_v8 = vpop.f32.mrf.mxu3  ;;  %2177 = vmatpush.msra.mxu2 %v277_v63  ;;  %v6605_v63 = vld [vmem:[#allocation46_spill] sm:$0xff] }
 0x1e8   : > { %v1613_v55 = vadd.f32 %v1534_v41, %v1474_v51  ;;  %v4657_v3 = vadd.f32 %v1671_v8, %v1611_v34  ;;  %v294_v34 = vld [vmem:[%s6353_s3 + $0xd8] sm:$0xff]  ;;  %v4694_v41 = vrot.slane %v4339_v42, 2 }
 0x1e9   : > { %2087 = vmatpush.msra.mxu1 %v294_v34  ;;  %v4699_v8 = vld [vmem:[%s3632_s29 + $0xf8] sm:$0xff]  ;;  %v4719_v34 = vld [vmem:[%s3632_s29 + $0x100] sm:$0xf] }
 0x1ea   : > { %3461 = vmatmul.msk.f32.gmra.mxu1 %vm500_vm0, %v4684_v11  ;;  %6601 = vst [vmem:[#allocation7_spill] sm:$0xff] %v4694_v41 }
 0x1eb   : > { %v4659_v49 = vpop.f32.mrf.mxu0 }
 0x1ec   : > { %3512 = vmatmul.msk.f32.gmra.mxu3 %vm500_vm0, %v6598_v48 }
 0x1ed   : > { %3491 = vmatmul.msk.f32.gmra.mxu2 %vm500_vm0, %v4699_v8 }
 0x1ee   : > { %3427 = vmatmul.msk.f32.gmra.mxu0 %vm500_vm0, %v6598_v48  ;;  %v4712_v48 = vsel %vm825_vm2, %v1356_v19, %v4694_v41  ;;  %v276_v19 = vld [vmem:[%s6353_s3 + $0x48] sm:$0xff] }
 0x1ef   : > { %v1674_v40 = vpop.f32.mrf.mxu3  ;;  %6603 = vst [vmem:[#allocation9_spill] sm:$0xff] %v4712_v48  ;;  %2178 = vmatpush.msra.mxu2 %v276_v19  ;;  %v1215_v19 = vrot.slane %v4339_v42, 1  ;;  %v1638_v42 = vrot.slane %v4699_v8, 1 }
 0x1f0   : > { %v4673_v46 = vadd.f32 %v1674_v40, %v1612_v57 }
 0x1f2   : > { %3462 = vmatmul.msk.f32.gmra.mxu1 %vm500_vm0, %v4712_v48 }
 0x1f3   : > { %v4676_v33 = vpop.f32.mrf.mxu0 }
 0x1f4   : > { %3513 = vmatmul.msk.f32.gmra.mxu3 %vm500_vm0, %v6599_v7 }
 0x1f5   : > { %3492 = vmatmul.msk.f32.gmra.mxu2 %vm500_vm0, %v4719_v34 }
 0x1f6   : > { %3428 = vmatmul.msk.f32.gmra.mxu0 %vm500_vm0, %v6599_v7  ;;  %v6604_v7 = vld [vmem:[#allocation43_spill] sm:$0xff] }
 0x1f7   : > { %v1677_v56 = vpop.f32.mrf.mxu3 }
 0x1f8   : > { %v4688_v57 = vadd.f32 %v1677_v56, %v1613_v55  ;;  %v293_v55 = vld [vmem:[%s6353_s3 + $0xd0] sm:$0xff]  ;;  %v292_v56 = vld [vmem:[%s6353_s3 + $0xc8] sm:$0xff] }
 0x1f9   : > { %2088 = vmatpush.msra.mxu1 %v293_v55  ;;  %v6606_v55 = vld [vmem:[#allocation2_spill] sm:$0xff] }
 0x1fa   : > { %3463 = vmatmul.msk.f32.gmra.mxu1 %vm500_vm0, %v4694_v41 }
 0x1fb   : > { %v4696_v51 = vpop.f32.mrf.mxu0  ;;  %2089 = vmatpush.msra.mxu1 %v292_v56  ;;  %v275_v56 = vld [vmem:[%s6353_s3 + $0x40] sm:$0xff] }
 0x1fc   : > { %3514 = vmatmul.msk.f32.gmra.mxu3 %vm500_vm0, %v6602_v5  ;;  %2179 = vmatpush.msra.mxu2 %v275_v56  ;;  %v274_v56 = vld [vmem:[%s6353_s3 + $0x38] sm:$0xff] }
 0x1fe   : > { %3429 = vmatmul.msk.f32.gmra.mxu0 %vm500_vm0, %v6602_v5  ;;  %v1213_v5 = vrot.slane %v4320_v53, 1  ;;  %2180 = vmatpush.msra.mxu2 %v274_v56 }
 0x200   : > { %v1216_v53 = vsel %vm442_vm1, %v1213_v5, %v1215_v19 }
 0x203   : > { %v4716_v40 = vpop.f32.mrf.mxu0 }
 0x204   : > { %3515 = vmatmul.msk.f32.gmra.mxu3 %vm500_vm0, %v6604_v7 }
 0x206   : > { %3430 = vmatmul.msk.f32.gmra.mxu0 %vm500_vm0, %v6604_v7  ;;  %v1214_v7 = vsel %vm442_vm1, %v6606_v55, %v1213_v5  ;;  %v1639_v55 = vsel %vm442_vm1, %v1215_v19, %v1638_v42  ;;  %v1640_v5 = vrot.slane %v4719_v34, 1 }
 0x20b   : > { %v4732_v61 = vpop.f32.mrf.mxu0 }
 0x20c   : > { %3516 = vmatmul.msk.f32.gmra.mxu3 %vm500_vm0, %v6605_v63 }
 0x20e   : > { %3431 = vmatmul.msk.f32.gmra.mxu0 %vm500_vm0, %v6605_v63  ;;  %v291_v63 = vld [vmem:[%s6353_s3 + $0xc0] sm:$0xff] }
 0x20f   : > { %2090 = vmatpush.msra.mxu1 %v291_v63  ;;  %v290_v63 = vld [vmem:[%s6353_s3 + $0xb8] sm:$0xff] }
 0x211   : > { %2091 = vmatpush.msra.mxu1 %v290_v63  ;;  %v4804_v63 = vpop.f32.mrf.mxu2 }
 0x213   : > { %v4744_v30 = vpop.f32.mrf.mxu0 }
 0x214   : > { %3517 = vmatmul.msk.f32.gmra.mxu3 %vm500_vm0, %v1214_v7 }
 0x216   : > { %3432 = vmatmul.msk.f32.gmra.mxu0 %vm500_vm0, %v1214_v7 }
 0x21b   : > { %v4753_v21 = vpop.f32.mrf.mxu0 }
 0x21c   : > { %6607 = vst [vmem:[#allocation14_spill] sm:$0xff] %v4753_v21  ;;  %3518 = vmatmul.msk.f32.gmra.mxu3 %vm500_vm0, %v1216_v53 }
 0x21e   : > { %3433 = vmatmul.msk.f32.gmra.mxu0 %vm500_vm0, %v1216_v53  ;;  %v1641_v53 = vsel %vm442_vm1, %v1638_v42, %v1640_v5  ;;  %v289_v42 = vld [vmem:[%s6353_s3 + $0xb0] sm:$0xff] }
 0x21f   : > { %2092 = vmatpush.msra.mxu1 %v289_v42  ;;  %v4817_v42 = vpop.f32.mrf.mxu3 }
 0x223   : > { %v4762_v7 = vpop.f32.mrf.mxu0 }
 0x224   : > { %6608 = vst [vmem:[#allocation11_spill] sm:$0xff] %v4762_v7  ;;  %3519 = vmatmul.msk.f32.gmra.mxu3 %vm500_vm0, %v1639_v55  ;;  %v273_v55 = vld [vmem:[%s6353_s3 + $0x30] sm:$0xff] }
 0x225   : > { %2181 = vmatpush.msra.mxu2 %v273_v55  ;;  %v4812_v55 = vpop.f32.mrf.mxu2 }
 0x226   : > { %3434 = vmatmul.msk.f32.gmra.mxu0 %vm500_vm0, %v1215_v19 }
 0x22b   : > { %v4774_v41 = vpop.f32.mrf.mxu0 }
 0x22c   : > { %6609 = vst [vmem:[#allocation8_spill] sm:$0xff] %v4774_v41  ;;  %3520 = vmatmul.msk.f32.gmra.mxu3 %vm500_vm0, %v1641_v53 }
 0x22e   : > { %3522 = vmatmul.msk.f32.vlgmr.msrb.gmra.mxu0 %vm500_vm0, %v4202_v38  ;;  %v272_v38 = vld [vmem:[%s6353_s3 + $0x28] sm:$0xff] }
 0x22f   : > { %2182 = vmatpush.msra.mxu2 %v272_v38 }
 0x233   : > { %v4779_v19 = vpop.f32.mrf.mxu0 }
 0x234   : > { %6610 = vst [vmem:[#allocation44_spill] sm:$0xff] %v4779_v19  ;;  %3521 = vmatmul.msk.f32.gmra.mxu3 %vm500_vm0, %v1640_v5 }
 0x236   : > { %3523 = vmatmul.msk.f32.gmra.mxu0 %vm500_vm0, %v4221_v4  ;;  %v288_v4 = vld [vmem:[%s6353_s3 + $0xa8] sm:$0xff] }
 0x237   : > { %2093 = vmatpush.msra.mxu1 %v288_v4  ;;  %v4828_v4 = vpop.f32.mrf.mxu2 }
 0x23b   : > { %v4790_v56 = vpop.f32.mrf.mxu0 }
 0x23c   : > { %6611 = vst [vmem:[#allocation13_spill] sm:$0xff] %v4790_v56  ;;  %v4832_v56 = vpop.f32.mrf.mxu3 }
 0x23e   : > { %3524 = vmatmul.msk.f32.gmra.mxu0 %vm500_vm0, %v4246_v0  ;;  %v4808_v0 = vpop.f32.mrf.mxu1 }
 0x23f   : > { %v4846_v19 = vpop.f32.mrf.mxu2 }
 0x243   : > { %v4797_v5 = vpop.f32.mrf.mxu0 }
 0x244   : > { %6612 = vst [vmem:[#allocation18_spill] sm:$0xff] %v4797_v5 }
 0x246   : > { %3525 = vmatmul.msk.f32.gmra.mxu0 %vm500_vm0, %v4268_v1  ;;  %v271_v1 = vld [vmem:[%s6353_s3 + $0x20] sm:$0xff]  ;;  %v4821_v5 = vpop.f32.mrf.mxu1 }
 0x247   : > { %2183 = vmatpush.msra.mxu2 %v271_v1 }
 0x24b   : > { %v4806_v53 = vpop.f32.mrf.mxu0 }
 0x24c   : > { %6613 = vst [vmem:[#allocation15_spill] sm:$0xff] %v4806_v53 }
 0x24e   : > { %3526 = vmatmul.msk.f32.gmra.mxu0 %vm500_vm0, %v4288_v14  ;;  %v287_v14 = vld [vmem:[%s6353_s3 + $0xa0] sm:$0xff]  ;;  %v4836_v1 = vpop.f32.mrf.mxu1 }
 0x24f   : > { %2094 = vmatpush.msra.mxu1 %v287_v14  ;;  %v286_v14 = vld [vmem:[%s6353_s3 + $0x98] sm:$0xff] }
 0x251   : > { %2095 = vmatpush.msra.mxu1 %v286_v14  ;;  %v269_v14 = vld [vmem:[%s6353_s3 + $0x10] sm:$0xff] }
 0x253   : > { %v4819_v38 = vpop.f32.mrf.mxu0 }
 0x254   : > { %6614 = vst [vmem:[#allocation49_spill] sm:$0xff] %v4819_v38 }
 0x256   : > { %3527 = vmatmul.msk.f32.gmra.mxu0 %vm500_vm0, %v4307_v26  ;;  %v270_v26 = vld [vmem:[%s6353_s3 + $0x18] sm:$0xff] }
 0x257   : > { %2184 = vmatpush.msra.mxu2 %v270_v26  ;;  %v314_v26 = vld [vmem:[%s6353_s3 + $0x178] sm:$0xff] }
 0x258   : > { %2334 = vmatpush.msra.mxu3 %v314_v26 }
 0x259   : > { %2185 = vmatpush.msra.mxu2 %v269_v14  ;;  %v313_v14 = vld [vmem:[%s6353_s3 + $0x170] sm:$0xff] }
 0x25a   : > { %2335 = vmatpush.msra.mxu3 %v313_v14  ;;  %v312_v14 = vld [vmem:[%s6353_s3 + $0x168] sm:$0xff] }
 0x25b   : > { %v4830_v53 = vpop.f32.mrf.mxu0 }
 0x25c   : > { %6615 = vst [vmem:[#allocation17_spill] sm:$0xff] %v4830_v53  ;;  %v4848_v53 = vpop.f32.mrf.mxu3  ;;  %2336 = vmatpush.msra.mxu3 %v312_v14 }
 0x25e   : > { %3528 = vmatmul.msk.f32.gmra.mxu0 %vm500_vm0, %v3730_v32  ;;  %v4852_v32 = vpop.f32.mrf.mxu1 }
 0x263   : > { %v4841_v38 = vpop.f32.mrf.mxu0 }
 0x264   : > { %6616 = vst [vmem:[#allocation60_spill] sm:$0xff] %v4841_v38  ;;  %v4864_v38 = vpop.f32.mrf.mxu2 }
 0x266   : > { %3529 = vmatmul.msk.f32.gmra.mxu0 %vm500_vm0, %v3755_v39  ;;  %v4866_v39 = vpop.f32.mrf.mxu3  ;;  %v4873_v26 = vpop.f32.mrf.mxu1 }
 0x26b   : > { %v4854_v41 = vpop.f32.mrf.mxu0 }
 0x26c   : > { %6617 = vst [vmem:[#allocation22_spill] sm:$0xff] %v4854_v41  ;;  %v285_v41 = vld [vmem:[%s6353_s3 + $0x90] sm:$0xff] }
 0x26d   : > { %2096 = vmatpush.msra.mxu1 %v285_v41  ;;  %v268_v41 = vld [vmem:[%s6353_s3 + $0x8] sm:$0xff] }
 0x26e   : > { %3530 = vmatmul.msk.f32.gmra.mxu0 %vm500_vm0, %v3783_v47  ;;  %v4877_v47 = vpop.f32.mrf.mxu2  ;;  %v4882_v21 = vpop.f32.mrf.mxu3  ;;  %2186 = vmatpush.msra.mxu2 %v268_v41  ;;  %v311_v41 = vld [vmem:[%s6353_s3 + $0x160] sm:$0xff] }
 0x26f   : > { %6619 = vst [vmem:[#allocation52_spill] sm:$0xff] %v4877_v47  ;;  %2337 = vmatpush.msra.mxu3 %v311_v41 }
 0x273   : > { %v4871_v7 = vpop.f32.mrf.mxu0 }
 0x274   : > { %6618 = vst [vmem:[#allocation19_spill] sm:$0xff] %v4871_v7  ;;  %v4889_v7 = vpop.f32.mrf.mxu1 }
 0x276   : > { %3531 = vmatmul.msk.f32.gmra.mxu0 %vm500_vm0, %v3808_v54  ;;  %v284_v54 = vld [vmem:[%s6353_s3 + $0x88] sm:$0xff]  ;;  %v4906_v48 = vpop.f32.mrf.mxu3 }
 0x277   : > { %2097 = vmatpush.msra.mxu1 %v284_v54  ;;  %v309_v54 = vld [vmem:[%s6353_s3 + $0x150] sm:$0xff] }
 0x27b   : > { %v4884_v43 = vpop.f32.mrf.mxu0 }
 0x27c   : > { %6620 = vst [vmem:[#allocation21_spill] sm:$0xff] %v4884_v43  ;;  %v4899_v43 = vpop.f32.mrf.mxu2  ;;  %v4916_v14 = vpop.f32.mrf.mxu1 }
 0x27d   : > { %6621 = vst [vmem:[#allocation26_spill] sm:$0xff] %v4899_v43  ;;  %v307_v43 = vld [vmem:[%s6353_s3 + $0x140] sm:$0xff] }
 0x27e   : > { %3532 = vmatmul.msk.f32.gmra.mxu0 %vm500_vm0, %v3830_v60  ;;  %v310_v60 = vld [vmem:[%s6353_s3 + $0x158] sm:$0xff]  ;;  %6623 = vst [vmem:[#allocation55_spill] sm:$0xff] %v4916_v14  ;;  %v4931_v14 = vpop.f32.mrf.mxu3 }
 0x27f   : > { %2338 = vmatpush.msra.mxu3 %v310_v60  ;;  %v306_v60 = vld [vmem:[%s6353_s3 + $0x138] sm:$0xff]  ;;  %6626 = vst [vmem:[#allocation34_spill] sm:$0xff] %v4931_v14 }
 0x281   : > { %2339 = vmatpush.msra.mxu3 %v309_v54  ;;  %v304_v54 = vld [vmem:[%s6353_s3 + $0x128] sm:$0xff] }
 0x283   : > { %v4901_v47 = vpop.f32.mrf.mxu0 }
 0x284   : > { %6622 = vst [vmem:[#allocation23_spill] sm:$0xff] %v4901_v47  ;;  %v308_v47 = vld [vmem:[%s6353_s3 + $0x148] sm:$0xff] }
 0x285   : > { %2340 = vmatpush.msra.mxu3 %v308_v47  ;;  %v305_v47 = vld [vmem:[%s6353_s3 + $0x130] sm:$0xff] }
 0x286   : > { %3533 = vmatmul.msk.f32.gmra.mxu0 %vm500_vm0, %v3852_v2  ;;  %v4926_v2 = vpop.f32.mrf.mxu2 }
 0x287   : > { %2341 = vmatpush.msra.mxu3 %v307_v43  ;;  %6625 = vst [vmem:[#allocation28_spill] sm:$0xff] %v4926_v2  ;;  %v267_v43 = vld [vmem:[%s6353_s3] sm:$0xff] }
 0x288   : > { %2187 = vmatpush.msra.mxu2 %v267_v43  ;;  %v303_v2 = vld [vmem:[%s6353_s3 + $0x120] sm:$0xff] }
 0x289   : > { %2342 = vmatpush.msra.mxu3 %v306_v60 }
 0x28b   : > { %v4921_v41 = vpop.f32.mrf.mxu0  ;;  %2343 = vmatpush.msra.mxu3 %v305_v47  ;;  %v302_v47 = vld [vmem:[%s6353_s3 + $0x118] sm:$0xff] }
 0x28c   : > { %6624 = vst [vmem:[#allocation31_spill] sm:$0xff] %v4921_v41  ;;  %v4944_v41 = vpop.f32.mrf.mxu1 }
 0x28d   : > { %6627 = vst [vmem:[#allocation37_spill] sm:$0xff] %v4944_v41  ;;  %2344 = vmatpush.msra.mxu3 %v304_v54  ;;  %v301_v54 = vld [vmem:[%s6353_s3 + $0x110] sm:$0xff] }
 0x28e   : > { %3534 = vmatmul.msk.f32.gmra.mxu0 %vm500_vm0, %v3871_v13  ;;  %v283_v13 = vld [vmem:[%s6353_s3 + $0x80] sm:$0xff]  ;;  %v4959_v43 = vpop.f32.mrf.mxu2 }
 0x28f   : > { %2098 = vmatpush.msra.mxu1 %v283_v13  ;;  %2345 = vmatpush.msra.mxu3 %v303_v2  ;;  %6629 = vst [vmem:[#allocation40_spill] sm:$0xff] %v4959_v43  ;;  %v4964_v13 = vpop.f32.mrf.mxu3  ;;  %v346_v2 = vld [vmem:[%s6353_s3 + $0x278] sm:$0xff] }
 0x290   : > { %6630 = vst [vmem:[#allocation43_spill] sm:$0xff] %v4964_v13  ;;  %2568 = vmatpush.msrb.mxu2 %v346_v2 }
 0x291   : > { %2346 = vmatpush.msra.mxu3 %v302_v47  ;;  %v299_v47 = vld [vmem:[%s6353_s3 + $0x100] sm:$0xff] }
 0x293   : > { %v4949_v60 = vpop.f32.mrf.mxu0  ;;  %2347 = vmatpush.msra.mxu3 %v301_v54  ;;  %v330_v54 = vld [vmem:[%s6353_s3 + $0x1f8] sm:$0xff] }
 0x294   : > { %6628 = vst [vmem:[#allocation27_spill] sm:$0xff] %v4949_v60  ;;  %v300_v60 = vld [vmem:[%s6353_s3 + $0x108] sm:$0xff]  ;;  %v4977_v43 = vpop.f32.mrf.mxu1  ;;  %2447 = vmatpush.msrb.mxu1 %v330_v54  ;;  %v5003_v54 = vld [vmem:[%s6352_s2] ss:$0 sm:$0xff] }
 0x295   : > { %2348 = vmatpush.msra.mxu3 %v300_v60  ;;  %6632 = vst [vmem:[#allocation2_spill] sm:$0xff] %v4977_v43 }
 0x296   : > { %3535 = vmatmul.msk.f32.gmra.mxu0 %vm500_vm0, %v3890_v31  ;;  %v4984_v13 = vpop.f32.mrf.mxu2 }
 0x297   : > { %2349 = vmatpush.msra.mxu3 %v299_v47  ;;  %6633 = vst [vmem:[#allocation109_spill] sm:$0xff] %v4984_v13  ;;  %v4986_v60 = vpop.f32.mrf.mxu3  ;;  %v329_v47 = vld [vmem:[%s6353_s3 + $0x1f0] sm:$0xff] }
 0x298   : > { %6634 = vst [vmem:[#allocation110_spill] sm:$0xff] %v4986_v60  ;;  %2448 = vmatpush.msrb.mxu1 %v329_v47  ;;  %v344_v47 = vld [vmem:[%s6353_s3 + $0x268] sm:$0xff] }
 0x29b   : > { %v4972_v31 = vpop.f32.mrf.mxu0 }
 0x29c   : > { %6631 = vst [vmem:[#allocation46_spill] sm:$0xff] %v4972_v31  ;;  %v4990_v31 = vpop.f32.mrf.mxu1 }
 0x29d   : > { %6636 = vst [vmem:[#allocation112_spill] sm:$0xff] %v4990_v31 }
 0x29e   : > { %3536 = vmatmul.msk.f32.gmra.mxu0 %vm500_vm0, %v3906_v45  ;;  %v345_v45 = vld [vmem:[%s6353_s3 + $0x270] sm:$0xff] }
 0x29f   : > { %2569 = vmatpush.msrb.mxu2 %v345_v45  ;;  %v5007_v31 = vpop.f32.mrf.mxu3 }
 0x2a0   : > { %6638 = vst [vmem:[#allocation114_spill] sm:$0xff] %v5007_v31 }
 0x2a1   : > { %2570 = vmatpush.msrb.mxu2 %v344_v47 }
 0x2a3   : > { %v4988_v2 = vpop.f32.mrf.mxu0 }
 0x2a4   : > { %6635 = vst [vmem:[#allocation111_spill] sm:$0xff] %v4988_v2  ;;  %v5005_v2 = vpop.f32.mrf.mxu2  ;;  %v5013_v43 = vpop.f32.mrf.mxu1 }
 0x2a5   : > { %6637 = vst [vmem:[#allocation113_spill] sm:$0xff] %v5005_v2 }
 0x2a6   : > { %3537 = vmatmul.msk.f32.gmra.mxu0 %vm500_vm0, %v3922_v58  ;;  %6639 = vst [vmem:[#allocation115_spill] sm:$0xff] %v5013_v43 }
 0x2ab   : > { %v1808_v13 = vpop.f32.mrf.mxu0 }
 0x2ac   : > { %v1895_v58 = vadd.f32 %v1808_v13, %v4626_v15  ;;  %v5019_v31 = vpop.f32.mrf.mxu2  ;;  %v5021_v15 = vpop.f32.mrf.mxu3 }
 0x2ad   : > { %6640 = vst [vmem:[#allocation116_spill] sm:$0xff] %v5019_v31 }
 0x2ae   : > { %v1927_v60 = vadd.f32 %v5003_v54, %v1895_v58  ;;  %3538 = vmatmul.msk.f32.gmra.mxu0 %vm500_vm0, %v6566_v59  ;;  %6641 = vst [vmem:[#allocation117_spill] sm:$0xff] %v5021_v15  ;;  %v5029_v58 = vpop.f32.mrf.mxu1 }
 0x2af   : > { %6642 = vst [vmem:[#allocation118_spill] sm:$0xff] %v5029_v58 }
 0x2b0   : > { %v1956_v45 = vmax.f32 %v1927_v60, 0.0  ;;  %v328_v60 = vld [vmem:[%s6353_s3 + $0x1e8] sm:$0xff] }
 0x2b1   : > { %2449 = vmatpush.msrb.mxu1 %v328_v60 }
 0x2b2   : > { %2188 = vmatmul.f32.vlgmr.msra.gmra.mxu2 %v1956_v45  ;;  %v2010_v47 = vrot.slane %v1956_v45, 1  ;;  %v2261_v43 = vrot.slane %v1956_v45, 2  ;;  %v6644_v45 = vld [vmem:[#allocation25_spill] sm:$0xff] }
 0x2b3   : > { %v1811_v2 = vpop.f32.mrf.mxu0  ;;  %v754_v58 = vadd.f32 %v4279_v10, %v6644_v45  ;;  %v6646_v45 = vld [vmem:[#allocation58_spill] sm:$0xff] }
 0x2b4   : > { %v1896_v41 = vadd.f32 %v1811_v2, %v4643_v18  ;;  %v5037_v60 = vpop.f32.mrf.mxu2 }
 0x2b5   : > { %6643 = vst [vmem:[#allocation119_spill] sm:$0xff] %v5037_v60 }
 0x2b6   : > { %v1928_v13 = vadd.f32 %v5003_v54, %v1896_v41  ;;  %3539 = vmatmul.msk.f32.gmra.mxu0 %vm500_vm0, %v6571_v37 }
 0x2b8   : > { %v1957_v59 = vmax.f32 %v1928_v13, 0.0 }
 0x2ba   : > { %v2011_v18 = vrot.slane %v1957_v59, 1  ;;  %2191 = vmatmul.f32.gmra.mxu2 %v1957_v59  ;;  %v2262_v2 = vrot.slane %v1957_v59, 2  ;;  %v5041_v59 = vpop.f32.mrf.mxu3 }
 0x2bb   : > { %v1814_v31 = vpop.f32.mrf.mxu0 }
 0x2bc   : > { %v1897_v15 = vadd.f32 %v1814_v31, %v4657_v3  ;;  %v2012_v41 = vsel %vm442_vm1, %v2010_v47, %v2011_v18  ;;  %v2263_v37 = vsel %vm825_vm2, %v2261_v43, %v2262_v2  ;;  %v343_v3 = vld [vmem:[%s6353_s3 + $0x260] sm:$0xff]  ;;  %v5055_v47 = vpop.f32.mrf.mxu1 }
 0x2bd   : > { %2099 = vmatmul.f32.vlgmr.msra.gmra.mxu1 %v2012_v41  ;;  %2350 = vmatmul.f32.vlgmr.msra.gmra.mxu3 %v2263_v37  ;;  %v327_v43 = vld [vmem:[%s6353_s3 + $0x1e0] sm:$0xff] }
 0x2be   : > { %v1929_v13 = vadd.f32 %v5003_v54, %v1897_v15  ;;  %3540 = vmatmul.msk.f32.gmra.mxu0 %vm500_vm0, %v6575_v62  ;;  %2571 = vmatpush.msrb.mxu2 %v343_v3  ;;  %v1050_v62 = vadd.f32 %v4495_v12, %v754_v58  ;;  %v6647_v58 = vld [vmem:[#allocation30_spill] sm:$0xff] }
 0x2bf   : > { %2450 = vmatpush.msrb.mxu1 %v327_v43  ;;  %v757_v43 = vadd.f32 %v4300_v35, %v6647_v58  ;;  %v326_v58 = vld [vmem:[%s6353_s3 + $0x1d8] sm:$0xff] }
 0x2c0   : > { %v5043_v14 = vmax.f32 %v1929_v13, 0.0  ;;  %v1189_v3 = vadd.f32 %v6646_v45, %v1050_v62 }
 0x2c1   : > { %2451 = vmatpush.msrb.mxu1 %v326_v58 }
 0x2c2   : > { %6645 = vst [vmem:[#allocation25_spill] sm:$0xff] %v5043_v14  ;;  %2194 = vmatmul.f32.gmra.mxu2 %v5043_v14  ;;  %v2013_v10 = vrot.slane %v5043_v14, 1  ;;  %v2264_v31 = vrot.slane %v5043_v14, 2  ;;  %v1332_v14 = vadd.f32 %v4659_v49, %v1189_v3  ;;  %v5075_v62 = vpop.f32.mrf.mxu3 }
 0x2c3   : > { %v1817_v15 = vpop.f32.mrf.mxu0 }
 0x2c4   : > { %v1898_v41 = vadd.f32 %v1817_v15, %v4673_v46  ;;  %v2014_v37 = vsel %vm442_vm1, %v2011_v18, %v2013_v10  ;;  %v2265_v13 = vsel %vm825_vm2, %v2262_v2, %v2264_v31  ;;  %v342_v46 = vld [vmem:[%s6353_s3 + $0x258] sm:$0xff]  ;;  %v5072_v18 = vpop.f32.mrf.mxu2  ;;  %v1051_v2 = vadd.f32 %v4511_v16, %v757_v43  ;;  %v6648_v16 = vld [vmem:[#allocation62_spill] sm:$0xff]  ;;  %v5091_v3 = vpop.f32.mrf.mxu1 }
 0x2c5   : > { %2102 = vmatmul.f32.gmra.mxu1 %v2014_v37  ;;  %2353 = vmatmul.f32.gmra.mxu3 %v2265_v13  ;;  %v1475_v15 = vadd.f32 %v4808_v0, %v1332_v14 }
 0x2c6   : > { %v1930_v12 = vadd.f32 %v5003_v54, %v1898_v41  ;;  %3541 = vmatmul.msk.f32.gmra.mxu0 %vm500_vm0, %v6579_v44  ;;  %2572 = vmatpush.msrb.mxu2 %v342_v46  ;;  %v1190_v45 = vadd.f32 %v6648_v16, %v1051_v2 }
 0x2c7   : > { %v1614_v14 = vadd.f32 %v4804_v63, %v1475_v15 }
 0x2c8   : > { %v5067_v60 = vmax.f32 %v1930_v12, 0.0 }
 0x2c9   : > { %v1757_v46 = vadd.f32 %v4817_v42, %v1614_v14  ;;  %v6650_v42 = vld [vmem:[#allocation64_spill] sm:$0xff] }
 0x2ca   : > { %2197 = vmatmul.f32.gmra.mxu2 %v5067_v60  ;;  %v2015_v44 = vrot.slane %v5067_v60, 1  ;;  %v2266_v35 = vrot.slane %v5067_v60, 2 }
 0x2cb   : > { %v1820_v49 = vpop.f32.mrf.mxu0 }
 0x2cc   : > { %v1899_v41 = vadd.f32 %v1820_v49, %v4688_v57  ;;  %v5083_v37 = vsel %vm442_vm1, %v2013_v10, %v2015_v44  ;;  %v5086_v13 = vsel %vm825_vm2, %v2264_v31, %v2266_v35  ;;  %v6649_v57 = vld [vmem:[#allocation33_spill] sm:$0xff]  ;;  %v1333_v10 = vadd.f32 %v4676_v33, %v1190_v45  ;;  %v5110_v63 = vpop.f32.mrf.mxu2  ;;  %v5113_v49 = vpop.f32.mrf.mxu3 }
 0x2cd   : > { %2105 = vmatmul.f32.gmra.mxu1 %v5083_v37  ;;  %2356 = vmatmul.f32.gmra.mxu3 %v5086_v13  ;;  %v760_v0 = vadd.f32 %v4326_v9, %v6649_v57 }
 0x2ce   : > { %v1931_v12 = vadd.f32 %v5003_v54, %v1899_v41  ;;  %3542 = vmatmul.msk.f32.gmra.mxu0 %vm500_vm0, %v6584_v29  ;;  %v1476_v2 = vadd.f32 %v4821_v5, %v1333_v10  ;;  %v378_v5 = vld [vmem:[%s6353_s3 + $0x378] sm:$0xff]  ;;  %v325_v10 = vld [vmem:[%s6353_s3 + $0x1d0] sm:$0xff] }
 0x2cf   : > { %v1052_v43 = vadd.f32 %v4527_v20, %v760_v0  ;;  %2800 = vmatpush.msra.mxu0 %v378_v5  ;;  %v5134_v0 = vpop.f32.mrf.mxu1  ;;  %2452 = vmatpush.msrb.mxu1 %v325_v10  ;;  %v340_v10 = vld [vmem:[%s6353_s3 + $0x248] sm:$0xff] }
 0x2d0   : > { %v5100_v31 = vmax.f32 %v1931_v12, 0.0  ;;  %v1615_v12 = vadd.f32 %v4812_v55, %v1476_v2 }
 0x2d1   : > { %v1191_v16 = vadd.f32 %v6650_v42, %v1052_v43 }
 0x2d2   : > { %2200 = vmatmul.f32.gmra.mxu2 %v5100_v31  ;;  %v2017_v29 = vrot.slane %v5100_v31, 1  ;;  %v2268_v9 = vrot.slane %v5100_v31, 2  ;;  %v1758_v55 = vadd.f32 %v4832_v56, %v1615_v12  ;;  %v375_v56 = vld [vmem:[%s6353_s3 + $0x360] sm:$0xff] }
 0x2d3   : > { %v1823_v33 = vpop.f32.mrf.mxu0  ;;  %v1334_v57 = vadd.f32 %v4696_v51, %v1191_v16 }
 0x2d4   : > { %v1900_v15 = vadd.f32 %v1823_v33, %v1757_v46  ;;  %v5116_v41 = vsel %vm442_vm1, %v2015_v44, %v2017_v29  ;;  %v5119_v20 = vsel %vm825_vm2, %v2266_v35, %v2268_v9  ;;  %v6651_v44 = vld [vmem:[#allocation36_spill] sm:$0xff]  ;;  %v376_v46 = vld [vmem:[%s6353_s3 + $0x368] sm:$0xff]  ;;  %v5165_v16 = vpop.f32.mrf.mxu2  ;;  %v5170_v5 = vpop.f32.mrf.mxu3 }
 0x2d5   : > { %2108 = vmatmul.f32.gmra.mxu1 %v5116_v41  ;;  %2359 = vmatmul.f32.gmra.mxu3 %v5119_v20  ;;  %v763_v35 = vadd.f32 %v4349_v17, %v6651_v44  ;;  %v377_v17 = vld [vmem:[%s6353_s3 + $0x370] sm:$0xff]  ;;  %v1477_v2 = vadd.f32 %v4836_v1, %v1334_v57  ;;  %v6653_v44 = vld [vmem:[#allocation39_spill] sm:$0xff] }
 0x2d6   : > { %v1932_v45 = vadd.f32 %v5003_v54, %v1900_v15  ;;  %3543 = vmatmul.msk.f32.gmra.mxu0 %vm500_vm0, %v6590_v6  ;;  %v341_v6 = vld [vmem:[%s6353_s3 + $0x250] sm:$0xff] }
 0x2d7   : > { %2573 = vmatpush.msrb.mxu2 %v341_v6  ;;  %v1053_v51 = vadd.f32 %v4542_v36, %v763_v35  ;;  %2801 = vmatpush.msra.mxu0 %v377_v17  ;;  %v766_v35 = vadd.f32 %v4369_v50, %v6653_v44  ;;  %v1616_v12 = vadd.f32 %v4828_v4, %v1477_v2  ;;  %v6402_v17 = vrot.slane %v4719_v34, 2 }
 0x2d8   : > { %v5136_v14 = vmax.f32 %v1932_v45, 0.0  ;;  %v6652_v45 = vld [vmem:[#allocation67_spill] sm:$0xff] }
 0x2d9   : > { %2802 = vmatpush.msra.mxu0 %v376_v46  ;;  %v1192_v1 = vadd.f32 %v6652_v45, %v1053_v51  ;;  %2574 = vmatpush.msrb.mxu2 %v340_v10  ;;  %v1054_v50 = vadd.f32 %v4557_v24, %v766_v35  ;;  %v1759_v4 = vadd.f32 %v4848_v53, %v1616_v12  ;;  %v5193_v51 = vpop.f32.mrf.mxu1  ;;  %v1781_v46 = vrot.slane %v4699_v8, 2  ;;  %v372_v53 = vld [vmem:[%s6353_s3 + $0x348] sm:$0xff]  ;;  %v371_v45 = vld [vmem:[%s6353_s3 + $0x340] sm:$0xff]  ;;  %v6675_v8 = vld [vmem:[#allocation76_spill] sm:$0xff] }
 0x2da   : > { %2203 = vmatmul.f32.gmra.mxu2 %v5136_v14  ;;  %v2019_v58 = vrot.slane %v5136_v14, 1  ;;  %v2270_v43 = vrot.slane %v5136_v14, 2  ;;  %v6657_v10 = vld [vmem:[#allocation50_spill] sm:$0xff] }
 0x2db   : > { %v1826_v33 = vpop.f32.mrf.mxu0  ;;  %2803 = vmatpush.msra.mxu0 %v375_v56  ;;  %v1335_v57 = vadd.f32 %v4716_v40, %v1192_v1  ;;  %v6656_v1 = vld [vmem:[#allocation42_spill] sm:$0xff] }
 0x2dc   : > { %v1901_v15 = vadd.f32 %v1826_v33, %v1758_v55  ;;  %v5157_v42 = vsel %vm442_vm1, %v2017_v29, %v2019_v58  ;;  %v5160_v36 = vsel %vm825_vm2, %v2268_v9, %v2270_v43  ;;  %v374_v9 = vld [vmem:[%s6353_s3 + $0x358] sm:$0xff] }
 0x2dd   : > { %2111 = vmatmul.f32.gmra.mxu1 %v5157_v42  ;;  %2362 = vmatmul.f32.gmra.mxu3 %v5160_v36  ;;  %v1478_v2 = vadd.f32 %v4852_v32, %v1335_v57  ;;  %v5216_v32 = vsel %vm825_vm2, %v1781_v46, %v6402_v17  ;;  %v370_v57 = vld [vmem:[%s6353_s3 + $0x338] sm:$0xff] }
 0x2de   : > { %v1933_v29 = vadd.f32 %v5003_v54, %v1901_v15  ;;  %3544 = vmatmul.msk.f32.gmra.mxu0 %vm500_vm0, %v6594_v25  ;;  %v373_v25 = vld [vmem:[%s6353_s3 + $0x350] sm:$0xff] }
 0x2df   : > { %2804 = vmatpush.msra.mxu0 %v374_v9  ;;  %v5227_v9 = vpop.f32.mrf.mxu2  ;;  %v1617_v44 = vadd.f32 %v4846_v19, %v1478_v2 }
 0x2e0   : > { %v5182_v6 = vmax.f32 %v1933_v29, 0.0  ;;  %v769_v29 = vadd.f32 %v4387_v27, %v6656_v1 }
 0x2e1   : > { %2805 = vmatpush.msra.mxu0 %v373_v25  ;;  %v1760_v27 = vadd.f32 %v4866_v39, %v1617_v44 }
 0x2e2   : > { %2206 = vmatmul.f32.gmra.mxu2 %v5182_v6  ;;  %v2021_v40 = vrot.slane %v5182_v6, 1  ;;  %v2272_v55 = vrot.slane %v5182_v6, 2  ;;  %v1055_v25 = vadd.f32 %v6657_v10, %v769_v29  ;;  %v6662_v10 = vld [vmem:[#allocation53_spill] sm:$0xff] }
 0x2e3   : > { %v1829_v33 = vpop.f32.mrf.mxu0  ;;  %2806 = vmatpush.msra.mxu0 %v372_v53  ;;  %v369_v53 = vld [vmem:[%s6353_s3 + $0x330] sm:$0xff] }
 0x2e4   : > { %v1902_v15 = vadd.f32 %v1829_v33, %v1759_v4  ;;  %v5201_v56 = vsel %vm442_vm1, %v2019_v58, %v2021_v40  ;;  %v5204_v24 = vsel %vm825_vm2, %v2270_v43, %v2272_v55  ;;  %v1193_v58 = vadd.f32 %v4296_v23, %v1054_v50  ;;  %v5231_v23 = vpop.f32.mrf.mxu3  ;;  %v5247_v33 = vpop.f32.mrf.mxu1 }
 0x2e5   : > { %6654 = vst [vmem:[#allocation58_spill] sm:$0xff] %v5201_v56  ;;  %2114 = vmatmul.f32.gmra.mxu1 %v5201_v56  ;;  %2365 = vmatmul.f32.gmra.mxu3 %v5204_v24 }
 0x2e6   : > { %6655 = vst [vmem:[#allocation30_spill] sm:$0xff] %v5204_v24  ;;  %v1934_v43 = vadd.f32 %v5003_v54, %v1902_v15  ;;  %3545 = vmatmul.msk.f32.gmra.mxu0 %vm500_vm0, %v6597_v52  ;;  %v1336_v35 = vadd.f32 %v4732_v61, %v1193_v58  ;;  %v324_v52 = vld [vmem:[%s6353_s3 + $0x1c8] sm:$0xff]  ;;  %v6660_v58 = vld [vmem:[#allocation72_spill] sm:$0xff] }
 0x2e7   : > { %2453 = vmatpush.msrb.mxu1 %v324_v52  ;;  %2807 = vmatpush.msra.mxu0 %v371_v45  ;;  %v323_v52 = vld [vmem:[%s6353_s3 + $0x1c0] sm:$0xff] }
 0x2e8   : > { %v5233_v12 = vmax.f32 %v1934_v43, 0.0  ;;  %v1479_v4 = vadd.f32 %v4873_v26, %v1336_v35  ;;  %v1194_v43 = vadd.f32 %v6660_v58, %v1055_v25  ;;  %v339_v35 = vld [vmem:[%s6353_s3 + $0x240] sm:$0xff]  ;;  %v366_v58 = vld [vmem:[%s6353_s3 + $0x318] sm:$0xff] }
 0x2e9   : > { %2808 = vmatpush.msra.mxu0 %v370_v57  ;;  %2575 = vmatpush.msrb.mxu2 %v339_v35  ;;  %v6669_v35 = vld [vmem:[#allocation14_spill] sm:$0xff] }
 0x2ea   : > { %2209 = vmatmul.f32.gmra.mxu2 %v5233_v12  ;;  %v2023_v61 = vrot.slane %v5233_v12, 1  ;;  %v2274_v19 = vrot.slane %v5233_v12, 2  ;;  %v1618_v1 = vadd.f32 %v4864_v38, %v1479_v4  ;;  %v1337_v29 = vadd.f32 %v4744_v30, %v1194_v43  ;;  %2454 = vmatpush.msrb.mxu1 %v323_v52  ;;  %v364_v52 = vld [vmem:[%s6353_s3 + $0x308] sm:$0xff] }
 0x2eb   : > { %v1832_v50 = vpop.f32.mrf.mxu0  ;;  %2809 = vmatpush.msra.mxu0 %v369_v53 }
 0x2ec   : > { %v1903_v2 = vadd.f32 %v1832_v50, %v1760_v27  ;;  %v5250_v15 = vsel %vm442_vm1, %v2021_v40, %v2023_v61  ;;  %v5253_v39 = vsel %vm825_vm2, %v2272_v55, %v2274_v19  ;;  %v368_v40 = vld [vmem:[%s6353_s3 + $0x328] sm:$0xff]  ;;  %v6661_v55 = vld [vmem:[#allocation45_spill] sm:$0xff]  ;;  %v1761_v30 = vadd.f32 %v4882_v21, %v1618_v1  ;;  %v5285_v38 = vpop.f32.mrf.mxu3  ;;  %v6668_v1 = vld [vmem:[#allocation52_spill] sm:$0xff] }
 0x2ed   : > { %6658 = vst [vmem:[#allocation62_spill] sm:$0xff] %v5250_v15  ;;  %2117 = vmatmul.f32.gmra.mxu1 %v5250_v15  ;;  %2368 = vmatmul.f32.gmra.mxu3 %v5253_v39  ;;  %v772_v45 = vadd.f32 %v4405_v28, %v6661_v55  ;;  %v5282_v28 = vpop.f32.mrf.mxu2  ;;  %v1480_v4 = vadd.f32 %v4889_v7, %v1337_v29  ;;  %v6667_v55 = vld [vmem:[#allocation89_spill] sm:$0xff] }
 0x2ee   : > { %6659 = vst [vmem:[#allocation33_spill] sm:$0xff] %v5253_v39  ;;  %v1935_v26 = vadd.f32 %v5003_v54, %v1903_v2  ;;  %3546 = vmatmul.msk.f32.gmra.mxu0 %vm500_vm0, %v4684_v11  ;;  %v367_v11 = vld [vmem:[%s6353_s3 + $0x320] sm:$0xff] }
 0x2ef   : > { %2810 = vmatpush.msra.mxu0 %v368_v40  ;;  %v1056_v25 = vadd.f32 %v6662_v10, %v772_v45  ;;  %v6665_v40 = vld [vmem:[#allocation9_spill] sm:$0xff]  ;;  %v1619_v29 = vadd.f32 %v6668_v1, %v1480_v4 }
 0x2f0   : > { %v5271_v44 = vmax.f32 %v1935_v26, 0.0  ;;  %v5304_v26 = vpop.f32.mrf.mxu1  ;;  %v6670_v4 = vld [vmem:[#allocation57_spill] sm:$0xff] }
 0x2f1   : > { %2811 = vmatpush.msra.mxu0 %v367_v11  ;;  %v1195_v43 = vadd.f32 %v4336_v22, %v1056_v25  ;;  %v1762_v10 = vadd.f32 %v4906_v48, %v1619_v29 }
 0x2f2   : > { %2212 = vmatmul.f32.gmra.mxu2 %v5271_v44  ;;  %v2025_v57 = vrot.slane %v5271_v44, 1  ;;  %v2276_v27 = vrot.slane %v5271_v44, 2 }
 0x2f3   : > { %v1835_v50 = vpop.f32.mrf.mxu0  ;;  %2812 = vmatpush.msra.mxu0 %v366_v58  ;;  %v1338_v11 = vadd.f32 %v6669_v35, %v1195_v43 }
 0x2f4   : > { %v1904_v2 = vadd.f32 %v1835_v50, %v1761_v30  ;;  %v5293_v53 = vsel %vm442_vm1, %v2023_v61, %v2025_v57  ;;  %v5296_v21 = vsel %vm825_vm2, %v2274_v19, %v2276_v27  ;;  %v365_v61 = vld [vmem:[%s6353_s3 + $0x310] sm:$0xff]  ;;  %v6666_v19 = vld [vmem:[#allocation47_spill] sm:$0xff]  ;;  %v338_v30 = vld [vmem:[%s6353_s3 + $0x238] sm:$0xff]  ;;  %v5336_v48 = vpop.f32.mrf.mxu3 }
 0x2f5   : > { %6663 = vst [vmem:[#allocation64_spill] sm:$0xff] %v5293_v53  ;;  %2120 = vmatmul.f32.gmra.mxu1 %v5293_v53  ;;  %2371 = vmatmul.f32.gmra.mxu3 %v5296_v21  ;;  %v775_v45 = vadd.f32 %v6667_v55, %v6666_v19  ;;  %v5329_v58 = vpop.f32.mrf.mxu2 }
 0x2f6   : > { %6664 = vst [vmem:[#allocation36_spill] sm:$0xff] %v5296_v21  ;;  %v1936_v7 = vadd.f32 %v5003_v54, %v1904_v2  ;;  %3547 = vmatmul.msk.f32.gmra.mxu0 %vm500_vm0, %v6665_v40  ;;  %2576 = vmatpush.msrb.mxu2 %v338_v30 }
 0x2f7   : > { %2813 = vmatpush.msra.mxu0 %v365_v61  ;;  %v1057_v2 = vadd.f32 %v6670_v4, %v775_v45  ;;  %v6672_v61 = vld [vmem:[#allocation55_spill] sm:$0xff]  ;;  %v363_v45 = vld [vmem:[%s6353_s3 + $0x300] sm:$0xff] }
 0x2f8   : > { %v5316_v22 = vmax.f32 %v1936_v7, 0.0  ;;  %v6671_v7 = vld [vmem:[#allocation7_spill] sm:$0xff]  ;;  %v1481_v19 = vadd.f32 %v6672_v61, %v1338_v11  ;;  %v6676_v11 = vld [vmem:[#allocation48_spill] sm:$0xff]  ;;  %v6680_v61 = vld [vmem:[#allocation34_spill] sm:$0xff] }
 0x2f9   : > { %v1782_v40 = vsel %vm825_vm2, %v6671_v7, %v1781_v46  ;;  %2814 = vmatpush.msra.mxu0 %v364_v52  ;;  %v1196_v46 = vadd.f32 %v6675_v8, %v1057_v2  ;;  %v322_v2 = vld [vmem:[%s6353_s3 + $0x1b8] sm:$0xff] }
 0x2fa   : > { %2215 = vmatmul.f32.gmra.mxu2 %v5316_v22  ;;  %v2027_v25 = vrot.slane %v5316_v22, 1  ;;  %v2278_v50 = vrot.slane %v5316_v22, 2  ;;  %2455 = vmatpush.msrb.mxu1 %v322_v2 }
 0x2fb   : > { %v1838_v43 = vpop.f32.mrf.mxu0  ;;  %2815 = vmatpush.msra.mxu0 %v363_v45 }
 0x2fc   : > { %v1905_v55 = vadd.f32 %v1838_v43, %v1762_v10  ;;  %v5339_v1 = vsel %vm442_vm1, %v2025_v57, %v2027_v25  ;;  %v5342_v29 = vsel %vm825_vm2, %v2276_v27, %v2278_v50  ;;  %v6677_v57 = vld [vmem:[#allocation93_spill] sm:$0xff]  ;;  %v6678_v27 = vld [vmem:[#allocation26_spill] sm:$0xff]  ;;  %v6679_v10 = vld [vmem:[#allocation11_spill] sm:$0xff]  ;;  %v5356_v43 = vpop.f32.mrf.mxu1  ;;  %v5380_v17 = vpop.f32.mrf.mxu3 }
 0x2fd   : > { %6673 = vst [vmem:[#allocation67_spill] sm:$0xff] %v5339_v1  ;;  %2123 = vmatmul.f32.gmra.mxu1 %v5339_v1  ;;  %2374 = vmatmul.f32.gmra.mxu3 %v5342_v29  ;;  %v778_v52 = vadd.f32 %v6677_v57, %v6676_v11  ;;  %v1620_v30 = vadd.f32 %v6678_v27, %v1481_v19  ;;  %v6681_v19 = vld [vmem:[#allocation61_spill] sm:$0xff]  ;;  %v5375_v2 = vpop.f32.mrf.mxu2 }
 0x2fe   : > { %6674 = vst [vmem:[#allocation39_spill] sm:$0xff] %v5342_v29  ;;  %v1937_v35 = vadd.f32 %v5003_v54, %v1905_v55  ;;  %3548 = vmatmul.msk.f32.gmra.mxu0 %vm500_vm0, %v1782_v40  ;;  %v1339_v4 = vadd.f32 %v6679_v10, %v1196_v46  ;;  %v6682_v11 = vld [vmem:[#allocation37_spill] sm:$0xff] }
 0x2ff   : > { %v1763_v55 = vadd.f32 %v6680_v61, %v1620_v30  ;;  %v1058_v8 = vadd.f32 %v6681_v19, %v778_v52  ;;  %v6685_v30 = vld [vmem:[#allocation79_spill] sm:$0xff] }
 0x300   : > { %v5358_v7 = vmax.f32 %v1937_v35, 0.0  ;;  %v1482_v57 = vadd.f32 %v6682_v11, %v1339_v4  ;;  %v6687_v4 = vld [vmem:[#allocation96_spill] sm:$0xff] }
 0x301   : > { %v1197_v61 = vadd.f32 %v6685_v30, %v1058_v8  ;;  %v337_v8 = vld [vmem:[%s6353_s3 + $0x230] sm:$0xff] }
 0x302   : > { %2218 = vmatmul.f32.gmra.mxu2 %v5358_v7  ;;  %v2029_v40 = vrot.slane %v5358_v7, 1  ;;  %v2280_v45 = vrot.slane %v5358_v7, 2 }
 0x303   : > { %v1841_v46 = vpop.f32.mrf.mxu0  ;;  %2577 = vmatpush.msrb.mxu2 %v337_v8 }
 0x304   : > { %v1906_v35 = vadd.f32 %v1841_v46, %v1763_v55  ;;  %v5370_v27 = vsel %vm442_vm1, %v2027_v25, %v2029_v40  ;;  %v5373_v10 = vsel %vm825_vm2, %v2278_v50, %v2280_v45  ;;  %v6686_v25 = vld [vmem:[#allocation51_spill] sm:$0xff]  ;;  %v6688_v50 = vld [vmem:[#allocation28_spill] sm:$0xff] }
 0x305   : > { %6683 = vst [vmem:[#allocation42_spill] sm:$0xff] %v5370_v27  ;;  %2126 = vmatmul.f32.gmra.mxu1 %v5370_v27  ;;  %2377 = vmatmul.f32.gmra.mxu3 %v5373_v10  ;;  %v781_v55 = vadd.f32 %v6687_v4, %v6686_v25  ;;  %v1621_v19 = vadd.f32 %v6688_v50, %v1482_v57  ;;  %v6689_v46 = vld [vmem:[#allocation8_spill] sm:$0xff]  ;;  %v6692_v50 = vld [vmem:[#allocation2_spill] sm:$0xff] }
 0x306   : > { %6684 = vst [vmem:[#allocation50_spill] sm:$0xff] %v5373_v10  ;;  %v1938_v52 = vadd.f32 %v5003_v54, %v1906_v35  ;;  %3549 = vmatmul.msk.f32.gmra.mxu0 %vm500_vm0, %v5216_v32  ;;  %v1340_v11 = vadd.f32 %v6689_v46, %v1197_v61  ;;  %v321_v35 = vld [vmem:[%s6353_s3 + $0x1b0] sm:$0xff]  ;;  %v6690_v32 = vld [vmem:[#allocation43_spill] sm:$0xff]  ;;  %v5398_v10 = vpop.f32.mrf.mxu1 }
 0x307   : > { %2456 = vmatpush.msrb.mxu1 %v321_v35  ;;  %v1764_v30 = vadd.f32 %v6690_v32, %v1621_v19  ;;  %v6695_v19 = vld [vmem:[#allocation82_spill] sm:$0xff] }
 0x308   : > { %v5389_v29 = vmax.f32 %v1938_v52, 0.0  ;;  %v6691_v52 = vld [vmem:[#allocation65_spill] sm:$0xff]  ;;  %v1483_v46 = vadd.f32 %v6692_v50, %v1340_v11  ;;  %v6697_v11 = vld [vmem:[#allocation54_spill] sm:$0xff]  ;;  %v6701_v50 = vld [vmem:[#allocation44_spill] sm:$0xff] }
 0x309   : > { %v1059_v25 = vadd.f32 %v6691_v52, %v781_v55  ;;  %v6696_v55 = vrot.slane %v4719_v34, 2  ;;  %v6702_v34 = vld [vmem:[#allocation110_spill] sm:$0xff] }
 0x30a   : > { %2221 = vmatmul.f32.gmra.mxu2 %v5389_v29  ;;  %v2031_v57 = vrot.slane %v5389_v29, 1  ;;  %v2282_v61 = vrot.slane %v5389_v29, 2 }
 0x30b   : > { %v1844_v4 = vpop.f32.mrf.mxu0  ;;  %v1198_v35 = vadd.f32 %v6695_v19, %v1059_v25 }
 0x30c   : > { %v1907_v27 = vadd.f32 %v1844_v4, %v1764_v30  ;;  %v5406_v21 = vsel %vm442_vm1, %v2029_v40, %v2031_v57  ;;  %v5409_v8 = vsel %vm825_vm2, %v2280_v45, %v2282_v61  ;;  %v6698_v30 = vld [vmem:[#allocation99_spill] sm:$0xff]  ;;  %v5420_v40 = vpop.f32.mrf.mxu2  ;;  %v6700_v4 = vld [vmem:[#allocation40_spill] sm:$0xff] }
 0x30d   : > { %6693 = vst [vmem:[#allocation72_spill] sm:$0xff] %v5406_v21  ;;  %2129 = vmatmul.f32.gmra.mxu1 %v5406_v21  ;;  %2380 = vmatmul.f32.gmra.mxu3 %v5409_v8  ;;  %v784_v52 = vadd.f32 %v6698_v30, %v6697_v11  ;;  %v1622_v45 = vadd.f32 %v6700_v4, %v1483_v46  ;;  %v5424_v21 = vpop.f32.mrf.mxu3  ;;  %v6703_v46 = vld [vmem:[#allocation68_spill] sm:$0xff] }
 0x30e   : > { %6694 = vst [vmem:[#allocation45_spill] sm:$0xff] %v5409_v8  ;;  %v1939_v32 = vadd.f32 %v5003_v54, %v1907_v27  ;;  %3550 = vmatmul.msk.f32.gmra.mxu0 %vm500_vm0, %v6696_v55  ;;  %v1341_v1 = vadd.f32 %v6701_v50, %v1198_v35  ;;  %v336_v27 = vld [vmem:[%s6353_s3 + $0x228] sm:$0xff]  ;;  %v6704_v30 = vld [vmem:[#allocation112_spill] sm:$0xff] }
 0x30f   : > { %6699 = vst [vmem:[#allocation53_spill] sm:$0xff] %v5420_v40  ;;  %2578 = vmatpush.msrb.mxu2 %v336_v27  ;;  %v1765_v25 = vadd.f32 %v6702_v34, %v1622_v45  ;;  %v1060_v11 = vadd.f32 %v6703_v46, %v784_v52  ;;  %v6708_v45 = vld [vmem:[#allocation85_spill] sm:$0xff]  ;;  %v6710_v46 = vld [vmem:[#allocation102_spill] sm:$0xff] }
 0x310   : > { %v5426_v8 = vmax.f32 %v1939_v32, 0.0  ;;  %v1484_v4 = vadd.f32 %v6704_v30, %v1341_v1  ;;  %v5437_v32 = vpop.f32.mrf.mxu1  ;;  %v6709_v1 = vld [vmem:[#allocation56_spill] sm:$0xff] }
 0x311   : > { %6705 = vst [vmem:[#allocation9_spill] sm:$0xff] %v5437_v32  ;;  %v1199_v34 = vadd.f32 %v6708_v45, %v1060_v11  ;;  %v787_v30 = vadd.f32 %v6710_v46, %v6709_v1  ;;  %v6714_v11 = vld [vmem:[#allocation114_spill] sm:$0xff] }
 0x312   : > { %2224 = vmatmul.f32.gmra.mxu2 %v5426_v8  ;;  %v2033_v19 = vrot.slane %v5426_v8, 1  ;;  %v2284_v55 = vrot.slane %v5426_v8, 2 }
 0x313   : > { %v1847_v35 = vpop.f32.mrf.mxu0 }
 0x314   : > { %v1908_v50 = vadd.f32 %v1847_v35, %v1765_v25  ;;  %v5440_v40 = vsel %vm442_vm1, %v2031_v57, %v2033_v19  ;;  %v5443_v27 = vsel %vm825_vm2, %v2282_v61, %v2284_v55  ;;  %v6711_v25 = vld [vmem:[#allocation109_spill] sm:$0xff]  ;;  %v320_v61 = vld [vmem:[%s6353_s3 + $0x1a8] sm:$0xff] }
 0x315   : > { %6706 = vst [vmem:[#allocation47_spill] sm:$0xff] %v5440_v40  ;;  %2132 = vmatmul.f32.gmra.mxu1 %v5440_v40  ;;  %2383 = vmatmul.f32.gmra.mxu3 %v5443_v27  ;;  %v1623_v35 = vadd.f32 %v6711_v25, %v1484_v4  ;;  %v6712_v57 = vld [vmem:[#allocation13_spill] sm:$0xff]  ;;  %v5462_v45 = vpop.f32.mrf.mxu3  ;;  %v6717_v25 = vld [vmem:[#allocation115_spill] sm:$0xff] }
 0x316   : > { %6707 = vst [vmem:[#allocation89_spill] sm:$0xff] %v5443_v27  ;;  %v1940_v52 = vadd.f32 %v5003_v54, %v1908_v50  ;;  %2816 = vmatmul.f32.vlgmr.msra.gmra.mxu0 %v5100_v31  ;;  %v1342_v32 = vadd.f32 %v6712_v57, %v1199_v34  ;;  %v5459_v27 = vpop.f32.mrf.mxu2  ;;  %2457 = vmatpush.msrb.mxu1 %v320_v61  ;;  %v6716_v34 = vld [vmem:[#allocation71_spill] sm:$0xff] }
 0x317   : > { %6713 = vst [vmem:[#allocation52_spill] sm:$0xff] %v5459_v27  ;;  %v1766_v50 = vadd.f32 %v6714_v11, %v1623_v35  ;;  %v6720_v35 = vld [vmem:[#allocation88_spill] sm:$0xff] }
 0x318   : > { %v5454_v39 = vmax.f32 %v1940_v52, 0.0  ;;  %6715 = vst [vmem:[#allocation14_spill] sm:$0xff] %v5462_v45  ;;  %v1061_v52 = vadd.f32 %v6716_v34, %v787_v30  ;;  %v1485_v57 = vadd.f32 %v6717_v25, %v1342_v32  ;;  %v5478_v27 = vpop.f32.mrf.mxu1  ;;  %v6722_v32 = vld [vmem:[#allocation59_spill] sm:$0xff]  ;;  %v6725_v25 = vld [vmem:[#allocation18_spill] sm:$0xff] }
 0x319   : > { %6721 = vst [vmem:[#allocation55_spill] sm:$0xff] %v5478_v27 }
 0x31a   : > { %2227 = vmatmul.f32.gmra.mxu2 %v5454_v39  ;;  %v2035_v1 = vrot.slane %v5454_v39, 1  ;;  %v2286_v4 = vrot.slane %v5454_v39, 2  ;;  %v1200_v11 = vadd.f32 %v6720_v35, %v1061_v52  ;;  %v6726_v52 = vld [vmem:[#allocation117_spill] sm:$0xff] }
 0x31b   : > { %v1850_v46 = vpop.f32.mrf.mxu0 }
 0x31c   : > { %v1909_v40 = vadd.f32 %v1850_v46, %v1766_v50  ;;  %v5470_v53 = vsel %vm442_vm1, %v2033_v19, %v2035_v1  ;;  %v5473_v61 = vsel %vm825_vm2, %v2284_v55, %v2286_v4  ;;  %v6723_v50 = vld [vmem:[#allocation106_spill] sm:$0xff]  ;;  %v6724_v19 = vld [vmem:[#allocation113_spill] sm:$0xff]  ;;  %v1343_v55 = vadd.f32 %v6725_v25, %v1200_v11 }
 0x31d   : > { %6718 = vst [vmem:[#allocation57_spill] sm:$0xff] %v5470_v53  ;;  %2135 = vmatmul.f32.gmra.mxu1 %v5470_v53  ;;  %2386 = vmatmul.f32.gmra.mxu3 %v5473_v61  ;;  %v790_v34 = vadd.f32 %v6723_v50, %v6722_v32  ;;  %v1624_v46 = vadd.f32 %v6724_v19, %v1485_v57  ;;  %v6727_v11 = vld [vmem:[#allocation74_spill] sm:$0xff]  ;;  %v5502_v53 = vpop.f32.mrf.mxu3 }
 0x31e   : > { %6719 = vst [vmem:[#allocation7_spill] sm:$0xff] %v5473_v61  ;;  %v1941_v30 = vadd.f32 %v5003_v54, %v1909_v40  ;;  %2819 = vmatmul.f32.gmra.mxu0 %v5136_v14  ;;  %v335_v61 = vld [vmem:[%s6353_s3 + $0x220] sm:$0xff]  ;;  %v5499_v50 = vpop.f32.mrf.mxu2 }
 0x31f   : > { %2579 = vmatpush.msrb.mxu2 %v335_v61  ;;  %v319_v40 = vld [vmem:[%s6353_s3 + $0x1a0] sm:$0xff]  ;;  %v1767_v35 = vadd.f32 %v6726_v52, %v1624_v46  ;;  %6728 = vst [vmem:[#allocation76_spill] sm:$0xff] %v5499_v50 }
 0x320   : > { %v5486_v45 = vmax.f32 %v1941_v30, 0.0  ;;  %2458 = vmatpush.msrb.mxu1 %v319_v40  ;;  %v1062_v30 = vadd.f32 %v6727_v11, %v790_v34  ;;  %v6729_v25 = vld [vmem:[#allocation118_spill] sm:$0xff]  ;;  %6730 = vst [vmem:[#allocation48_spill] sm:$0xff] %v5502_v53  ;;  %v6735_v11 = vld [vmem:[#allocation108_spill] sm:$0xff]  ;;  %v5519_v53 = vpop.f32.mrf.mxu1 }
 0x321   : > { %v1486_v61 = vadd.f32 %v6729_v25, %v1343_v55  ;;  %v6733_v40 = vld [vmem:[#allocation90_spill] sm:$0xff]  ;;  %v6734_v55 = vld [vmem:[#allocation63_spill] sm:$0xff] }
 0x322   : > { %2230 = vmatmul.f32.gmra.mxu2 %v5486_v45  ;;  %v2037_v32 = vrot.slane %v5486_v45, 1  ;;  %v2288_v57 = vrot.slane %v5486_v45, 2  ;;  %v1201_v34 = vadd.f32 %v6733_v40, %v1062_v30  ;;  %v793_v25 = vadd.f32 %v6735_v11, %v6734_v55  ;;  %v6738_v55 = vld [vmem:[#allocation77_spill] sm:$0xff] }
 0x323   : > { %v1853_v19 = vpop.f32.mrf.mxu0 }
 0x324   : > { %v1910_v27 = vadd.f32 %v1853_v19, %v1767_v35  ;;  %v5505_v24 = vsel %vm442_vm1, %v2035_v1, %v2037_v32  ;;  %v5508_v46 = vsel %vm825_vm2, %v2286_v4, %v2288_v57  ;;  %v6736_v35 = vld [vmem:[#allocation116_spill] sm:$0xff]  ;;  %v6737_v1 = vld [vmem:[#allocation15_spill] sm:$0xff] }
 0x325   : > { %6731 = vst [vmem:[#allocation93_spill] sm:$0xff] %v5505_v24  ;;  %2138 = vmatmul.f32.gmra.mxu1 %v5505_v24  ;;  %2389 = vmatmul.f32.gmra.mxu3 %v5508_v46  ;;  %v1625_v19 = vadd.f32 %v6736_v35, %v1486_v61  ;;  %v1344_v50 = vadd.f32 %v6737_v1, %v1201_v34 }
 0x326   : > { %6732 = vst [vmem:[#allocation26_spill] sm:$0xff] %v5508_v46  ;;  %v1942_v52 = vadd.f32 %v5003_v54, %v1910_v27  ;;  %2822 = vmatmul.f32.gmra.mxu0 %v5182_v6  ;;  %v334_v46 = vld [vmem:[%s6353_s3 + $0x218] sm:$0xff]  ;;  %v1063_v61 = vadd.f32 %v6738_v55, %v793_v25  ;;  %v5543_v25 = vpop.f32.mrf.mxu3 }
 0x327   : > { %v1768_v30 = vadd.f32 %v5041_v59, %v1625_v19  ;;  %2580 = vmatpush.msrb.mxu2 %v334_v46  ;;  %v1487_v34 = vadd.f32 %v5055_v47, %v1344_v50  ;;  %v5538_v59 = vpop.f32.mrf.mxu2  ;;  %v6742_v19 = vld [vmem:[#allocation92_spill] sm:$0xff]  ;;  %v6743_v47 = vld [vmem:[#allocation66_spill] sm:$0xff]  ;;  %v6746_v55 = vld [vmem:[#allocation49_spill] sm:$0xff] }
 0x328   : > { %v5521_v4 = vmax.f32 %v1942_v52, 0.0  ;;  %6741 = vst [vmem:[#allocation61_spill] sm:$0xff] %v5538_v59  ;;  %v1202_v24 = vadd.f32 %v6742_v19, %v1063_v61  ;;  %v5557_v19 = vpop.f32.mrf.mxu1 }
 0x329   : > { %6747 = vst [vmem:[#allocation37_spill] sm:$0xff] %v5557_v19 }
 0x32a   : > { %2233 = vmatmul.f32.gmra.mxu2 %v5521_v4  ;;  %v2039_v27 = vrot.slane %v5521_v4, 1  ;;  %v2290_v40 = vrot.slane %v5521_v4, 2 }
 0x32b   : > { %v1856_v11 = vpop.f32.mrf.mxu0 }
 0x32c   : > { %v1911_v52 = vadd.f32 %v1856_v11, %v1768_v30  ;;  %v5533_v35 = vsel %vm442_vm1, %v2037_v32, %v2039_v27  ;;  %v5536_v1 = vsel %vm825_vm2, %v2288_v57, %v2290_v40  ;;  %v6744_v32 = vld [vmem:[#allocation12_spill] sm:$0xff]  ;;  %v6745_v30 = vld [vmem:[#allocation119_spill] sm:$0xff]  ;;  %v1345_v11 = vadd.f32 %v6746_v55, %v1202_v24 }
 0x32d   : > { %6739 = vst [vmem:[#allocation11_spill] sm:$0xff] %v5533_v35  ;;  %2141 = vmatmul.f32.gmra.mxu1 %v5533_v35  ;;  %2392 = vmatmul.f32.gmra.mxu3 %v5536_v1  ;;  %v796_v50 = vadd.f32 %v6744_v32, %v6743_v47  ;;  %v1626_v57 = vadd.f32 %v6745_v30, %v1487_v34  ;;  %v6748_v34 = vld [vmem:[#allocation80_spill] sm:$0xff] }
 0x32e   : > { %6740 = vst [vmem:[#allocation34_spill] sm:$0xff] %v5536_v1  ;;  %v1943_v46 = vadd.f32 %v5003_v54, %v1911_v52  ;;  %2825 = vmatmul.f32.gmra.mxu0 %v5233_v12  ;;  %v318_v1 = vld [vmem:[%s6353_s3 + $0x198] sm:$0xff] }
 0x32f   : > { %2459 = vmatpush.msrb.mxu1 %v318_v1  ;;  %v1769_v61 = vadd.f32 %v5075_v62, %v1626_v57  ;;  %v1064_v32 = vadd.f32 %v6748_v34, %v796_v50  ;;  %v6751_v57 = vld [vmem:[#allocation95_spill] sm:$0xff]  ;;  %v6752_v50 = vld [vmem:[#allocation69_spill] sm:$0xff] }
 0x330   : > { %v5551_v59 = vmax.f32 %v1943_v46, 0.0  ;;  %v1488_v46 = vadd.f32 %v5091_v3, %v1345_v11  ;;  %v6753_v3 = vld [vmem:[#allocation16_spill] sm:$0xff] }
 0x331   : > { %v1203_v19 = vadd.f32 %v6751_v57, %v1064_v32  ;;  %v799_v11 = vadd.f32 %v6753_v3, %v6752_v50  ;;  %v317_v32 = vld [vmem:[%s6353_s3 + $0x190] sm:$0xff] }
 0x332   : > { %2236 = vmatmul.f32.gmra.mxu2 %v5551_v59  ;;  %v2041_v52 = vrot.slane %v5551_v59, 1  ;;  %v2292_v47 = vrot.slane %v5551_v59, 2  ;;  %2460 = vmatpush.msrb.mxu1 %v317_v32 }
 0x333   : > { %v1859_v24 = vpop.f32.mrf.mxu0 }
 0x334   : > { %v1912_v30 = vadd.f32 %v1859_v24, %v1769_v61  ;;  %v5565_v55 = vsel %vm442_vm1, %v2039_v27, %v2041_v52  ;;  %v5568_v1 = vsel %vm825_vm2, %v2290_v40, %v2292_v47  ;;  %v1627_v27 = vadd.f32 %v5072_v18, %v1488_v46  ;;  %v6754_v61 = vld [vmem:[#allocation17_spill] sm:$0xff]  ;;  %v5579_v40 = vpop.f32.mrf.mxu3 }
 0x335   : > { %6749 = vst [vmem:[#allocation79_spill] sm:$0xff] %v5565_v55  ;;  %2144 = vmatmul.f32.gmra.mxu1 %v5565_v55  ;;  %v2189_v62 = vpop.f32.mrf.mxu2  ;;  %2395 = vmatmul.f32.gmra.mxu3 %v5568_v1  ;;  %v1346_v34 = vadd.f32 %v6754_v61, %v1203_v19 }
 0x336   : > { %6750 = vst [vmem:[#allocation51_spill] sm:$0xff] %v5568_v1  ;;  %v1944_v35 = vadd.f32 %v5003_v54, %v1912_v30  ;;  %2828 = vmatmul.f32.gmra.mxu0 %v5271_v44  ;;  %v333_v1 = vld [vmem:[%s6353_s3 + $0x210] sm:$0xff]  ;;  %v1770_v30 = vadd.f32 %v5113_v49, %v1627_v27  ;;  %v362_v27 = vld [vmem:[%s6353_s3 + $0x2f8] sm:$0xff] }
 0x337   : > { %6755 = vst [vmem:[#allocation96_spill] sm:$0xff] %v5579_v40  ;;  %2581 = vmatpush.msrb.mxu2 %v333_v1  ;;  %v1489_v3 = vadd.f32 %v5134_v0, %v1346_v34  ;;  %2687 = vmatpush.msrb.mxu3 %v362_v27  ;;  %v6761_v34 = vld [vmem:[#allocation20_spill] sm:$0xff]  ;;  %v332_v27 = vld [vmem:[%s6353_s3 + $0x208] sm:$0xff] }
 0x338   : > { %v5581_v24 = vmax.f32 %v1944_v35, 0.0  ;;  %v6756_v35 = vld [vmem:[#allocation84_spill] sm:$0xff] }
 0x339   : > { %v1065_v46 = vadd.f32 %v6756_v35, %v799_v11  ;;  %v6759_v11 = vld [vmem:[#allocation98_spill] sm:$0xff]  ;;  %v361_v35 = vld [vmem:[%s6353_s3 + $0x2f0] sm:$0xff]  ;;  %2582 = vmatpush.msrb.mxu2 %v332_v27 }
 0x33a   : > { %v2100_v57 = vpop.f32.mrf.mxu1  ;;  %2239 = vmatmul.f32.gmra.mxu2 %v5581_v24  ;;  %v2043_v18 = vrot.slane %v5581_v24, 1  ;;  %v2294_v19 = vrot.slane %v5581_v24, 2  ;;  %2688 = vmatpush.msrb.mxu3 %v361_v35 }
 0x33b   : > { %v1862_v50 = vpop.f32.mrf.mxu0  ;;  %v1204_v32 = vadd.f32 %v6759_v11, %v1065_v46 }
 0x33c   : > { %v1913_v1 = vadd.f32 %v1862_v50, %v1770_v30  ;;  %v5596_v61 = vsel %vm442_vm1, %v2041_v52, %v2043_v18  ;;  %v5599_v40 = vsel %vm825_vm2, %v2292_v47, %v2294_v19  ;;  %v6760_v52 = vld [vmem:[#allocation70_spill] sm:$0xff]  ;;  %v2190_v30 = vadd.f32 %v2189_v62, %v2100_v57  ;;  %v360_v62 = vld [vmem:[%s6353_s3 + $0x2e8] sm:$0xff] }
 0x33d   : > { %6757 = vst [vmem:[#allocation28_spill] sm:$0xff] %v5596_v61  ;;  %2147 = vmatmul.f32.gmra.mxu1 %v5596_v61  ;;  %v2192_v49 = vpop.f32.mrf.mxu2  ;;  %2398 = vmatmul.f32.gmra.mxu3 %v5599_v40  ;;  %v802_v47 = vadd.f32 %v6761_v34, %v6760_v52  ;;  %v1628_v50 = vadd.f32 %v5110_v63, %v1489_v3  ;;  %v6764_v3 = vld [vmem:[#allocation87_spill] sm:$0xff]  ;;  %v359_v52 = vld [vmem:[%s6353_s3 + $0x2e0] sm:$0xff] }
 0x33e   : > { %6758 = vst [vmem:[#allocation8_spill] sm:$0xff] %v5599_v40  ;;  %v1945_v0 = vadd.f32 %v5003_v54, %v1913_v1  ;;  %2831 = vmatmul.f32.gmra.mxu0 %v5316_v22  ;;  %v6762_v40 = vld [vmem:[#allocation60_spill] sm:$0xff]  ;;  %2689 = vmatpush.msrb.mxu3 %v360_v62 }
 0x33f   : > { %v1347_v61 = vadd.f32 %v6762_v40, %v1204_v32  ;;  %v1771_v57 = vadd.f32 %v5170_v5, %v1628_v50  ;;  %v1066_v32 = vadd.f32 %v6764_v3, %v802_v47  ;;  %v358_v47 = vld [vmem:[%s6353_s3 + $0x2d8] sm:$0xff] }
 0x340   : > { %v5616_v55 = vmax.f32 %v1945_v0, 0.0  ;;  %v2351_v46 = vpop.f32.mrf.mxu3  ;;  %2690 = vmatpush.msrb.mxu3 %v359_v52 }
 0x341   : > { %v5618_v1 = vadd.f32 %v2351_v46, %v2190_v30  ;;  %v1490_v34 = vadd.f32 %v5193_v51, %v1347_v61  ;;  %v6766_v46 = vld [vmem:[#allocation101_spill] sm:$0xff] }
 0x342   : > { %v2103_v11 = vpop.f32.mrf.mxu1  ;;  %2242 = vmatmul.f32.gmra.mxu2 %v5616_v55  ;;  %v2045_v63 = vrot.slane %v5616_v55, 1  ;;  %v2296_v40 = vrot.slane %v5616_v55, 2  ;;  %v1205_v27 = vadd.f32 %v6766_v46, %v1066_v32  ;;  %2691 = vmatpush.msrb.mxu3 %v358_v47  ;;  %v6771_v46 = vld [vmem:[#allocation91_spill] sm:$0xff] }
 0x343   : > { %6763 = vst [vmem:[#allocation43_spill] sm:$0xff] %v5618_v1  ;;  %v1865_v0 = vpop.f32.mrf.mxu0  ;;  %v2193_v62 = vadd.f32 %v2192_v49, %v2103_v11  ;;  %v1629_v3 = vadd.f32 %v5165_v16, %v1490_v34  ;;  %v356_v49 = vld [vmem:[%s6353_s3 + $0x2c8] sm:$0xff] }
 0x344   : > { %v1914_v30 = vadd.f32 %v1865_v0, %v1771_v57  ;;  %v5636_v5 = vsel %vm442_vm1, %v2043_v18, %v2045_v63  ;;  %v5639_v35 = vsel %vm825_vm2, %v2294_v19, %v2296_v40  ;;  %v6767_v18 = vld [vmem:[#allocation73_spill] sm:$0xff]  ;;  %v6768_v19 = vld [vmem:[#allocation24_spill] sm:$0xff]  ;;  %v6769_v0 = vld [vmem:[#allocation22_spill] sm:$0xff] }
 0x345   : > { %6765 = vst [vmem:[#allocation65_spill] sm:$0xff] %v5636_v5  ;;  %2150 = vmatmul.f32.gmra.mxu1 %v5636_v5  ;;  %v2195_v50 = vpop.f32.mrf.mxu2  ;;  %2401 = vmatmul.f32.gmra.mxu3 %v5639_v35  ;;  %v805_v61 = vadd.f32 %v6768_v19, %v6767_v18  ;;  %v357_v57 = vld [vmem:[%s6353_s3 + $0x2d0] sm:$0xff]  ;;  %v1348_v52 = vadd.f32 %v6769_v0, %v1205_v27  ;;  %v355_v18 = vld [vmem:[%s6353_s3 + $0x2c0] sm:$0xff]  ;;  %v6772_v0 = vld [vmem:[#allocation103_spill] sm:$0xff] }
 0x346   : > { %v1946_v51 = vadd.f32 %v5003_v54, %v1914_v30  ;;  %2834 = vmatmul.f32.gmra.mxu0 %v5358_v7  ;;  %v316_v54 = vld [vmem:[%s6353_s3 + $0x188] sm:$0xff]  ;;  %2692 = vmatpush.msrb.mxu3 %v357_v57  ;;  %v1772_v11 = vadd.f32 %v5231_v23, %v1629_v3 }
 0x347   : > { %2461 = vmatpush.msrb.mxu1 %v316_v54  ;;  %v1067_v27 = vadd.f32 %v6771_v46, %v805_v61  ;;  %v1491_v19 = vadd.f32 %v5247_v33, %v1348_v52  ;;  %v354_v61 = vld [vmem:[%s6353_s3 + $0x2b8] sm:$0xff]  ;;  %v5690_v33 = vld [vmem:[%s6352_s2] ss:$0 sm:$0xff] }
 0x348   : > { %v5656_v1 = vmax.f32 %v1946_v51, 0.0  ;;  %v2354_v32 = vpop.f32.mrf.mxu3  ;;  %2693 = vmatpush.msrb.mxu3 %v356_v49  ;;  %v6774_v52 = vld [vmem:[#allocation29_spill] sm:$0xff] }
 0x349   : > { %v5661_v30 = vadd.f32 %v2354_v32, %v2193_v62  ;;  %v1206_v32 = vadd.f32 %v6772_v0, %v1067_v27  ;;  %v1630_v46 = vadd.f32 %v5227_v9, %v1491_v19  ;;  %v6775_v27 = vld [vmem:[#allocation19_spill] sm:$0xff] }
 0x34a   : > { %v2106_v16 = vpop.f32.mrf.mxu1  ;;  %2245 = vmatmul.f32.gmra.mxu2 %v5656_v1  ;;  %v2047_v34 = vrot.slane %v5656_v1, 1  ;;  %v2298_v47 = vrot.slane %v5656_v1, 2  ;;  %2694 = vmatpush.msrb.mxu3 %v355_v18  ;;  %v352_v9 = vld [vmem:[%s6353_s3 + $0x2a8] sm:$0xff] }
 0x34b   : > { %6770 = vst [vmem:[#allocation2_spill] sm:$0xff] %v5661_v30  ;;  %v1868_v51 = vpop.f32.mrf.mxu0  ;;  %v2196_v49 = vadd.f32 %v2195_v50, %v2106_v16  ;;  %v315_v50 = vld [vmem:[%s6353_s3 + $0x180] sm:$0xff]  ;;  %v1773_v16 = vadd.f32 %v5285_v38, %v1630_v46 }
 0x34c   : > { %v1915_v62 = vadd.f32 %v1868_v51, %v1772_v11  ;;  %v5676_v23 = vsel %vm442_vm1, %v2045_v63, %v2047_v34  ;;  %v5679_v57 = vsel %vm825_vm2, %v2296_v40, %v2298_v47  ;;  %2695 = vmatpush.msrb.mxu3 %v354_v61  ;;  %v6773_v40 = vld [vmem:[#allocation75_spill] sm:$0xff]  ;;  %v353_v11 = vld [vmem:[%s6353_s3 + $0x2b0] sm:$0xff]  ;;  %v1349_v51 = vadd.f32 %v6775_v27, %v1206_v32 }
 0x34d   : > { %2153 = vmatmul.f32.gmra.mxu1 %v5676_v23  ;;  %v2198_v3 = vpop.f32.mrf.mxu2  ;;  %2404 = vmatmul.f32.gmra.mxu3 %v5679_v57  ;;  %v808_v54 = vadd.f32 %v6774_v52, %v6773_v40  ;;  %v6777_v40 = vld [vmem:[#allocation94_spill] sm:$0xff] }
 0x34e   : > { %v1947_v63 = vadd.f32 %v5690_v33, %v1915_v62  ;;  %2837 = vmatmul.f32.gmra.mxu0 %v5389_v29  ;;  %v331_v62 = vld [vmem:[%s6353_s3 + $0x200] sm:$0xff]  ;;  %2696 = vmatpush.msrb.mxu3 %v353_v11  ;;  %v1492_v27 = vadd.f32 %v5304_v26, %v1349_v51  ;;  %v6781_v51 = vld [vmem:[#allocation32_spill] sm:$0xff] }
 0x34f   : > { %2583 = vmatpush.msrb.mxu2 %v331_v62  ;;  %2462 = vmatpush.msrb.mxu1 %v315_v50  ;;  %v1068_v52 = vadd.f32 %v6777_v40, %v808_v54  ;;  %v351_v11 = vld [vmem:[%s6353_s3 + $0x2a0] sm:$0xff]  ;;  %v350_v54 = vld [vmem:[%s6353_s3 + $0x298] sm:$0xff]  ;;  %v349_v40 = vld [vmem:[%s6353_s3 + $0x290] sm:$0xff] }
 0x350   : > { %v5701_v18 = vmax.f32 %v1947_v63, 0.0  ;;  %v2357_v0 = vpop.f32.mrf.mxu3  ;;  %2697 = vmatpush.msrb.mxu3 %v352_v9  ;;  %v6779_v50 = vld [vmem:[#allocation105_spill] sm:$0xff] }
 0x351   : > { %v5706_v61 = vadd.f32 %v2357_v0, %v2196_v49  ;;  %v1207_v9 = vadd.f32 %v6779_v50, %v1068_v52 }
 0x352   : > { %v2109_v19 = vpop.f32.mrf.mxu1  ;;  %2248 = vmatmul.f32.gmra.mxu2 %v5701_v18  ;;  %v2049_v32 = vrot.slane %v5701_v18, 1  ;;  %v2300_v63 = vrot.slane %v5701_v18, 2  ;;  %2698 = vmatpush.msrb.mxu3 %v351_v11  ;;  %v410_v11 = vld [vmem:[%s6353_s3 + $0x478] sm:$0xff] }
 0x353   : > { %6776 = vst [vmem:[#allocation82_spill] sm:$0xff] %v5706_v61  ;;  %v1871_v49 = vpop.f32.mrf.mxu0  ;;  %v6782_v61 = vld [vmem:[#allocation21_spill] sm:$0xff]  ;;  %3040 = vmatpush.msra.mxu2 %v410_v11 }
 0x354   : > { %v1916_v0 = vadd.f32 %v1871_v49, %v1773_v16  ;;  %v5724_v38 = vsel %vm442_vm1, %v2047_v34, %v2049_v32  ;;  %v5727_v46 = vsel %vm825_vm2, %v2298_v47, %v2300_v63  ;;  %v6780_v34 = vld [vmem:[#allocation78_spill] sm:$0xff]  ;;  %v2199_v16 = vadd.f32 %v2198_v3, %v2109_v19  ;;  %2699 = vmatpush.msrb.mxu3 %v350_v54  ;;  %v348_v3 = vld [vmem:[%s6353_s3 + $0x288] sm:$0xff] }
 0x355   : > { %6778 = vst [vmem:[#allocation54_spill] sm:$0xff] %v5727_v46  ;;  %2156 = vmatmul.f32.gmra.mxu1 %v5724_v38  ;;  %v2201_v62 = vpop.f32.mrf.mxu2  ;;  %2407 = vmatmul.f32.gmra.mxu3 %v5727_v46  ;;  %v811_v47 = vadd.f32 %v6781_v51, %v6780_v34  ;;  %v1631_v49 = vadd.f32 %v5282_v28, %v1492_v27  ;;  %v6783_v27 = vld [vmem:[#allocation97_spill] sm:$0xff] }
 0x356   : > { %v1948_v26 = vadd.f32 %v5690_v33, %v1916_v0  ;;  %2840 = vmatmul.f32.gmra.mxu0 %v5426_v8  ;;  %v1350_v46 = vadd.f32 %v6782_v61, %v1207_v9  ;;  %2700 = vmatpush.msrb.mxu3 %v349_v40 }
 0x357   : > { %v1774_v19 = vadd.f32 %v5336_v48, %v1631_v49  ;;  %v1069_v54 = vadd.f32 %v6783_v27, %v811_v47  ;;  %v6785_v47 = vld [vmem:[#allocation3_spill] sm:$0xff] }
 0x358   : > { %v5744_v30 = vmax.f32 %v1948_v26, 0.0  ;;  %v2360_v52 = vpop.f32.mrf.mxu3  ;;  %v347_v26 = vld [vmem:[%s6353_s3 + $0x280] sm:$0xff]  ;;  %v1493_v34 = vadd.f32 %v5356_v43, %v1350_v46  ;;  %2701 = vmatpush.msrb.mxu3 %v348_v3  ;;  %v394_v43 = vld [vmem:[%s6353_s3 + $0x3f8] sm:$0xff]  ;;  %v6786_v46 = vld [vmem:[#allocation23_spill] sm:$0xff] }
 0x359   : > { %v5746_v0 = vadd.f32 %v2360_v52, %v2199_v16  ;;  %v1208_v49 = vadd.f32 %v6785_v47, %v1069_v54  ;;  %2921 = vmatpush.msra.mxu1 %v394_v43 }
 0x35a   : > { %v2112_v50 = vpop.f32.mrf.mxu1  ;;  %2251 = vmatmul.f32.gmra.mxu2 %v5744_v30  ;;  %v2051_v28 = vrot.slane %v5744_v30, 1  ;;  %v2302_v61 = vrot.slane %v5744_v30, 2  ;;  %2702 = vmatpush.msrb.mxu3 %v347_v26 }
 0x35b   : > { %v1874_v9 = vpop.f32.mrf.mxu0  ;;  %v1351_v11 = vadd.f32 %v6786_v46, %v1208_v49 }
 0x35c   : > { %v1917_v51 = vadd.f32 %v1874_v9, %v1774_v19  ;;  %v5764_v48 = vsel %vm442_vm1, %v2049_v32, %v2051_v28  ;;  %v5767_v16 = vsel %vm825_vm2, %v2300_v63, %v2302_v61  ;;  %v2202_v32 = vadd.f32 %v2201_v62, %v2112_v50 }
 0x35d   : > { %6784 = vst [vmem:[#allocation99_spill] sm:$0xff] %v5764_v48  ;;  %2159 = vmatmul.f32.gmra.mxu1 %v5764_v48  ;;  %v2204_v40 = vpop.f32.mrf.mxu2  ;;  %2410 = vmatmul.f32.gmra.mxu3 %v5767_v16  ;;  %v1632_v63 = vadd.f32 %v5329_v58, %v1493_v34  ;;  %v1494_v50 = vadd.f32 %v5398_v10, %v1351_v11  ;;  %v409_v10 = vld [vmem:[%s6353_s3 + $0x470] sm:$0xff] }
 0x35e   : > { %v1949_v52 = vadd.f32 %v5690_v33, %v1917_v51  ;;  %2843 = vmatmul.f32.gmra.mxu0 %v5454_v39  ;;  %3041 = vmatpush.msra.mxu2 %v409_v10 }
 0x35f   : > { %v1775_v54 = vadd.f32 %v5380_v17, %v1632_v63  ;;  %v393_v63 = vld [vmem:[%s6353_s3 + $0x3f0] sm:$0xff] }
 0x360   : > { %v5779_v3 = vmax.f32 %v1949_v52, 0.0  ;;  %v2363_v19 = vpop.f32.mrf.mxu3  ;;  %2922 = vmatpush.msra.mxu1 %v393_v63 }
 0x361   : > { %v5781_v27 = vadd.f32 %v2363_v19, %v2202_v32 }
 0x362   : > { %v2115_v9 = vpop.f32.mrf.mxu1  ;;  %2254 = vmatmul.f32.gmra.mxu2 %v5779_v3  ;;  %v2053_v26 = vrot.slane %v5779_v3, 1  ;;  %v2304_v51 = vrot.slane %v5779_v3, 2 }
 0x363   : > { %v1877_v62 = vpop.f32.mrf.mxu0  ;;  %v2205_v52 = vadd.f32 %v2204_v40, %v2115_v9 }
 0x364   : > { %v1918_v58 = vadd.f32 %v1877_v62, %v1775_v54  ;;  %v5789_v34 = vsel %vm442_vm1, %v2051_v28, %v2053_v26  ;;  %v5792_v47 = vsel %vm825_vm2, %v2302_v61, %v2304_v51  ;;  %v1633_v28 = vadd.f32 %v5375_v2, %v1494_v50 }
 0x365   : > { %2162 = vmatmul.f32.gmra.mxu1 %v5789_v34  ;;  %v2207_v17 = vpop.f32.mrf.mxu2  ;;  %2413 = vmatmul.f32.gmra.mxu3 %v5792_v47 }
 0x366   : > { %v1950_v49 = vadd.f32 %v5690_v33, %v1918_v58  ;;  %2846 = vmatmul.f32.gmra.mxu0 %v5486_v45  ;;  %v1776_v46 = vadd.f32 %v5424_v21, %v1633_v28 }
 0x368   : > { %v5802_v43 = vmax.f32 %v1950_v49, 0.0  ;;  %v2366_v61 = vpop.f32.mrf.mxu3 }
 0x369   : > { %v5804_v32 = vadd.f32 %v2366_v61, %v2205_v52 }
 0x36a   : > { %v2118_v11 = vpop.f32.mrf.mxu1  ;;  %2257 = vmatmul.f32.gmra.mxu2 %v5802_v43  ;;  %v2055_v19 = vrot.slane %v5802_v43, 1  ;;  %v2306_v40 = vrot.slane %v5802_v43, 2 }
 0x36b   : > { %v1880_v2 = vpop.f32.mrf.mxu0  ;;  %v2208_v58 = vadd.f32 %v2207_v17, %v2118_v11 }
 0x36c   : > { %v1919_v54 = vadd.f32 %v1880_v2, %v1776_v46  ;;  %v5814_v9 = vsel %vm442_vm1, %v2053_v26, %v2055_v19  ;;  %v5817_v62 = vsel %vm825_vm2, %v2304_v51, %v2306_v40  ;;  %v408_v26 = vld [vmem:[%s6353_s3 + $0x468] sm:$0xff] }
 0x36d   : > { %2165 = vmatmul.f32.gmra.mxu1 %v5814_v9  ;;  %v2210_v50 = vpop.f32.mrf.mxu2  ;;  %2416 = vmatmul.f32.gmra.mxu3 %v5817_v62 }
 0x36e   : > { %v1951_v21 = vadd.f32 %v5690_v33, %v1919_v54  ;;  %2849 = vmatmul.f32.gmra.mxu0 %v5521_v4  ;;  %3042 = vmatpush.msra.mxu2 %v408_v26 }
 0x370   : > { %v5823_v49 = vmax.f32 %v1951_v21, 0.0  ;;  %v2369_v10 = vpop.f32.mrf.mxu3  ;;  %v6787_v21 = vld [vmem:[#allocation25_spill] sm:$0xff] }
 0x371   : > { %v5825_v52 = vadd.f32 %v2369_v10, %v2208_v58  ;;  %v407_v58 = vld [vmem:[%s6353_s3 + $0x460] sm:$0xff] }
 0x372   : > { %v2121_v51 = vpop.f32.mrf.mxu1  ;;  %2584 = vmatmul.f32.vlgmr.msrb.gmra.mxu2 %v5083_v37  ;;  %v6450_v28 = vrot.slane %v5823_v49, 1  ;;  %v6449_v61 = vrot.slane %v5823_v49, 2  ;;  %v392_v37 = vld [vmem:[%s6353_s3 + $0x3e8] sm:$0xff] }
 0x373   : > { %2923 = vmatpush.msra.mxu1 %v392_v37  ;;  %v2211_v11 = vadd.f32 %v2210_v50, %v2121_v51  ;;  %3043 = vmatpush.msra.mxu2 %v407_v58 }
 0x374   : > { %v5836_v17 = vsel %vm442_vm1, %v2055_v19, %v6450_v28  ;;  %v5841_v63 = vsel %vm825_vm2, %v2306_v40, %v6449_v61 }
 0x375   : > { %2168 = vmatmul.f32.gmra.mxu1 %v5836_v17  ;;  %v2213_v46 = vpop.f32.mrf.mxu2  ;;  %2419 = vmatmul.f32.gmra.mxu3 %v5841_v63 }
 0x376   : > { %2852 = vmatmul.f32.gmra.mxu0 %v5551_v59 }
 0x378   : > { %v2372_v19 = vpop.f32.mrf.mxu3 }
 0x379   : > { %v5849_v2 = vadd.f32 %v2372_v19, %v2211_v11  ;;  %v406_v19 = vld [vmem:[%s6353_s3 + $0x458] sm:$0xff] }
 0x37a   : > { %v2124_v54 = vpop.f32.mrf.mxu1  ;;  %2587 = vmatmul.f32.gmra.mxu2 %v5116_v41  ;;  %v391_v41 = vld [vmem:[%s6353_s3 + $0x3e0] sm:$0xff] }
 0x37b   : > { %v2214_v10 = vadd.f32 %v2213_v46, %v2124_v54  ;;  %2924 = vmatpush.msra.mxu1 %v391_v41  ;;  %3044 = vmatpush.msra.mxu2 %v406_v19  ;;  %v405_v41 = vld [vmem:[%s6353_s3 + $0x450] sm:$0xff] }
 0x37d   : > { %v2216_v40 = vpop.f32.mrf.mxu2  ;;  %2463 = vmatmul.f32.vlgmr.msrb.gmra.mxu1 %v6787_v21  ;;  %2703 = vmatmul.f32.vlgmr.msrb.gmra.mxu3 %v5086_v13 }
 0x37e   : > { %2855 = vmatmul.f32.gmra.mxu0 %v5581_v24  ;;  %3045 = vmatpush.msra.mxu2 %v405_v41 }
 0x380   : > { %v2375_v50 = vpop.f32.mrf.mxu3 }
 0x381   : > { %v5858_v26 = vadd.f32 %v2375_v50, %v2214_v10 }
 0x382   : > { %v2127_v51 = vpop.f32.mrf.mxu1  ;;  %2590 = vmatmul.f32.gmra.mxu2 %v5157_v42 }
 0x383   : > { %v2217_v37 = vadd.f32 %v2216_v40, %v2127_v51 }
 0x385   : > { %v2219_v13 = vpop.f32.mrf.mxu2  ;;  %2466 = vmatmul.f32.gmra.mxu1 %v5067_v60  ;;  %2706 = vmatmul.f32.gmra.mxu3 %v5119_v20  ;;  %v390_v60 = vld [vmem:[%s6353_s3 + $0x3d8] sm:$0xff] }
 0x386   : > { %2858 = vmatmul.f32.gmra.mxu0 %v5616_v55  ;;  %2925 = vmatpush.msra.mxu1 %v390_v60  ;;  %v6793_v60 = vld [vmem:[#allocation33_spill] sm:$0xff] }
 0x388   : > { %v2378_v46 = vpop.f32.mrf.mxu3 }
 0x389   : > { %v5867_v11 = vadd.f32 %v2378_v46, %v2217_v37  ;;  %v389_v46 = vld [vmem:[%s6353_s3 + $0x3d0] sm:$0xff] }
 0x38a   : > { %v2130_v54 = vpop.f32.mrf.mxu1  ;;  %2593 = vmatmul.f32.gmra.mxu2 %v5201_v56  ;;  %2926 = vmatpush.msra.mxu1 %v389_v46  ;;  %v6797_v46 = vld [vmem:[#allocation67_spill] sm:$0xff]  ;;  %v6807_v56 = vld [vmem:[#allocation9_spill] sm:$0xff] }
 0x38b   : > { %6788 = vst [vmem:[#allocation40_spill] sm:$0xff] %v5867_v11  ;;  %v2220_v20 = vadd.f32 %v2219_v13, %v2130_v54  ;;  %v6792_v54 = vld [vmem:[#allocation64_spill] sm:$0xff] }
 0x38d   : > { %v2222_v21 = vpop.f32.mrf.mxu2  ;;  %2469 = vmatmul.f32.gmra.mxu1 %v5100_v31  ;;  %2709 = vmatmul.f32.gmra.mxu3 %v5160_v36  ;;  %v6790_v31 = vld [vmem:[#allocation30_spill] sm:$0xff] }
 0x38e   : > { %2861 = vmatmul.f32.gmra.mxu0 %v5656_v1 }
 0x390   : > { %v2381_v40 = vpop.f32.mrf.mxu3 }
 0x391   : > { %v5879_v58 = vadd.f32 %v2381_v40, %v2220_v20  ;;  %v6795_v40 = vld [vmem:[#allocation35_spill] sm:$0xff] }
 0x392   : > { %v2133_v10 = vpop.f32.mrf.mxu1  ;;  %2596 = vmatmul.f32.gmra.mxu2 %v5250_v15  ;;  %v6805_v15 = vld [vmem:[#allocation42_spill] sm:$0xff] }
 0x393   : > { %6789 = vst [vmem:[#allocation44_spill] sm:$0xff] %v5879_v58  ;;  %v2223_v51 = vadd.f32 %v2222_v21, %v2133_v10  ;;  %v6794_v21 = vld [vmem:[#allocation81_spill] sm:$0xff]  ;;  %v6806_v58 = vld [vmem:[#allocation104_spill] sm:$0xff] }
 0x394   : > { %v814_v10 = vadd.f32 %v6795_v40, %v6794_v21 }
 0x395   : > { %v2225_v50 = vpop.f32.mrf.mxu2  ;;  %2472 = vmatmul.f32.gmra.mxu1 %v5136_v14  ;;  %2712 = vmatmul.f32.gmra.mxu3 %v6790_v31 }
 0x396   : > { %2864 = vmatmul.f32.gmra.mxu0 %v5701_v18 }
 0x398   : > { %v2384_v13 = vpop.f32.mrf.mxu3 }
 0x399   : > { %v5888_v37 = vadd.f32 %v2384_v13, %v2223_v51  ;;  %v404_v13 = vld [vmem:[%s6353_s3 + $0x448] sm:$0xff] }
 0x39a   : > { %v2136_v19 = vpop.f32.mrf.mxu1  ;;  %2599 = vmatmul.f32.gmra.mxu2 %v6792_v54 }
 0x39b   : > { %6791 = vst [vmem:[#allocation110_spill] sm:$0xff] %v5888_v37  ;;  %v2226_v20 = vadd.f32 %v2225_v50, %v2136_v19  ;;  %3046 = vmatpush.msra.mxu2 %v404_v13  ;;  %v6799_v50 = vld [vmem:[#allocation36_spill] sm:$0xff]  ;;  %v388_v19 = vld [vmem:[%s6353_s3 + $0x3c8] sm:$0xff] }
 0x39c   : > { %2927 = vmatpush.msra.mxu1 %v388_v19 }
 0x39d   : > { %v2228_v14 = vpop.f32.mrf.mxu2  ;;  %2475 = vmatmul.f32.gmra.mxu1 %v5182_v6  ;;  %2715 = vmatmul.f32.gmra.mxu3 %v6793_v60  ;;  %v6798_v6 = vld [vmem:[#allocation100_spill] sm:$0xff] }
 0x39e   : > { %2867 = vmatmul.f32.gmra.mxu0 %v5744_v30  ;;  %v1070_v28 = vadd.f32 %v6798_v6, %v814_v10 }
 0x3a0   : > { %v2387_v41 = vpop.f32.mrf.mxu3 }
 0x3a1   : > { %v5899_v51 = vadd.f32 %v2387_v41, %v2226_v20  ;;  %v6800_v20 = vld [vmem:[#allocation6_spill] sm:$0xff]  ;;  %v6801_v41 = vld [vmem:[#allocation83_spill] sm:$0xff] }
 0x3a2   : > { %v2139_v61 = vpop.f32.mrf.mxu1  ;;  %2602 = vmatmul.f32.gmra.mxu2 %v6797_v46  ;;  %v1209_v21 = vadd.f32 %v6800_v20, %v1070_v28  ;;  %v6802_v46 = vld [vmem:[#allocation38_spill] sm:$0xff]  ;;  %v1883_v28 = vpop.f32.mrf.mxu0 }
 0x3a3   : > { %6796 = vst [vmem:[#allocation68_spill] sm:$0xff] %v5899_v51  ;;  %v2229_v40 = vadd.f32 %v2228_v14, %v2139_v61  ;;  %v817_v13 = vadd.f32 %v6802_v46, %v6801_v41  ;;  %v6803_v51 = vld [vmem:[#allocation31_spill] sm:$0xff]  ;;  %v403_v14 = vld [vmem:[%s6353_s3 + $0x440] sm:$0xff] }
 0x3a4   : > { %v1352_v10 = vadd.f32 %v6803_v51, %v1209_v21  ;;  %v6808_v61 = vld [vmem:[#allocation39_spill] sm:$0xff]  ;;  %v6809_v51 = vld [vmem:[#allocation4_spill] sm:$0xff]  ;;  %3047 = vmatpush.msra.mxu2 %v403_v14  ;;  %v6810_v21 = vld [vmem:[#allocation86_spill] sm:$0xff] }
 0x3a5   : > { %v2231_v54 = vpop.f32.mrf.mxu2  ;;  %2478 = vmatmul.f32.gmra.mxu1 %v5233_v12  ;;  %2718 = vmatmul.f32.gmra.mxu3 %v6799_v50  ;;  %v1071_v50 = vadd.f32 %v6806_v58, %v817_v13  ;;  %v6811_v58 = vld [vmem:[#allocation41_spill] sm:$0xff]  ;;  %v6813_v13 = vld [vmem:[#allocation27_spill] sm:$0xff] }
 0x3a6   : > { %2870 = vmatmul.f32.gmra.mxu0 %v5779_v3  ;;  %v1495_v11 = vadd.f32 %v6807_v56, %v1352_v10  ;;  %v6812_v56 = vld [vmem:[#allocation53_spill] sm:$0xff]  ;;  %v6817_v14 = vld [vmem:[#allocation55_spill] sm:$0xff] }
 0x3a7   : > { %v1210_v46 = vadd.f32 %v6809_v51, %v1071_v50 }
 0x3a8   : > { %v2390_v6 = vpop.f32.mrf.mxu3  ;;  %v1634_v41 = vadd.f32 %v6812_v56, %v1495_v11 }
 0x3a9   : > { %v5916_v37 = vadd.f32 %v2390_v6, %v2229_v40  ;;  %v820_v40 = vadd.f32 %v6811_v58, %v6810_v21  ;;  %v1353_v10 = vadd.f32 %v6813_v13, %v1210_v46  ;;  %v6818_v46 = vld [vmem:[#allocation50_spill] sm:$0xff] }
 0x3aa   : > { %v2142_v12 = vpop.f32.mrf.mxu1  ;;  %2605 = vmatmul.f32.gmra.mxu2 %v6805_v15  ;;  %v387_v15 = vld [vmem:[%s6353_s3 + $0x3c0] sm:$0xff]  ;;  %v1886_v13 = vpop.f32.mrf.mxu0 }
 0x3ab   : > { %6804 = vst [vmem:[#allocation112_spill] sm:$0xff] %v5916_v37  ;;  %v2232_v19 = vadd.f32 %v2231_v54, %v2142_v12  ;;  %v6814_v37 = vld [vmem:[#allocation14_spill] sm:$0xff]  ;;  %2928 = vmatpush.msra.mxu1 %v387_v15  ;;  %v6816_v54 = vld [vmem:[#allocation107_spill] sm:$0xff]  ;;  %v1496_v21 = vadd.f32 %v6817_v14, %v1353_v10 }
 0x3ac   : > { %v1777_v50 = vadd.f32 %v6814_v37, %v1634_v41  ;;  %v1072_v12 = vadd.f32 %v6816_v54, %v820_v40  ;;  %v6820_v41 = vld [vmem:[#allocation52_spill] sm:$0xff]  ;;  %v6823_v14 = vld [vmem:[#allocation47_spill] sm:$0xff] }
 0x3ad   : > { %v2234_v20 = vpop.f32.mrf.mxu2  ;;  %2481 = vmatmul.f32.gmra.mxu1 %v5271_v44  ;;  %2721 = vmatmul.f32.gmra.mxu3 %v6808_v61  ;;  %v6815_v61 = vld [vmem:[#allocation72_spill] sm:$0xff] }
 0x3ae   : > { %2873 = vmatmul.f32.gmra.mxu0 %v5802_v43  ;;  %v1920_v11 = vadd.f32 %v1883_v28, %v1777_v50  ;;  %v6822_v28 = vld [vmem:[#allocation48_spill] sm:$0xff] }
 0x3b0   : > { %v2393_v44 = vpop.f32.mrf.mxu3  ;;  %v1952_v40 = vadd.f32 %v5690_v33, %v1920_v11  ;;  %v6824_v11 = vld [vmem:[#allocation45_spill] sm:$0xff] }
 0x3b1   : > { %v5932_v6 = vadd.f32 %v2393_v44, %v2232_v19  ;;  %v6819_v19 = vld [vmem:[#allocation5_spill] sm:$0xff]  ;;  %v1635_v44 = vadd.f32 %v6820_v41, %v1496_v21 }
 0x3b2   : > { %v2145_v51 = vpop.f32.mrf.mxu1  ;;  %2608 = vmatmul.f32.gmra.mxu2 %v6815_v61  ;;  %v1211_v56 = vadd.f32 %v6819_v19, %v1072_v12  ;;  %v6821_v61 = vld [vmem:[#allocation46_spill] sm:$0xff]  ;;  %v386_v19 = vld [vmem:[%s6353_s3 + $0x3b8] sm:$0xff] }
 0x3b3   : > { %v2235_v37 = vadd.f32 %v2234_v20, %v2145_v51  ;;  %v1778_v50 = vadd.f32 %v6822_v28, %v1635_v44  ;;  %v5956_v51 = vmax.f32 %v1952_v40, 0.0  ;;  %2929 = vmatpush.msra.mxu1 %v386_v19 }
 0x3b4   : > { %v1354_v15 = vadd.f32 %v6821_v61, %v1211_v56 }
 0x3b5   : > { %v2237_v58 = vpop.f32.mrf.mxu2  ;;  %2484 = vmatmul.f32.gmra.mxu1 %v5316_v22  ;;  %2724 = vmatmul.f32.gmra.mxu3 %v6818_v46  ;;  %v402_v22 = vld [vmem:[%s6353_s3 + $0x438] sm:$0xff]  ;;  %v1921_v61 = vadd.f32 %v1886_v13, %v1778_v50 }
 0x3b6   : > { %2876 = vmatmul.f32.gmra.mxu0 %v5823_v49  ;;  %3048 = vmatpush.msra.mxu2 %v402_v22  ;;  %v1497_v20 = vadd.f32 %v5519_v53, %v1354_v15  ;;  %v1889_v15 = vpop.f32.mrf.mxu0 }
 0x3b7   : > { %v1953_v53 = vadd.f32 %v5690_v33, %v1921_v61 }
 0x3b8   : > { %v2396_v54 = vpop.f32.mrf.mxu3 }
 0x3b9   : > { %v5948_v10 = vadd.f32 %v2396_v54, %v2235_v37  ;;  %v6825_v37 = vld [vmem:[#allocation76_spill] sm:$0xff]  ;;  %v6826_v54 = vld [vmem:[#allocation57_spill] sm:$0xff]  ;;  %v5970_v28 = vmax.f32 %v1953_v53, 0.0 }
 0x3ba   : > { %v2148_v12 = vpop.f32.mrf.mxu1  ;;  %2611 = vmatmul.f32.gmra.mxu2 %v6823_v14  ;;  %v1636_v41 = vadd.f32 %v6825_v37, %v1497_v20  ;;  %v6828_v37 = vld [vmem:[#allocation93_spill] sm:$0xff] }
 0x3bb   : > { %v2238_v56 = vadd.f32 %v2237_v58, %v2148_v12  ;;  %v6827_v58 = vld [vmem:[#allocation89_spill] sm:$0xff]  ;;  %v401_v12 = vld [vmem:[%s6353_s3 + $0x430] sm:$0xff] }
 0x3bc   : > { %3049 = vmatpush.msra.mxu2 %v401_v12  ;;  %v6832_v12 = vld [vmem:[#allocation11_spill] sm:$0xff] }
 0x3bd   : > { %v2240_v21 = vpop.f32.mrf.mxu2  ;;  %2487 = vmatmul.f32.gmra.mxu1 %v5358_v7  ;;  %2727 = vmatmul.f32.gmra.mxu3 %v6824_v11  ;;  %v1779_v7 = vadd.f32 %v5543_v25, %v1636_v41 }
 0x3be   : > { %2879 = vmatmul.f32.gmra.mxu0 %v5956_v51 }
 0x3bf   : > { %v1922_v22 = vadd.f32 %v1889_v15, %v1779_v7 }
 0x3c0   : > { %v2399_v44 = vpop.f32.mrf.mxu3 }
 0x3c1   : > { %v5966_v13 = vadd.f32 %v2399_v44, %v2238_v56  ;;  %v1954_v25 = vadd.f32 %v5690_v33, %v1922_v22  ;;  %v385_v56 = vld [vmem:[%s6353_s3 + $0x3b0] sm:$0xff]  ;;  %v6830_v44 = vld [vmem:[#allocation7_spill] sm:$0xff] }
 0x3c2   : > { %v2151_v40 = vpop.f32.mrf.mxu1  ;;  %2614 = vmatmul.f32.gmra.mxu2 %v6826_v54  ;;  %2930 = vmatpush.msra.mxu1 %v385_v56 }
 0x3c3   : > { %v2241_v20 = vadd.f32 %v2240_v21, %v2151_v40  ;;  %v5985_v41 = vmax.f32 %v1954_v25, 0.0  ;;  %v5989_v21 = vpop.f32.mrf.mxu0  ;;  %v400_v40 = vld [vmem:[%s6353_s3 + $0x428] sm:$0xff] }
 0x3c4   : > { %6831 = vst [vmem:[#allocation56_spill] sm:$0xff] %v5989_v21  ;;  %3050 = vmatpush.msra.mxu2 %v400_v40  ;;  %v6836_v40 = vld [vmem:[#allocation34_spill] sm:$0xff] }
 0x3c5   : > { %v2243_v50 = vpop.f32.mrf.mxu2  ;;  %2490 = vmatmul.f32.gmra.mxu1 %v5389_v29  ;;  %2730 = vmatmul.f32.gmra.mxu3 %v6827_v58  ;;  %6829 = vst [vmem:[#allocation85_spill] sm:$0xff] %v5985_v41 }
 0x3c6   : > { %2882 = vmatmul.f32.gmra.mxu0 %v5970_v28 }
 0x3c8   : > { %v2402_v61 = vpop.f32.mrf.mxu3 }
 0x3c9   : > { %v5979_v19 = vadd.f32 %v2402_v61, %v2241_v20 }
 0x3ca   : > { %v2154_v29 = vpop.f32.mrf.mxu1  ;;  %2617 = vmatmul.f32.gmra.mxu2 %v6828_v37 }
 0x3cb   : > { %v2244_v33 = vadd.f32 %v2243_v50, %v2154_v29  ;;  %v384_v50 = vld [vmem:[%s6353_s3 + $0x3a8] sm:$0xff] }
 0x3cc   : > { %2931 = vmatpush.msra.mxu1 %v384_v50 }
 0x3cd   : > { %v2246_v53 = vpop.f32.mrf.mxu2  ;;  %2493 = vmatmul.f32.gmra.mxu1 %v5426_v8  ;;  %2733 = vmatmul.f32.gmra.mxu3 %v6830_v44  ;;  %v6833_v8 = vld [vmem:[#allocation26_spill] sm:$0xff] }
 0x3ce   : > { %2885 = vmatmul.f32.gmra.mxu0 %v5985_v41 }
 0x3d0   : > { %v2405_v15 = vpop.f32.mrf.mxu3 }
 0x3d1   : > { %v5992_v7 = vadd.f32 %v2405_v15, %v2244_v33  ;;  %v6835_v33 = vld [vmem:[#allocation79_spill] sm:$0xff] }
 0x3d2   : > { %v2157_v22 = vpop.f32.mrf.mxu1  ;;  %2620 = vmatmul.f32.gmra.mxu2 %v6832_v12 }
 0x3d3   : > { %v2247_v25 = vadd.f32 %v2246_v53, %v2157_v22  ;;  %v383_v53 = vld [vmem:[%s6353_s3 + $0x3a0] sm:$0xff] }
 0x3d4   : > { %2932 = vmatpush.msra.mxu1 %v383_v53 }
 0x3d5   : > { %v2249_v20 = vpop.f32.mrf.mxu2  ;;  %2496 = vmatmul.f32.gmra.mxu1 %v5454_v39  ;;  %2736 = vmatmul.f32.gmra.mxu3 %v6833_v8  ;;  %v399_v39 = vld [vmem:[%s6353_s3 + $0x420] sm:$0xff] }
 0x3d6   : > { %3051 = vmatpush.msra.mxu2 %v399_v39 }
 0x3d8   : > { %v2408_v61 = vpop.f32.mrf.mxu3 }
 0x3d9   : > { %v6003_v56 = vadd.f32 %v2408_v61, %v2247_v25  ;;  %v6837_v25 = vld [vmem:[#allocation28_spill] sm:$0xff]  ;;  %v6838_v61 = vld [vmem:[#allocation51_spill] sm:$0xff] }
 0x3da   : > { %v2160_v29 = vpop.f32.mrf.mxu1  ;;  %2623 = vmatmul.f32.gmra.mxu2 %v6835_v33 }
 0x3db   : > { %6834 = vst [vmem:[#allocation102_spill] sm:$0xff] %v6003_v56  ;;  %v2250_v41 = vadd.f32 %v2249_v20, %v2160_v29  ;;  %v6839_v29 = vld [vmem:[#allocation8_spill] sm:$0xff] }
 0x3dd   : > { %v2252_v15 = vpop.f32.mrf.mxu2  ;;  %2499 = vmatmul.f32.gmra.mxu1 %v5486_v45  ;;  %2739 = vmatmul.f32.gmra.mxu3 %v6836_v40 }
 0x3e0   : > { %v2411_v21 = vpop.f32.mrf.mxu3 }
 0x3e1   : > { %v6011_v50 = vadd.f32 %v2411_v21, %v2250_v41  ;;  %v398_v41 = vld [vmem:[%s6353_s3 + $0x418] sm:$0xff] }
 0x3e2   : > { %v2163_v22 = vpop.f32.mrf.mxu1  ;;  %2626 = vmatmul.f32.gmra.mxu2 %v6837_v25 }
 0x3e3   : > { %v2253_v33 = vadd.f32 %v2252_v15, %v2163_v22  ;;  %3052 = vmatpush.msra.mxu2 %v398_v41 }
 0x3e5   : > { %v2255_v45 = vpop.f32.mrf.mxu2  ;;  %2502 = vmatmul.f32.gmra.mxu1 %v5521_v4  ;;  %2742 = vmatmul.f32.gmra.mxu3 %v6838_v61  ;;  %v382_v4 = vld [vmem:[%s6353_s3 + $0x398] sm:$0xff] }
 0x3e6   : > { %2933 = vmatpush.msra.mxu1 %v382_v4 }
 0x3e8   : > { %v2414_v56 = vpop.f32.mrf.mxu3 }
 0x3e9   : > { %v6019_v39 = vadd.f32 %v2414_v56, %v2253_v33 }
 0x3ea   : > { %v2166_v21 = vpop.f32.mrf.mxu1  ;;  %2629 = vmatmul.f32.gmra.mxu2 %v5636_v5 }
 0x3eb   : > { %v2256_v56 = vadd.f32 %v2255_v45, %v2166_v21  ;;  %v381_v45 = vld [vmem:[%s6353_s3 + $0x390] sm:$0xff] }
 0x3ec   : > { %2934 = vmatpush.msra.mxu1 %v381_v45 }
 0x3ed   : > { %v2258_v20 = vpop.f32.mrf.mxu2  ;;  %2505 = vmatmul.f32.gmra.mxu1 %v5551_v59  ;;  %2745 = vmatmul.f32.gmra.mxu3 %v6839_v29  ;;  %v397_v59 = vld [vmem:[%s6353_s3 + $0x410] sm:$0xff] }
 0x3ee   : > { %3053 = vmatpush.msra.mxu2 %v397_v59 }
 0x3f0   : > { %v2417_v33 = vpop.f32.mrf.mxu3 }
 0x3f1   : > { %v6030_v15 = vadd.f32 %v2417_v33, %v2256_v56 }
 0x3f2   : > { %v2169_v53 = vpop.f32.mrf.mxu1  ;;  %2632 = vmatmul.f32.gmra.mxu2 %v5676_v23 }
 0x3f3   : > { %v2259_v41 = vadd.f32 %v2258_v20, %v2169_v53  ;;  %v6841_v53 = vld [vmem:[#allocation2_spill] sm:$0xff] }
 0x3f5   : > { %2508 = vmatmul.f32.gmra.mxu1 %v5581_v24  ;;  %v2585_v22 = vpop.f32.mrf.mxu2  ;;  %2748 = vmatmul.f32.gmra.mxu3 %v5639_v35  ;;  %v6840_v24 = vld [vmem:[#allocation43_spill] sm:$0xff] }
 0x3f8   : > { %v2420_v5 = vpop.f32.mrf.mxu3 }
 0x3f9   : > { %v6038_v4 = vadd.f32 %v2420_v5, %v2259_v41  ;;  %v396_v5 = vld [vmem:[%s6353_s3 + $0x408] sm:$0xff] }
 0x3fa   : > { %v2464_v21 = vpop.f32.mrf.mxu1  ;;  %2635 = vmatmul.f32.gmra.mxu2 %v5724_v38 }
 0x3fb   : > { %v2536_v56 = vadd.f32 %v2464_v21, %v6840_v24  ;;  %3054 = vmatpush.msra.mxu2 %v396_v5  ;;  %v6842_v21 = vld [vmem:[#allocation54_spill] sm:$0xff] }
 0x3fd   : > { %2511 = vmatmul.f32.gmra.mxu1 %v5616_v55  ;;  %v2588_v33 = vpop.f32.mrf.mxu2  ;;  %2751 = vmatmul.f32.gmra.mxu3 %v5679_v57  ;;  %v6047_v59 = vadd.f32 %v2585_v22, %v2536_v56  ;;  %v380_v22 = vld [vmem:[%s6353_s3 + $0x388] sm:$0xff]  ;;  %v6843_v56 = vld [vmem:[#allocation82_spill] sm:$0xff] }
 0x3fe   : > { %2935 = vmatpush.msra.mxu1 %v380_v22 }
 0x402   : > { %v2467_v20 = vpop.f32.mrf.mxu1  ;;  %2638 = vmatmul.f32.gmra.mxu2 %v5764_v48 }
 0x403   : > { %v2537_v41 = vadd.f32 %v2467_v20, %v6841_v53  ;;  %v379_v20 = vld [vmem:[%s6353_s3 + $0x380] sm:$0xff] }
 0x404   : > { %2936 = vmatpush.msra.mxu1 %v379_v20 }
 0x405   : > { %2514 = vmatmul.f32.gmra.mxu1 %v5656_v1  ;;  %v2591_v45 = vpop.f32.mrf.mxu2  ;;  %2754 = vmatmul.f32.gmra.mxu3 %v6842_v21  ;;  %v6056_v55 = vadd.f32 %v2588_v33, %v2537_v41  ;;  %v395_v33 = vld [vmem:[%s6353_s3 + $0x400] sm:$0xff] }
 0x406   : > { %3055 = vmatpush.msra.mxu2 %v395_v33 }
 0x40a   : > { %v2470_v24 = vpop.f32.mrf.mxu1  ;;  %2641 = vmatmul.f32.gmra.mxu2 %v5789_v34 }
 0x40b   : > { %v2538_v48 = vadd.f32 %v2470_v24, %v6843_v56 }
 0x40d   : > { %2517 = vmatmul.f32.gmra.mxu1 %v5701_v18  ;;  %v2594_v5 = vpop.f32.mrf.mxu2  ;;  %2757 = vmatmul.f32.gmra.mxu3 %v5767_v16  ;;  %v6065_v1 = vadd.f32 %v2591_v45, %v2538_v48 }
 0x412   : > { %v2473_v53 = vpop.f32.mrf.mxu1  ;;  %2644 = vmatmul.f32.gmra.mxu2 %v5814_v9 }
 0x413   : > { %v2539_v18 = vadd.f32 %v2473_v53, %v5746_v0  ;;  %v2562_v0 = vrot.slane %v5956_v51, 1  ;;  %v6457_v53 = vrot.slane %v5970_v28, 1 }
 0x415   : > { %2520 = vmatmul.f32.gmra.mxu1 %v5744_v30  ;;  %v2597_v41 = vpop.f32.mrf.mxu2  ;;  %2760 = vmatmul.f32.gmra.mxu3 %v5792_v47  ;;  %v6077_v48 = vadd.f32 %v2594_v5, %v2539_v18  ;;  %v6844_v30 = vrot.slane %v5823_v49, 1  ;;  %v2681_v18 = vrot.slane %v5956_v51, 2 }
 0x417   : > { %v6089_v33 = vsel %vm442_vm1, %v6844_v30, %v2562_v0 }
 0x41a   : > { %v2476_v45 = vpop.f32.mrf.mxu1  ;;  %2647 = vmatmul.f32.gmra.mxu2 %v5836_v17 }
 0x41b   : > { %v2540_v22 = vadd.f32 %v2476_v45, %v5781_v27 }
 0x41d   : > { %2523 = vmatmul.f32.gmra.mxu1 %v5779_v3  ;;  %v2600_v24 = vpop.f32.mrf.mxu2  ;;  %2763 = vmatmul.f32.gmra.mxu3 %v5817_v62  ;;  %v6083_v56 = vadd.f32 %v2597_v41, %v2540_v22  ;;  %v6102_v41 = vsel %vm442_vm1, %v2562_v0, %v6457_v53  ;;  %v6458_v0 = vrot.slane %v5970_v28, 2  ;;  %v6849_v53 = vld [vmem:[#allocation58_spill] sm:$0xff] }
 0x422   : > { %v2479_v5 = vpop.f32.mrf.mxu1  ;;  %2650 = vmatmul.f32.gmra.mxu2 %v6089_v33 }
 0x423   : > { %v2541_v20 = vadd.f32 %v2479_v5, %v5804_v32 }
 0x425   : > { %2526 = vmatmul.f32.gmra.mxu1 %v5802_v43  ;;  %v2603_v3 = vpop.f32.mrf.mxu2  ;;  %2766 = vmatmul.f32.gmra.mxu3 %v5841_v63  ;;  %v6095_v27 = vadd.f32 %v2600_v24, %v2541_v20  ;;  %v6845_v43 = vrot.slane %v5823_v49, 2 }
 0x427   : > { %v6109_v22 = vsel %vm825_vm2, %v6845_v43, %v2681_v18 }
 0x42a   : > { %v2482_v45 = vpop.f32.mrf.mxu1  ;;  %2653 = vmatmul.f32.gmra.mxu2 %v6102_v41 }
 0x42b   : > { %v2542_v32 = vadd.f32 %v2482_v45, %v5825_v52  ;;  %v6121_v52 = vsel %vm825_vm2, %v2681_v18, %v6458_v0  ;;  %v6848_v18 = vld [vmem:[#allocation40_spill] sm:$0xff] }
 0x42c   : > { %v6850_v0 = vld [vmem:[#allocation36_spill] sm:$0xff] }
 0x42d   : > { %2529 = vmatmul.f32.gmra.mxu1 %v5823_v49  ;;  %v2606_v24 = vpop.f32.mrf.mxu2  ;;  %2769 = vmatmul.f32.gmra.mxu3 %v6109_v22  ;;  %v6113_v30 = vadd.f32 %v2603_v3, %v2542_v32 }
 0x432   : > { %v2485_v5 = vpop.f32.mrf.mxu1  ;;  %3056 = vmatmul.f32.vlgmr.msra.gmra.mxu2 %v5160_v36 }
 0x433   : > { %v2543_v20 = vadd.f32 %v2485_v5, %v5849_v2 }
 0x435   : > { %2532 = vmatmul.f32.gmra.mxu1 %v5956_v51  ;;  %v2609_v49 = vpop.f32.mrf.mxu2  ;;  %2772 = vmatmul.f32.gmra.mxu3 %v6121_v52  ;;  %v6125_v45 = vadd.f32 %v2606_v24, %v2543_v20 }
 0x437   : > { %6846 = vst [vmem:[#allocation109_spill] sm:$0xff] %v6125_v45  ;;  %v6852_v45 = vld [vmem:[#allocation62_spill] sm:$0xff] }
 0x43a   : > { %v2488_v3 = vpop.f32.mrf.mxu1  ;;  %3059 = vmatmul.f32.gmra.mxu2 %v6790_v31  ;;  %v6851_v31 = vld [vmem:[#allocation44_spill] sm:$0xff] }
 0x43b   : > { %v2544_v32 = vadd.f32 %v2488_v3, %v5858_v26 }
 0x43d   : > { %v2612_v36 = vpop.f32.mrf.mxu2  ;;  %2937 = vmatmul.f32.vlgmr.msra.gmra.mxu1 %v5157_v42  ;;  %v6130_v2 = vadd.f32 %v2609_v49, %v2544_v32  ;;  %v6853_v32 = vld [vmem:[#allocation39_spill] sm:$0xff] }
 0x43f   : > { %6847 = vst [vmem:[#allocation13_spill] sm:$0xff] %v6130_v2  ;;  %v6855_v2 = vld [vmem:[#allocation64_spill] sm:$0xff] }
 0x442   : > { %v2491_v43 = vpop.f32.mrf.mxu1  ;;  %3062 = vmatmul.f32.gmra.mxu2 %v6793_v60  ;;  %v6854_v60 = vld [vmem:[#allocation110_spill] sm:$0xff] }
 0x443   : > { %v2545_v51 = vadd.f32 %v2491_v43, %v6848_v18 }
 0x445   : > { %v2615_v5 = vpop.f32.mrf.mxu2  ;;  %2940 = vmatmul.f32.gmra.mxu1 %v6849_v53  ;;  %v6135_v24 = vadd.f32 %v2612_v36, %v2545_v51 }
 0x44a   : > { %v2494_v20 = vpop.f32.mrf.mxu1  ;;  %3065 = vmatmul.f32.gmra.mxu2 %v6850_v0  ;;  %v6856_v0 = vld [vmem:[#allocation68_spill] sm:$0xff] }
 0x44b   : > { %v2546_v26 = vadd.f32 %v2494_v20, %v6851_v31  ;;  %v6857_v31 = vld [vmem:[#allocation67_spill] sm:$0xff] }
 0x44d   : > { %v2618_v3 = vpop.f32.mrf.mxu2  ;;  %2943 = vmatmul.f32.gmra.mxu1 %v6852_v45  ;;  %v6140_v42 = vadd.f32 %v2615_v5, %v2546_v26  ;;  %v6858_v26 = vld [vmem:[#allocation112_spill] sm:$0xff] }
 0x452   : > { %v2497_v49 = vpop.f32.mrf.mxu1  ;;  %3068 = vmatmul.f32.gmra.mxu2 %v6853_v32 }
 0x453   : > { %v2547_v43 = vadd.f32 %v2497_v49, %v6854_v60  ;;  %v6859_v60 = vld [vmem:[#allocation42_spill] sm:$0xff] }
 0x455   : > { %v2621_v18 = vpop.f32.mrf.mxu2  ;;  %2946 = vmatmul.f32.gmra.mxu1 %v6855_v2  ;;  %v6145_v53 = vadd.f32 %v2618_v3, %v2547_v43 }
 0x45a   : > { %v2500_v36 = vpop.f32.mrf.mxu1  ;;  %3071 = vmatmul.f32.gmra.mxu2 %v6818_v46 }
 0x45b   : > { %v2548_v51 = vadd.f32 %v2500_v36, %v6856_v0  ;;  %v6860_v36 = vld [vmem:[#allocation72_spill] sm:$0xff] }
 0x45d   : > { %v2624_v20 = vpop.f32.mrf.mxu2  ;;  %2949 = vmatmul.f32.gmra.mxu1 %v6857_v31  ;;  %v6150_v45 = vadd.f32 %v2621_v18, %v2548_v51 }
 0x462   : > { %v2503_v5 = vpop.f32.mrf.mxu1  ;;  %3074 = vmatmul.f32.gmra.mxu2 %v6824_v11 }
 0x463   : > { %v2549_v49 = vadd.f32 %v2503_v5, %v6858_v26 }
 0x465   : > { %v2627_v32 = vpop.f32.mrf.mxu2  ;;  %2952 = vmatmul.f32.gmra.mxu1 %v6859_v60  ;;  %v6155_v2 = vadd.f32 %v2624_v20, %v2549_v49 }
 0x46a   : > { %v2506_v3 = vpop.f32.mrf.mxu1  ;;  %3077 = vmatmul.f32.gmra.mxu2 %v6827_v58 }
 0x46b   : > { %v2550_v46 = vadd.f32 %v2506_v3, %v5932_v6 }
 0x46d   : > { %v2630_v43 = vpop.f32.mrf.mxu2  ;;  %2955 = vmatmul.f32.gmra.mxu1 %v6860_v36  ;;  %v6160_v18 = vadd.f32 %v2627_v32, %v2550_v46  ;;  %v2817_v32 = vpop.f32.mrf.mxu0  ;;  %v6862_v36 = vld [vmem:[#allocation79_spill] sm:$0xff] }
 0x472   : > { %v2509_v0 = vpop.f32.mrf.mxu1  ;;  %3080 = vmatmul.f32.gmra.mxu2 %v6830_v44  ;;  %v2704_v44 = vpop.f32.mrf.mxu3 }
 0x473   : > { %v2551_v11 = vadd.f32 %v2509_v0, %v5948_v10 }
 0x475   : > { %v2633_v51 = vpop.f32.mrf.mxu2  ;;  %2958 = vmatmul.f32.gmra.mxu1 %v6823_v14  ;;  %v6165_v20 = vadd.f32 %v2630_v43, %v2551_v11 }
 0x47a   : > { %v2512_v31 = vpop.f32.mrf.mxu1  ;;  %3083 = vmatmul.f32.gmra.mxu2 %v6833_v8 }
 0x47b   : > { %v2552_v6 = vadd.f32 %v2512_v31, %v5966_v13 }
 0x47d   : > { %v2636_v58 = vpop.f32.mrf.mxu2  ;;  %2961 = vmatmul.f32.gmra.mxu1 %v6826_v54  ;;  %v6170_v5 = vadd.f32 %v2633_v51, %v2552_v6  ;;  %v2707_v54 = vpop.f32.mrf.mxu3 }
 0x482   : > { %v2515_v26 = vpop.f32.mrf.mxu1  ;;  %3086 = vmatmul.f32.gmra.mxu2 %v6836_v40 }
 0x483   : > { %v2553_v10 = vadd.f32 %v2515_v26, %v5979_v19  ;;  %v6861_v19 = vld [vmem:[#allocation102_spill] sm:$0xff] }
 0x485   : > { %v2639_v49 = vpop.f32.mrf.mxu2  ;;  %2964 = vmatmul.f32.gmra.mxu1 %v6828_v37  ;;  %v6175_v14 = vadd.f32 %v2636_v58, %v2553_v10  ;;  %v2820_v37 = vpop.f32.mrf.mxu0  ;;  %v6863_v10 = vld [vmem:[#allocation65_spill] sm:$0xff] }
 0x48a   : > { %v2518_v8 = vpop.f32.mrf.mxu1  ;;  %3089 = vmatmul.f32.gmra.mxu2 %v6838_v61  ;;  %v2710_v61 = vpop.f32.mrf.mxu3 }
 0x48b   : > { %v2554_v13 = vadd.f32 %v2518_v8, %v5992_v7 }
 0x48d   : > { %v2642_v60 = vpop.f32.mrf.mxu2  ;;  %2967 = vmatmul.f32.gmra.mxu1 %v6832_v12  ;;  %v6180_v3 = vadd.f32 %v2639_v49, %v2554_v13 }
 0x492   : > { %v2521_v40 = vpop.f32.mrf.mxu1  ;;  %3092 = vmatmul.f32.gmra.mxu2 %v6839_v29  ;;  %v2823_v29 = vpop.f32.mrf.mxu0 }
 0x493   : > { %v2555_v46 = vadd.f32 %v2521_v40, %v6861_v19  ;;  %v2713_v31 = vpop.f32.mrf.mxu3  ;;  %v2776_v19 = vadd.f32 %v2704_v44, %v6047_v59  ;;  %v2777_v59 = vadd.f32 %v2707_v54, %v6056_v55  ;;  %v2778_v54 = vadd.f32 %v2710_v61, %v6065_v1  ;;  %v6866_v1 = vld [vmem:[#allocation111_spill] sm:$0xff] }
 0x495   : > { %v2645_v43 = vpop.f32.mrf.mxu2  ;;  %2970 = vmatmul.f32.gmra.mxu1 %v6862_v36  ;;  %v6185_v0 = vadd.f32 %v2642_v60, %v2555_v46 }
 0x49a   : > { %v2524_v11 = vpop.f32.mrf.mxu1  ;;  %3095 = vmatmul.f32.gmra.mxu2 %v5639_v35  ;;  %v2826_v35 = vpop.f32.mrf.mxu0 }
 0x49b   : > { %v2556_v7 = vadd.f32 %v2524_v11, %v6011_v50  ;;  %v6198_v50 = vpop.f32.mrf.mxu3 }
 0x49d   : > { %v2648_v12 = vpop.f32.mrf.mxu2  ;;  %2973 = vmatmul.f32.gmra.mxu1 %v6837_v25  ;;  %v6190_v51 = vadd.f32 %v2645_v43, %v2556_v7 }
 0x4a2   : > { %v2527_v6 = vpop.f32.mrf.mxu1  ;;  %3098 = vmatmul.f32.gmra.mxu2 %v5679_v57  ;;  %v6204_v57 = vpop.f32.mrf.mxu0 }
 0x4a3   : > { %v2557_v58 = vadd.f32 %v2527_v6, %v6019_v39 }
 0x4a5   : > { %v2651_v26 = vpop.f32.mrf.mxu2  ;;  %2976 = vmatmul.f32.gmra.mxu1 %v6863_v10  ;;  %v6195_v49 = vadd.f32 %v2648_v12, %v2557_v58  ;;  %v2890_v12 = vadd.f32 %v2820_v37, %v2777_v59  ;;  %v2891_v37 = vadd.f32 %v2823_v29, %v2778_v54  ;;  %v6867_v29 = vld [vmem:[#allocation37_spill] sm:$0xff] }
 0x4aa   : > { %v2530_v8 = vpop.f32.mrf.mxu1  ;;  %3101 = vmatmul.f32.gmra.mxu2 %v6842_v21  ;;  %v6209_v21 = vpop.f32.mrf.mxu3 }
 0x4ab   : > { %v2558_v25 = vadd.f32 %v2530_v8, %v6030_v15 }
 0x4ad   : > { %v2654_v13 = vpop.f32.mrf.mxu2  ;;  %2979 = vmatmul.f32.gmra.mxu1 %v5676_v23  ;;  %v6202_v60 = vadd.f32 %v2651_v26, %v2558_v25  ;;  %v2889_v23 = vadd.f32 %v2817_v32, %v2776_v19 }
 0x4b2   : > { %v2533_v39 = vpop.f32.mrf.mxu1  ;;  %3104 = vmatmul.f32.gmra.mxu2 %v5767_v16  ;;  %v6218_v16 = vld [vmem:[%s6354_s4] ss:$0 sm:$0xff]  ;;  %v6225_v7 = vpop.f32.mrf.mxu3 }
 0x4b3   : > { %v2559_v40 = vadd.f32 %v2533_v39, %v6038_v4  ;;  %v6220_v4 = vpop.f32.mrf.mxu0 }
 0x4b5   : > { %2982 = vmatmul.f32.gmra.mxu1 %v5724_v38  ;;  %v3057_v15 = vpop.f32.mrf.mxu2  ;;  %v6212_v46 = vadd.f32 %v2654_v13, %v2559_v40  ;;  %v6864_v38 = vld [vmem:[#allocation99_spill] sm:$0xff]  ;;  %v6865_v40 = vld [vmem:[#allocation10_spill] sm:$0xff] }
 0x4b6   : > { %v1355_v61 = vadd.f32 %v6866_v1, %v6865_v40 }
 0x4ba   : > { %v2938_v43 = vpop.f32.mrf.mxu1  ;;  %3107 = vmatmul.f32.gmra.mxu2 %v5792_v47  ;;  %v6240_v25 = vpop.f32.mrf.mxu3 }
 0x4bb   : > { %v3010_v36 = vadd.f32 %v2938_v43, %v2889_v23  ;;  %v6237_v10 = vpop.f32.mrf.mxu0 }
 0x4bd   : > { %v3129_v44 = vadd.f32 %v3057_v15, %v3010_v36  ;;  %2985 = vmatmul.f32.gmra.mxu1 %v6864_v38  ;;  %v3060_v11 = vpop.f32.mrf.mxu2  ;;  %v1498_v36 = vadd.f32 %v6867_v29, %v1355_v61 }
 0x4bf   : > { %v3156_v32 = vadd.f32 %v6218_v16, %v3129_v44 }
 0x4c1   : > { %v3180_v47 = vmax.f32 %v3156_v32, 0.0 }
 0x4c2   : > { %v2941_v6 = vpop.f32.mrf.mxu1  ;;  %3110 = vmatmul.f32.gmra.mxu2 %v5817_v62  ;;  %v6253_v38 = vpop.f32.mrf.mxu3 }
 0x4c3   : > { %3204 = vst [vmem:[%s6231_s16] sm:$0xff] %v3180_v47  ;;  %v3011_v55 = vadd.f32 %v2941_v6, %v2890_v12  ;;  %v6249_v43 = vpop.f32.mrf.mxu0  ;;  %v6869_v12 = vld [vmem:[#allocation96_spill] sm:$0xff] }
 0x4c5   : > { %v3130_v58 = vadd.f32 %v3060_v11, %v3011_v55  ;;  %2988 = vmatmul.f32.gmra.mxu1 %v5789_v34  ;;  %v3063_v26 = vpop.f32.mrf.mxu2  ;;  %v2779_v34 = vadd.f32 %v2713_v31, %v6077_v48  ;;  %v6868_v31 = vld [vmem:[#allocation61_spill] sm:$0xff]  ;;  %v6870_v55 = vld [vmem:[#allocation56_spill] sm:$0xff] }
 0x4c6   : > { %v1637_v11 = vadd.f32 %v6868_v31, %v1498_v36 }
 0x4c7   : > { %v3157_v8 = vadd.f32 %v6218_v16, %v3130_v58 }
 0x4c8   : > { %v1780_v6 = vadd.f32 %v6869_v12, %v1637_v11 }
 0x4c9   : > { %v3181_v13 = vmax.f32 %v3157_v8, 0.0 }
 0x4ca   : > { %v2944_v39 = vpop.f32.mrf.mxu1  ;;  %3113 = vmatmul.f32.gmra.mxu2 %v5841_v63  ;;  %v2892_v63 = vadd.f32 %v2826_v35, %v2779_v34 }
 0x4cb   : > { %3205 = vst [vmem:[%s6231_s16 + $0x8] sm:$0xff] %v3181_v13  ;;  %v3012_v62 = vadd.f32 %v2944_v39, %v2891_v37  ;;  %v2731_v37 = vpop.f32.mrf.mxu3 }
 0x4cd   : > { %v3131_v19 = vadd.f32 %v3063_v26, %v3012_v62  ;;  %2991 = vmatmul.f32.gmra.mxu1 %v5814_v9  ;;  %v3066_v15 = vpop.f32.mrf.mxu2  ;;  %v2780_v9 = vadd.f32 %v6198_v50, %v6083_v56  ;;  %v2841_v26 = vpop.f32.mrf.mxu0  ;;  %v2781_v50 = vadd.f32 %v6209_v21, %v6095_v27  ;;  %v6871_v62 = vld [vmem:[#allocation85_spill] sm:$0xff] }
 0x4ce   : > { %v3034_v40 = vrot.slane %v6871_v62, 2 }
 0x4cf   : > { %v3158_v23 = vadd.f32 %v6218_v16, %v3131_v19  ;;  %v2893_v58 = vadd.f32 %v6204_v57, %v2780_v9  ;;  %v2894_v34 = vadd.f32 %v6220_v4, %v2781_v50  ;;  %v6872_v19 = vrot.slane %v5970_v28, 2 }
 0x4d1   : > { %v3182_v59 = vmax.f32 %v3158_v23, 0.0 }
 0x4d2   : > { %v2947_v44 = vpop.f32.mrf.mxu1  ;;  %3116 = vmatmul.f32.gmra.mxu2 %v6109_v22  ;;  %v1923_v22 = vadd.f32 %v6870_v55, %v1780_v6 }
 0x4d3   : > { %3206 = vst [vmem:[%s6231_s16 + $0x10] sm:$0xff] %v3182_v59  ;;  %v3013_v48 = vadd.f32 %v2947_v44, %v2892_v63  ;;  %v2734_v63 = vpop.f32.mrf.mxu3  ;;  %v2915_v44 = vrot.slane %v6871_v62, 1 }
 0x4d5   : > { %v3132_v32 = vadd.f32 %v3066_v15, %v3013_v48  ;;  %2994 = vmatmul.f32.gmra.mxu1 %v5836_v17  ;;  %v3069_v47 = vpop.f32.mrf.mxu2  ;;  %v3570_v17 = vld [vmem:[%s6352_s2] ss:$0 sm:$0xff]  ;;  %v3035_v15 = vsel %vm825_vm2, %v6872_v19, %v3034_v40  ;;  %v2844_v21 = vpop.f32.mrf.mxu0 }
 0x4d6   : > { %v1955_v56 = vadd.f32 %v3570_v17, %v1923_v22  ;;  %v6875_v17 = vld [vmem:[#allocation13_spill] sm:$0xff] }
 0x4d7   : > { %v3159_v35 = vadd.f32 %v6218_v16, %v3132_v32  ;;  %v6874_v32 = vld [vmem:[#allocation109_spill] sm:$0xff] }
 0x4d8   : > { %v1984_v1 = vmax.f32 %v1955_v56, 0.0 }
 0x4d9   : > { %v3183_v54 = vmax.f32 %v3159_v35, 0.0 }
 0x4da   : > { %v2950_v8 = vpop.f32.mrf.mxu1  ;;  %3119 = vmatmul.f32.gmra.mxu2 %v6121_v52  ;;  %v3036_v59 = vrot.slane %v1984_v1, 2  ;;  %v2917_v55 = vrot.slane %v1984_v1, 1 }
 0x4db   : > { %3207 = vst [vmem:[%s6231_s16 + $0x18] sm:$0xff] %v3183_v54  ;;  %v3014_v13 = vadd.f32 %v2950_v8, %v2893_v58  ;;  %v2737_v22 = vpop.f32.mrf.mxu3 }
 0x4dc   : > { %v3037_v11 = vsel %vm825_vm2, %v3034_v40, %v3036_v59 }
 0x4dd   : > { %v3133_v39 = vadd.f32 %v3069_v47, %v3014_v13  ;;  %2997 = vmatmul.f32.gmra.mxu1 %v6089_v33  ;;  %v3072_v57 = vpop.f32.mrf.mxu2  ;;  %v2782_v33 = vadd.f32 %v6225_v7, %v6113_v30  ;;  %v6873_v7 = vrot.slane %v5970_v28, 1  ;;  %v2783_v47 = vadd.f32 %v6240_v25, %v6874_v32  ;;  %v2847_v35 = vpop.f32.mrf.mxu0 }
 0x4de   : > { %v2918_v13 = vsel %vm442_vm1, %v2915_v44, %v2917_v55  ;;  %v2784_v25 = vadd.f32 %v6253_v38, %v6875_v17 }
 0x4df   : > { %v3160_v52 = vadd.f32 %v6218_v16, %v3133_v39  ;;  %v2895_v31 = vadd.f32 %v6237_v10, %v2782_v33  ;;  %v2896_v58 = vadd.f32 %v6249_v43, %v2783_v47 }
 0x4e0   : > { %v2897_v40 = vadd.f32 %v2841_v26, %v2784_v25 }
 0x4e1   : > { %v3184_v61 = vmax.f32 %v3160_v52, 0.0 }
 0x4e2   : > { %v2953_v23 = vpop.f32.mrf.mxu1  ;;  %3122 = vmatmul.f32.gmra.mxu2 %v3035_v15 }
 0x4e3   : > { %3208 = vst [vmem:[%s6231_s16 + $0x20] sm:$0xff] %v3184_v61  ;;  %v3015_v27 = vadd.f32 %v2953_v23, %v2894_v34  ;;  %v2740_v1 = vpop.f32.mrf.mxu3  ;;  %v2785_v61 = vadd.f32 %v2731_v37, %v6135_v24 }
 0x4e5   : > { %v3134_v29 = vadd.f32 %v3072_v57, %v3015_v27  ;;  %3000 = vmatmul.f32.gmra.mxu1 %v6102_v41  ;;  %v3075_v36 = vpop.f32.mrf.mxu2  ;;  %v2916_v41 = vsel %vm442_vm1, %v6873_v7, %v2915_v44  ;;  %v2850_v57 = vpop.f32.mrf.mxu0  ;;  %v2898_v23 = vadd.f32 %v2844_v21, %v2785_v61  ;;  %v2787_v21 = vadd.f32 %v2737_v22, %v6145_v53 }
 0x4e7   : > { %v3161_v4 = vadd.f32 %v6218_v16, %v3134_v29 }
 0x4e9   : > { %v3185_v48 = vmax.f32 %v3161_v4, 0.0 }
 0x4ea   : > { %v2956_v9 = vpop.f32.mrf.mxu1  ;;  %3125 = vmatmul.f32.gmra.mxu2 %v3037_v11 }
 0x4eb   : > { %3209 = vst [vmem:[%s6231_s16 + $0x28] sm:$0xff] %v3185_v48  ;;  %v3016_v30 = vadd.f32 %v2956_v9, %v2895_v31  ;;  %v2743_v26 = vpop.f32.mrf.mxu3 }
 0x4ed   : > { %v3135_v12 = vadd.f32 %v3075_v36, %v3016_v30  ;;  %3003 = vmatmul.f32.gmra.mxu1 %v2916_v41  ;;  %v3078_v6 = vpop.f32.mrf.mxu2  ;;  %v2853_v27 = vpop.f32.mrf.mxu0  ;;  %v2786_v36 = vadd.f32 %v2734_v63, %v6140_v42  ;;  %v2900_v41 = vadd.f32 %v2850_v57, %v2787_v21 }
 0x4ef   : > { %v3162_v10 = vadd.f32 %v6218_v16, %v3135_v12  ;;  %v2899_v37 = vadd.f32 %v2847_v35, %v2786_v36  ;;  %v2788_v12 = vadd.f32 %v2740_v1, %v6150_v45 }
 0x4f1   : > { %v3186_v54 = vmax.f32 %v3162_v10, 0.0 }
 0x4f2   : > { %v2959_v8 = vpop.f32.mrf.mxu1 }
 0x4f3   : > { %3210 = vst [vmem:[%s6231_s16 + $0x30] sm:$0xff] %v3186_v54  ;;  %v3017_v28 = vadd.f32 %v2959_v8, %v2896_v58  ;;  %v2746_v7 = vpop.f32.mrf.mxu3  ;;  %v2901_v54 = vadd.f32 %v2853_v27, %v2788_v12 }
 0x4f5   : > { %v3136_v56 = vadd.f32 %v3078_v6, %v3017_v28  ;;  %3006 = vmatmul.f32.gmra.mxu1 %v2918_v13  ;;  %v3081_v50 = vpop.f32.mrf.mxu2  ;;  %v2856_v11 = vpop.f32.mrf.mxu0  ;;  %v2789_v28 = vadd.f32 %v2743_v26, %v6155_v2 }
 0x4f7   : > { %v3163_v39 = vadd.f32 %v6218_v16, %v3136_v56 }
 0x4f9   : > { %v3187_v62 = vmax.f32 %v3163_v39, 0.0 }
 0x4fa   : > { %v2962_v52 = vpop.f32.mrf.mxu1 }
 0x4fb   : > { %3211 = vst [vmem:[%s6231_s16 + $0x38] sm:$0xff] %v3187_v62  ;;  %v3018_v43 = vadd.f32 %v2962_v52, %v2897_v40  ;;  %v2749_v53 = vpop.f32.mrf.mxu3  ;;  %v2790_v40 = vadd.f32 %v2746_v7, %v6160_v18 }
 0x4fd   : > { %v3137_v34 = vadd.f32 %v3081_v50, %v3018_v43  ;;  %v3084_v19 = vpop.f32.mrf.mxu2  ;;  %v2859_v10 = vpop.f32.mrf.mxu0  ;;  %v2902_v50 = vadd.f32 %v2856_v11, %v2789_v28 }
 0x4fe   : > { %v2903_v61 = vadd.f32 %v2859_v10, %v2790_v40 }
 0x4ff   : > { %v3164_v38 = vadd.f32 %v6218_v16, %v3137_v34 }
 0x501   : > { %v3188_v15 = vmax.f32 %v3164_v38, 0.0 }
 0x502   : > { %v2965_v33 = vpop.f32.mrf.mxu1 }
 0x503   : > { %3212 = vst [vmem:[%s6231_s16 + $0x40] sm:$0xff] %v3188_v15  ;;  %v3019_v29 = vadd.f32 %v2965_v33, %v2898_v23  ;;  %v2752_v57 = vpop.f32.mrf.mxu3  ;;  %v2791_v15 = vadd.f32 %v2749_v53, %v6165_v20 }
 0x505   : > { %v3138_v59 = vadd.f32 %v3084_v19, %v3019_v29  ;;  %v3087_v4 = vpop.f32.mrf.mxu2  ;;  %v2862_v45 = vpop.f32.mrf.mxu0 }
 0x506   : > { %v2904_v36 = vadd.f32 %v2862_v45, %v2791_v15 }
 0x507   : > { %v3165_v44 = vadd.f32 %v6218_v16, %v3138_v59 }
 0x509   : > { %v3189_v24 = vmax.f32 %v3165_v44, 0.0  ;;  %v2792_v44 = vadd.f32 %v2752_v57, %v6170_v5 }
 0x50a   : > { %v2968_v48 = vpop.f32.mrf.mxu1 }
 0x50b   : > { %3213 = vst [vmem:[%s6231_s16 + $0x48] sm:$0xff] %v3189_v24  ;;  %v3020_v31 = vadd.f32 %v2968_v48, %v2899_v37  ;;  %v2755_v23 = vpop.f32.mrf.mxu3 }
 0x50d   : > { %v3139_v9 = vadd.f32 %v3087_v4, %v3020_v31  ;;  %v3090_v30 = vpop.f32.mrf.mxu2  ;;  %v2865_v34 = vpop.f32.mrf.mxu0 }
 0x50e   : > { %v2905_v11 = vadd.f32 %v2865_v34, %v2792_v44 }
 0x50f   : > { %v3166_v42 = vadd.f32 %v6218_v16, %v3139_v9 }
 0x511   : > { %v3190_v63 = vmax.f32 %v3166_v42, 0.0 }
 0x512   : > { %v2971_v32 = vpop.f32.mrf.mxu1 }
 0x513   : > { %3214 = vst [vmem:[%s6231_s16 + $0x50] sm:$0xff] %v3190_v63  ;;  %v3021_v47 = vadd.f32 %v2971_v32, %v2900_v41  ;;  %v2758_v48 = vpop.f32.mrf.mxu3 }
 0x515   : > { %v3140_v6 = vadd.f32 %v3090_v30, %v3021_v47  ;;  %v3093_v35 = vpop.f32.mrf.mxu2  ;;  %v2868_v4 = vpop.f32.mrf.mxu0  ;;  %v2793_v30 = vadd.f32 %v2755_v23, %v6175_v14 }
 0x517   : > { %v3167_v55 = vadd.f32 %v6218_v16, %v3140_v6  ;;  %v2906_v47 = vadd.f32 %v2868_v4, %v2793_v30 }
 0x519   : > { %v3191_v22 = vmax.f32 %v3167_v55, 0.0 }
 0x51a   : > { %v2974_v58 = vpop.f32.mrf.mxu1 }
 0x51b   : > { %3215 = vst [vmem:[%s6231_s16 + $0x58] sm:$0xff] %v3191_v22  ;;  %v3022_v8 = vadd.f32 %v2974_v58, %v2901_v54  ;;  %v2761_v5 = vpop.f32.mrf.mxu3 }
 0x51d   : > { %v3141_v13 = vadd.f32 %v3093_v35, %v3022_v8  ;;  %v3096_v17 = vpop.f32.mrf.mxu2  ;;  %v2871_v63 = vpop.f32.mrf.mxu0  ;;  %v2794_v35 = vadd.f32 %v2758_v48, %v6180_v3 }
 0x51f   : > { %v3168_v25 = vadd.f32 %v6218_v16, %v3141_v13  ;;  %v2907_v54 = vadd.f32 %v2871_v63, %v2794_v35  ;;  %v2795_v13 = vadd.f32 %v2761_v5, %v6185_v0 }
 0x521   : > { %v3192_v56 = vmax.f32 %v3168_v25, 0.0 }
 0x522   : > { %v2977_v39 = vpop.f32.mrf.mxu1 }
 0x523   : > { %3216 = vst [vmem:[%s6231_s16 + $0x60] sm:$0xff] %v3192_v56  ;;  %v3023_v62 = vadd.f32 %v2977_v39, %v2902_v50  ;;  %v2764_v8 = vpop.f32.mrf.mxu3 }
 0x525   : > { %v3142_v52 = vadd.f32 %v3096_v17, %v3023_v62  ;;  %v3099_v1 = vpop.f32.mrf.mxu2  ;;  %v2874_v14 = vpop.f32.mrf.mxu0  ;;  %v2796_v62 = vadd.f32 %v2764_v8, %v6190_v51 }
 0x526   : > { %v2908_v56 = vadd.f32 %v2874_v14, %v2795_v13 }
 0x527   : > { %v3169_v43 = vadd.f32 %v6218_v16, %v3142_v52 }
 0x529   : > { %v3193_v2 = vmax.f32 %v3169_v43, 0.0 }
 0x52a   : > { %v2980_v19 = vpop.f32.mrf.mxu1 }
 0x52b   : > { %3217 = vst [vmem:[%s6231_s16 + $0x68] sm:$0xff] %v3193_v2  ;;  %v3024_v38 = vadd.f32 %v2980_v19, %v2903_v61  ;;  %v2767_v40 = vpop.f32.mrf.mxu3 }
 0x52d   : > { %v3143_v27 = vadd.f32 %v3099_v1, %v3024_v38  ;;  %v3102_v33 = vpop.f32.mrf.mxu2  ;;  %v2877_v50 = vpop.f32.mrf.mxu0  ;;  %v2797_v38 = vadd.f32 %v2767_v40, %v6195_v49 }
 0x52e   : > { %v2909_v2 = vadd.f32 %v2877_v50, %v2796_v62 }
 0x52f   : > { %v3170_v29 = vadd.f32 %v6218_v16, %v3143_v27 }
 0x531   : > { %v3194_v18 = vmax.f32 %v3170_v29, 0.0 }
 0x532   : > { %v2983_v26 = vpop.f32.mrf.mxu1 }
 0x533   : > { %3218 = vst [vmem:[%s6231_s16 + $0x70] sm:$0xff] %v3194_v18  ;;  %v3025_v59 = vadd.f32 %v2983_v26, %v2904_v36  ;;  %v2770_v23 = vpop.f32.mrf.mxu3 }
 0x534   : > { %v2798_v26 = vadd.f32 %v2770_v23, %v6202_v60 }
 0x535   : > { %v3144_v24 = vadd.f32 %v3102_v33, %v3025_v59  ;;  %v3105_v37 = vpop.f32.mrf.mxu2  ;;  %v2880_v19 = vpop.f32.mrf.mxu0 }
 0x536   : > { %v2910_v29 = vadd.f32 %v2880_v19, %v2797_v38 }
 0x537   : > { %v3171_v20 = vadd.f32 %v6218_v16, %v3144_v24 }
 0x539   : > { %v3195_v31 = vmax.f32 %v3171_v20, 0.0 }
 0x53a   : > { %v2986_v21 = vpop.f32.mrf.mxu1 }
 0x53b   : > { %3219 = vst [vmem:[%s6231_s16 + $0x78] sm:$0xff] %v3195_v31  ;;  %v3026_v9 = vadd.f32 %v2986_v21, %v2905_v11  ;;  %v2773_v24 = vpop.f32.mrf.mxu3 }
 0x53c   : > { %v2799_v11 = vadd.f32 %v2773_v24, %v6212_v46 }
 0x53d   : > { %v3145_v7 = vadd.f32 %v3105_v37, %v3026_v9  ;;  %v3108_v42 = vpop.f32.mrf.mxu2  ;;  %v2883_v4 = vpop.f32.mrf.mxu0 }
 0x53e   : > { %v2911_v37 = vadd.f32 %v2883_v4, %v2798_v26 }
 0x53f   : > { %v3172_v41 = vadd.f32 %v6218_v16, %v3145_v7 }
 0x541   : > { %v3196_v32 = vmax.f32 %v3172_v41, 0.0 }
 0x542   : > { %v2989_v12 = vpop.f32.mrf.mxu1 }
 0x543   : > { %3220 = vst [vmem:[%s6231_s16 + $0x80] sm:$0xff] %v3196_v32  ;;  %v3027_v6 = vadd.f32 %v2989_v12, %v2906_v47 }
 0x545   : > { %v3146_v10 = vadd.f32 %v3108_v42, %v3027_v6  ;;  %v3111_v55 = vpop.f32.mrf.mxu2  ;;  %v2886_v30 = vpop.f32.mrf.mxu0 }
 0x546   : > { %v2912_v7 = vadd.f32 %v2886_v30, %v2799_v11 }
 0x547   : > { %v3173_v53 = vadd.f32 %v6218_v16, %v3146_v10 }
 0x549   : > { %v3197_v22 = vmax.f32 %v3173_v53, 0.0 }
 0x54a   : > { %v2992_v58 = vpop.f32.mrf.mxu1 }
 0x54b   : > { %3221 = vst [vmem:[%s6231_s16 + $0x88] sm:$0xff] %v3197_v22  ;;  %v3028_v28 = vadd.f32 %v2992_v58, %v2907_v54 }
 0x54d   : > { %v3147_v17 = vadd.f32 %v3111_v55, %v3028_v28  ;;  %v3114_v25 = vpop.f32.mrf.mxu2 }
 0x54f   : > { %v3174_v45 = vadd.f32 %v6218_v16, %v3147_v17 }
 0x551   : > { %v3198_v3 = vmax.f32 %v3174_v45, 0.0 }
 0x552   : > { %v2995_v39 = vpop.f32.mrf.mxu1 }
 0x553   : > { %3222 = vst [vmem:[%s6231_s16 + $0x90] sm:$0xff] %v3198_v3  ;;  %v3029_v57 = vadd.f32 %v2995_v39, %v2908_v56 }
 0x555   : > { %v3148_v52 = vadd.f32 %v3114_v25, %v3029_v57  ;;  %v3117_v1 = vpop.f32.mrf.mxu2 }
 0x557   : > { %v3175_v43 = vadd.f32 %v6218_v16, %v3148_v52 }
 0x559   : > { %v3199_v0 = vmax.f32 %v3175_v43, 0.0 }
 0x55a   : > { %v2998_v61 = vpop.f32.mrf.mxu1 }
 0x55b   : > { %3223 = vst [vmem:[%s6231_s16 + $0x98] sm:$0xff] %v3199_v0  ;;  %v3030_v34 = vadd.f32 %v2998_v61, %v2909_v2 }
 0x55d   : > { %v3149_v15 = vadd.f32 %v3117_v1, %v3030_v34  ;;  %v3120_v51 = vpop.f32.mrf.mxu2 }
 0x55f   : > { %v3176_v27 = vadd.f32 %v6218_v16, %v3149_v15 }
 0x561   : > { %v3200_v33 = vmax.f32 %v3176_v27, 0.0 }
 0x562   : > { %v3001_v18 = vpop.f32.mrf.mxu1 }
 0x563   : > { %3224 = vst [vmem:[%s6231_s16 + $0xa0] sm:$0xff] %v3200_v33  ;;  %v3031_v36 = vadd.f32 %v3001_v18, %v2910_v29 }
 0x565   : > { %v3150_v59 = vadd.f32 %v3120_v51, %v3031_v36  ;;  %v3123_v48 = vpop.f32.mrf.mxu2 }
 0x567   : > { %v3177_v44 = vadd.f32 %v6218_v16, %v3150_v59 }
 0x569   : > { %v3201_v49 = vmax.f32 %v3177_v44, 0.0 }
 0x56a   : > { %v3004_v20 = vpop.f32.mrf.mxu1 }
 0x56b   : > { %3225 = vst [vmem:[%s6231_s16 + $0xa8] sm:$0xff] %v3201_v49  ;;  %v3032_v31 = vadd.f32 %v3004_v20, %v2911_v37 }
 0x56d   : > { %v3151_v21 = vadd.f32 %v3123_v48, %v3032_v31  ;;  %v3126_v41 = vpop.f32.mrf.mxu2 }
 0x56f   : > { %v3178_v9 = vadd.f32 %v6218_v16, %v3151_v21 }
 0x571   : > { %v3202_v60 = vmax.f32 %v3178_v9, 0.0 }
 0x572   : > { %v3007_v42 = vpop.f32.mrf.mxu1 }
 0x573   : > { %3226 = vst [vmem:[%s6231_s16 + $0xb0] sm:$0xff] %v3202_v60  ;;  %v3033_v63 = vadd.f32 %v3007_v42, %v2912_v7 }
 0x575   : > { %v3152_v5 = vadd.f32 %v3126_v41, %v3033_v63 }
 0x577   : > { %v3179_v32 = vadd.f32 %v6218_v16, %v3152_v5 }
 0x579   : > { %v3203_v47 = vmax.f32 %v3179_v32, 0.0 }
 0x57b   : > { %3227 = vst [vmem:[%s6231_s16 + $0xb8] sm:$0xff] %v3203_v47 }
 0x57c PF: > { %s15_s18 = sadd.s32 1, %s3577_s18  }
 0x57d   : > { %p12_p4 = scmp.ge.s32.totalorder %s15_s18, 4  }
 0x57f   :  { %14 = sbr.rel (!%p12_p4) target bundleno = 1 (0x1), region = 70 }

</bundles_post_ra>
